<compile_context>
chip_gen: v7x
topology: tpu7x:2x2x1
jax: 0.10.0
libtpu: 0.0.40
codegen_flags: <defaults>
</compile_context>

<pallas_src>
import functools

import jax
import jax.numpy as jnp
import numpy as np
from jax.experimental import pallas as pl
from jax.experimental.pallas import tpu as pltpu


def _round_up(x, m):
    return ((x + m - 1) // m) * m


# ------------------------------ Pallas kernel ------------------------------ #

def _residual_block_kernel(x_ref, mask_ref, w1_ref, b1_ref, w2_ref, b2_ref, *rest,
                           taps, k1, k2, res_off, y1_off, has_ds):
    """Fused conv1+bn1+relu1 -> conv2+bn2+relu2 -> (+ residual/downsample) -> relu.

    x_ref    : (Cin, Ltot)  bf16  flattened zero-padded input slab for one batch element
    mask_ref : (1, M)       f32   1.0 at valid flat base positions, 0.0 at halo/garbage
    w*_ref   : (Cout, Kpad) bf16  folded (conv*BNscale) weights, K zero-padded to 128-mult
    b*_ref   : (Cout, 1)    f32   folded BN biases
    rest     : [wds, bds,]  out (Cout, M), p1 (K1p, M), y1p (Cout, L2), p2 (K2p, M)
    """
    if has_ds:
        wds_ref, bds_ref, out_ref, p1_ref, y1p_ref, p2_ref = rest
    else:
        out_ref, p1_ref, y1p_ref, p2_ref = rest

    cin = x_ref.shape[0]
    cmid = y1p_ref.shape[0]
    m = mask_ref.shape[1]

    # ---- conv1 im2col: each (kt,kh,kw) tap is a pure lane-offset slice of the slab ----
    for t, s in enumerate(taps):
        p1_ref[t * cin:(t + 1) * cin, :] = x_ref[:, s:s + m]
    if k1 < p1_ref.shape[0]:                       # zero the K padding rows
        p1_ref[k1:, :] = jnp.zeros((p1_ref.shape[0] - k1, m), p1_ref.dtype)

    y1 = jnp.dot(w1_ref[...], p1_ref[...], preferred_element_type=jnp.float32)
    y1 = jnp.maximum(y1 + b1_ref[...], 0.0)        # folded bn1 + relu1
    # TODO(synk): dropout1/dropout2 omitted — eval-mode identity.

    # ---- scatter masked conv1 output into conv2's zero-padded flattened layout (VMEM) ----
    y1p_ref[...] = jnp.zeros(y1p_ref.shape, y1p_ref.dtype)
    y1p_ref[:, y1_off:y1_off + m] = (y1 * mask_ref[...]).astype(y1p_ref.dtype)

    # ---- conv2 im2col from the VMEM-resident padded intermediate ----
    base2 = y1_off - res_off
    for t, s in enumerate(taps):
        p2_ref[t * cmid:(t + 1) * cmid, :] = y1p_ref[:, base2 + s:base2 + s + m]
    if k2 < p2_ref.shape[0]:
        p2_ref[k2:, :] = jnp.zeros((p2_ref.shape[0] - k2, m), p2_ref.dtype)

    y2 = jnp.dot(w2_ref[...], p2_ref[...], preferred_element_type=jnp.float32)
    y2 = jnp.maximum(y2 + b2_ref[...], 0.0)        # folded bn2 + relu2

    # ---- residual path: same flat base layout, sliced from the resident input slab ----
    res = x_ref[:, res_off:res_off + m]
    if has_ds:                                     # 1x1x1 conv + folded BN
        res = jnp.dot(wds_ref[...], res, preferred_element_type=jnp.float32) + bds_ref[...]
    else:
        res = res.astype(jnp.float32)
    out_ref[...] = jnp.maximum(y2 + res, 0.0).astype(out_ref.dtype)


# --------------------------------- wrapper ---------------------------------- #

def _fold_conv_bn(w_oidhw, scale, k_pad, dtype):
    """(Cout,Cin,KT,KH,KW) -> (Cout, k_pad): BN scale folded, K zero-padded, tap-major K."""
    cout, cin, kt, kh, kw = w_oidhw.shape
    w = jnp.transpose(w_oidhw, (0, 2, 3, 4, 1)).reshape(cout, kt * kh * kw * cin)
    w = w * scale.reshape(cout, 1)
    w = jnp.pad(w, ((0, 0), (0, k_pad - w.shape[1])))
    return w.astype(dtype)


def residual_block(x_ncdhw, params, *, kernel_size, dilation,
                   compute_dtype=jnp.bfloat16):
    """Forward of ResidualBlock. Input/output in PyTorch NCDHW layout."""
    N, Cin, D, H, W = x_ncdhw.shape
    w1 = params["w1"]
    Cout, _, KT, KH, KW = w1.shape
    assert KT == kernel_size and (KH, KW) == (3, 3)
    assert KT % 2 == 1, "shape-preserving conv requires an odd temporal kernel"
    has_ds = "w_ds" in params
    if not has_ds:
        assert Cin == Cout, "identity residual requires in_channels == out_channels"

    pt = (KT - 1) * dilation // 2                  # PyTorch 'same' padding (odd KT)
    Dp, Hp, Wp = D + 2 * pt, H + 2, W + 2
    plane = Hp * Wp
    assert D + 2 * pt - dilation * (KT - 1) == D   # depth-preserving

    max_shift = (KT - 1) * dilation * plane + (KH - 1) * Wp + (KW - 1)
    M = _round_up(D * plane, 128)                  # lane-dense matmul N dim
    Ltot = _round_up(M + max_shift, 128)           # flattened padded input length
    res_off = pt * plane + Wp + 1                  # flat offset of padded center (0,0,0)
    y1_off = _round_up(res_off, 128)               # 128-aligned store offset for conv1 out
    L2 = _round_up((y1_off - res_off) + M + max_shift, 128)
    K1, K2 = KT * KH * KW * Cin, KT * KH * KW * Cout
    K1p, K2p = _round_up(K1, 128), _round_up(K2, 128)

    # one flattened, zero-padded, bf16 input slab per batch element (single DMA per step)
    xp = jnp.pad(x_ncdhw, ((0, 0), (0, 0), (pt, pt), (1, 1), (1, 1)))
    xflat = xp.reshape(N, Cin, Dp * plane)
    xflat = jnp.pad(xflat, ((0, 0), (0, 0), (0, Ltot - Dp * plane))).astype(compute_dtype)

    # validity mask over flat base positions (1 where (d,h,w) is a real output position)
    o = np.arange(M)
    d_i, rem = o // plane, o % plane
    h_i, w_i = rem // Wp, rem % Wp
    mask = jnp.asarray(((d_i < D) & (h_i < H) & (w_i < W))
                       .astype(np.float32).reshape(1, M))

    w1f = _fold_conv_bn(w1, params["s1"], K1p, compute_dtype)
    w2f = _fold_conv_bn(params["w2"], params["s2"], K2p, compute_dtype)
    b1f = params["b1"].reshape(Cout, 1).astype(jnp.float32)
    b2f = params["b2"].reshape(Cout, 1).astype(jnp.float32)

    taps = tuple(kt * dilation * plane + kh * Wp + kw
                 for kt in range(KT) for kh in range(KH) for kw in range(KW))

    in_specs = [
        pl.BlockSpec((None, Cin, Ltot), lambda n: (n, 0, 0)),
        pl.BlockSpec((1, M), lambda n: (0, 0)),
        pl.BlockSpec((Cout, K1p), lambda n: (0, 0)),
        pl.BlockSpec((Cout, 1), lambda n: (0, 0)),
        pl.BlockSpec((Cout, K2p), lambda n: (0, 0)),
        pl.BlockSpec((Cout, 1), lambda n: (0, 0)),
    ]
    args = [xflat, mask, w1f, b1f, w2f, b2f]
    if has_ds:
        wds = (params["w_ds"].reshape(Cout, Cin)
               * params["s_ds"].reshape(Cout, 1)).astype(compute_dtype)
        bds = params["b_ds"].reshape(Cout, 1).astype(jnp.float32)
        in_specs += [pl.BlockSpec((Cout, Cin), lambda n: (0, 0)),
                     pl.BlockSpec((Cout, 1), lambda n: (0, 0))]
        args += [wds, bds]

    kernel = functools.partial(_residual_block_kernel, taps=taps, k1=K1, k2=K2,
                               res_off=res_off, y1_off=y1_off, has_ds=has_ds)
    out_flat = pl.pallas_call(
        kernel,
        out_shape=jax.ShapeDtypeStruct((N, Cout, M), x_ncdhw.dtype),
        grid=(N,),
        in_specs=in_specs,
        out_specs=pl.BlockSpec((None, Cout, M), lambda n: (n, 0, 0)),
        scratch_shapes=[pltpu.VMEM((K1p, M), compute_dtype),    # conv1 im2col patches
                        pltpu.VMEM((Cout, L2), compute_dtype),  # padded intermediate
                        pltpu.VMEM((K2p, M), compute_dtype)],   # conv2 im2col patches
        compiler_params=pltpu.CompilerParams(
            dimension_semantics=("parallel",),
            vmem_limit_bytes=32 * 1024 * 1024),
    )(*args)

    # keep only the real (d, h, w) positions; layout is already NCDHW -> no transpose
    out = out_flat[:, :, :D * plane].reshape(N, Cout, D, Hp, Wp)[:, :, :, :H, :W]
    return out


# ---------------------------- parameter setup ------------------------------ #

def make_params(key, in_ch, out_ch, kernel_size, eps=1e-5):
    ks = jax.random.split(key, 8)

    def conv_w(k, cout, cin, kt, kh, kw):
        fan_in = cin * kt * kh * kw
        return jax.random.normal(k, (cout, cin, kt, kh, kw), jnp.float32) / np.sqrt(fan_in)

    def bn(k, c):
        kg, kb, km, kv = jax.random.split(k, 4)
        gamma = 0.5 + jax.random.uniform(kg, (c,), jnp.float32)
        beta = 0.1 * jax.random.normal(kb, (c,), jnp.float32)
        mean = 0.1 * jax.random.normal(km, (c,), jnp.float32)
        var = 0.5 + jax.random.uniform(kv, (c,), jnp.float32)
        scale = gamma / jnp.sqrt(var + eps)             # fold eval-mode BN
        bias = beta - mean * scale
        return scale, bias

    s1, b1 = bn(ks[1], out_ch)
    s2, b2 = bn(ks[3], out_ch)
    params = {
        "w1": conv_w(ks[0], out_ch, in_ch, kernel_size, 3, 3), "s1": s1, "b1": b1,
        "w2": conv_w(ks[2], out_ch, out_ch, kernel_size, 3, 3), "s2": s2, "b2": b2,
    }
    if in_ch != out_ch:
        s_ds, b_ds = bn(ks[5], out_ch)
        params["w_ds"] = conv_w(ks[4], out_ch, in_ch, 1, 1, 1)
        params["s_ds"] = s_ds
        params["b_ds"] = b_ds
    return params


# ------------------------- pure-JAX reference ------------------------------ #

def reference_forward(x_ncdhw, p, *, kernel_size, dilation):
    pt = (kernel_size - 1) * dilation // 2

    def conv(x, w, dil_t, pad_t, pad_s):
        return jax.lax.conv_general_dilated(
            x, w, window_strides=(1, 1, 1),
            padding=((pad_t, pad_t), (pad_s, pad_s), (pad_s, pad_s)),
            rhs_dilation=(dil_t, 1, 1),
            dimension_numbers=("NCDHW", "OIDHW", "NCDHW"))

    def affine(x, s, b):
        return x * s[None, :, None, None, None] + b[None, :, None, None, None]

    o = jnp.maximum(affine(conv(x_ncdhw, p["w1"], dilation, pt, 1), p["s1"], p["b1"]), 0.0)
    o = jnp.maximum(affine(conv(o, p["w2"], dilation, pt, 1), p["s2"], p["b2"]), 0.0)
    if "w_ds" in p:
        res = affine(conv(x_ncdhw, p["w_ds"], 1, 0, 0), p["s_ds"], p["b_ds"])
    else:
        res = x_ncdhw
    return jnp.maximum(o + res, 0.0)


# --------------------------------- main ------------------------------------ #

if __name__ == "__main__":
    KERNEL_SIZE = 3

    def run_case(key, n, in_ch, out_ch, dhw, dilation):
        d, h, w = dhw
        kx, kp = jax.random.split(key)
        x = jax.random.normal(kx, (n, in_ch, d, h, w), jnp.float32)   # PyTorch NCDHW
        params = make_params(kp, in_ch, out_ch, KERNEL_SIZE)
        fwd = jax.jit(functools.partial(residual_block,
                                        kernel_size=KERNEL_SIZE, dilation=dilation))
        out = jax.block_until_ready(fwd(x, params))
        ref = reference_forward(x, params, kernel_size=KERNEL_SIZE, dilation=dilation)
        assert out.shape == (n, out_ch, d, h, w), out.shape
        # bf16 MXU operands + f32 accumulation: tolerance sized for two chained convs.
        np.testing.assert_allclose(np.asarray(out), np.asarray(ref), rtol=5e-2, atol=5e-2)

    root = jax.random.PRNGKey(0)
    key_a, key_b = jax.random.split(root)
    run_case(key_a, 2, 4, 8, (8, 8, 8), 2)   # 1x1x1 downsample + BN residual path
    run_case(key_b, 2, 8, 8, (6, 8, 8), 1)   # identity residual path
    print("KERNEL_OK")
</pallas_src>

<mosaic_0001>
module attributes {stable_mosaic.version = 11 : i64} {
  func.func @_residual_block_kernel(%arg0: i32, %arg1: memref<1x4x1408xbf16, #tpu.memory_space<vmem>>, %arg2: memref<1x896xf32, #tpu.memory_space<vmem>>, %arg3: memref<8x128xbf16, #tpu.memory_space<vmem>>, %arg4: memref<8x1xf32, #tpu.memory_space<vmem>>, %arg5: memref<8x256xbf16, #tpu.memory_space<vmem>>, %arg6: memref<8x1xf32, #tpu.memory_space<vmem>>, %arg7: memref<8x4xbf16, #tpu.memory_space<vmem>>, %arg8: memref<8x1xf32, #tpu.memory_space<vmem>>, %arg9: memref<1x8x896xf32, #tpu.memory_space<vmem>>, %arg10: memref<128x896xbf16, #tpu.memory_space<vmem>>, %arg11: memref<8x1408xbf16, #tpu.memory_space<vmem>>, %arg12: memref<256x896xbf16, #tpu.memory_space<vmem>>) attributes {dimension_semantics = [#tpu.dimension_semantics<parallel>], iteration_bounds = array<i64: 2>, scalar_prefetch = 0 : i64, scratch_operands = 3 : i64, tpu.core_type = #tpu.core_type<tc>, window_params = [{transform_indices = @transform_0, window_bounds = array<i64: 1, 4, 1408>}, {pipeline_mode = #tpu.pipeline_mode<synchronous>, transform_indices = @transform_1, window_bounds = array<i64: 1, 896>}, {pipeline_mode = #tpu.pipeline_mode<synchronous>, transform_indices = @transform_2, window_bounds = array<i64: 8, 128>}, {pipeline_mode = #tpu.pipeline_mode<synchronous>, transform_indices = @transform_3, window_bounds = array<i64: 8, 1>}, {pipeline_mode = #tpu.pipeline_mode<synchronous>, transform_indices = @transform_4, window_bounds = array<i64: 8, 256>}, {pipeline_mode = #tpu.pipeline_mode<synchronous>, transform_indices = @transform_5, window_bounds = array<i64: 8, 1>}, {pipeline_mode = #tpu.pipeline_mode<synchronous>, transform_indices = @transform_6, window_bounds = array<i64: 8, 4>}, {pipeline_mode = #tpu.pipeline_mode<synchronous>, transform_indices = @transform_7, window_bounds = array<i64: 8, 1>}, {transform_indices = @transform_8, window_bounds = array<i64: 1, 8, 896>}]} {
    %c0 = arith.constant 0 : index
    %c0_0 = arith.constant 0 : index
    %c0_1 = arith.constant 0 : index
    %0 = vector.load %arg1[%c0, %c0_0, %c0_1] : memref<1x4x1408xbf16, #tpu.memory_space<vmem>>, vector<1x4x896xbf16>
    %1 = vector.shape_cast %0 : vector<1x4x896xbf16> to vector<4x896xbf16>
    %c0_2 = arith.constant 0 : index
    %c0_3 = arith.constant 0 : index
    %2 = vector.load %arg10[%c0_2, %c0_3] : memref<128x896xbf16, #tpu.memory_space<vmem>>, vector<4x896xbf16>
    tpu.vector_store %arg10[%c0_2, %c0_3], %1 {strides = array<i32>} : memref<128x896xbf16, #tpu.memory_space<vmem>>, vector<4x896xbf16>,
    %c0_4 = arith.constant 0 : index
    %c0_5 = arith.constant 0 : index
    %c1 = arith.constant 1 : index
    %3 = vector.load %arg1[%c0_4, %c0_5, %c1] : memref<1x4x1408xbf16, #tpu.memory_space<vmem>>, vector<1x4x896xbf16>
    %4 = vector.shape_cast %3 : vector<1x4x896xbf16> to vector<4x896xbf16>
    %c4 = arith.constant 4 : index
    %c0_6 = arith.constant 0 : index
    %5 = vector.load %arg10[%c4, %c0_6] : memref<128x896xbf16, #tpu.memory_space<vmem>>, vector<4x896xbf16>
    tpu.vector_store %arg10[%c4, %c0_6], %4 {strides = array<i32>} : memref<128x896xbf16, #tpu.memory_space<vmem>>, vector<4x896xbf16>,
    %c0_7 = arith.constant 0 : index
    %c0_8 = arith.constant 0 : index
    %c2 = arith.constant 2 : index
    %6 = vector.load %arg1[%c0_7, %c0_8, %c2] : memref<1x4x1408xbf16, #tpu.memory_space<vmem>>, vector<1x4x896xbf16>
    %7 = vector.shape_cast %6 : vector<1x4x896xbf16> to vector<4x896xbf16>
    %c8 = arith.constant 8 : index
    %c0_9 = arith.constant 0 : index
    %8 = vector.load %arg10[%c8, %c0_9] : memref<128x896xbf16, #tpu.memory_space<vmem>>, vector<4x896xbf16>
    tpu.vector_store %arg10[%c8, %c0_9], %7 {strides = array<i32>} : memref<128x896xbf16, #tpu.memory_space<vmem>>, vector<4x896xbf16>,
    %c0_10 = arith.constant 0 : index
    %c0_11 = arith.constant 0 : index
    %c10 = arith.constant 10 : index
    %9 = vector.load %arg1[%c0_10, %c0_11, %c10] : memref<1x4x1408xbf16, #tpu.memory_space<vmem>>, vector<1x4x896xbf16>
    %10 = vector.shape_cast %9 : vector<1x4x896xbf16> to vector<4x896xbf16>
    %c12 = arith.constant 12 : index
    %c0_12 = arith.constant 0 : index
    %11 = vector.load %arg10[%c12, %c0_12] : memref<128x896xbf16, #tpu.memory_space<vmem>>, vector<4x896xbf16>
    tpu.vector_store %arg10[%c12, %c0_12], %10 {strides = array<i32>} : memref<128x896xbf16, #tpu.memory_space<vmem>>, vector<4x896xbf16>,
    %c0_13 = arith.constant 0 : index
    %c0_14 = arith.constant 0 : index
    %c11 = arith.constant 11 : index
    %12 = vector.load %arg1[%c0_13, %c0_14, %c11] : memref<1x4x1408xbf16, #tpu.memory_space<vmem>>, vector<1x4x896xbf16>
    %13 = vector.shape_cast %12 : vector<1x4x896xbf16> to vector<4x896xbf16>
    %c16 = arith.constant 16 : index
    %c0_15 = arith.constant 0 : index
    %14 = vector.load %arg10[%c16, %c0_15] : memref<128x896xbf16, #tpu.memory_space<vmem>>, vector<4x896xbf16>
    tpu.vector_store %arg10[%c16, %c0_15], %13 {strides = array<i32>} : memref<128x896xbf16, #tpu.memory_space<vmem>>, vector<4x896xbf16>,
    %c0_16 = arith.constant 0 : index
    %c0_17 = arith.constant 0 : index
    %c12_18 = arith.constant 12 : index
    %15 = vector.load %arg1[%c0_16, %c0_17, %c12_18] : memref<1x4x1408xbf16, #tpu.memory_space<vmem>>, vector<1x4x896xbf16>
    %16 = vector.shape_cast %15 : vector<1x4x896xbf16> to vector<4x896xbf16>
    %c20 = arith.constant 20 : index
    %c0_19 = arith.constant 0 : index
    %17 = vector.load %arg10[%c20, %c0_19] : memref<128x896xbf16, #tpu.memory_space<vmem>>, vector<4x896xbf16>
    tpu.vector_store %arg10[%c20, %c0_19], %16 {strides = array<i32>} : memref<128x896xbf16, #tpu.memory_space<vmem>>, vector<4x896xbf16>,
    %c0_20 = arith.constant 0 : index
    %c0_21 = arith.constant 0 : index
    %c20_22 = arith.constant 20 : index
    %18 = vector.load %arg1[%c0_20, %c0_21, %c20_22] : memref<1x4x1408xbf16, #tpu.memory_space<vmem>>, vector<1x4x896xbf16>
    %19 = vector.shape_cast %18 : vector<1x4x896xbf16> to vector<4x896xbf16>
    %c24 = arith.constant 24 : index
    %c0_23 = arith.constant 0 : index
    %20 = vector.load %arg10[%c24, %c0_23] : memref<128x896xbf16, #tpu.memory_space<vmem>>, vector<4x896xbf16>
    tpu.vector_store %arg10[%c24, %c0_23], %19 {strides = array<i32>} : memref<128x896xbf16, #tpu.memory_space<vmem>>, vector<4x896xbf16>,
    %c0_24 = arith.constant 0 : index
    %c0_25 = arith.constant 0 : index
    %c21 = arith.constant 21 : index
    %21 = vector.load %arg1[%c0_24, %c0_25, %c21] : memref<1x4x1408xbf16, #tpu.memory_space<vmem>>, vector<1x4x896xbf16>
    %22 = vector.shape_cast %21 : vector<1x4x896xbf16> to vector<4x896xbf16>
    %c28 = arith.constant 28 : index
    %c0_26 = arith.constant 0 : index
    %23 = vector.load %arg10[%c28, %c0_26] : memref<128x896xbf16, #tpu.memory_space<vmem>>, vector<4x896xbf16>
    tpu.vector_store %arg10[%c28, %c0_26], %22 {strides = array<i32>} : memref<128x896xbf16, #tpu.memory_space<vmem>>, vector<4x896xbf16>,
    %c0_27 = arith.constant 0 : index
    %c0_28 = arith.constant 0 : index
    %c22 = arith.constant 22 : index
    %24 = vector.load %arg1[%c0_27, %c0_28, %c22] : memref<1x4x1408xbf16, #tpu.memory_space<vmem>>, vector<1x4x896xbf16>
    %25 = vector.shape_cast %24 : vector<1x4x896xbf16> to vector<4x896xbf16>
    %c32 = arith.constant 32 : index
    %c0_29 = arith.constant 0 : index
    %26 = vector.load %arg10[%c32, %c0_29] : memref<128x896xbf16, #tpu.memory_space<vmem>>, vector<4x896xbf16>
    tpu.vector_store %arg10[%c32, %c0_29], %25 {strides = array<i32>} : memref<128x896xbf16, #tpu.memory_space<vmem>>, vector<4x896xbf16>,
    %c0_30 = arith.constant 0 : index
    %c0_31 = arith.constant 0 : index
    %c200 = arith.constant 200 : index
    %27 = vector.load %arg1[%c0_30, %c0_31, %c200] : memref<1x4x1408xbf16, #tpu.memory_space<vmem>>, vector<1x4x896xbf16>
    %28 = vector.shape_cast %27 : vector<1x4x896xbf16> to vector<4x896xbf16>
    %c36 = arith.constant 36 : index
    %c0_32 = arith.constant 0 : index
    %29 = vector.load %arg10[%c36, %c0_32] : memref<128x896xbf16, #tpu.memory_space<vmem>>, vector<4x896xbf16>
    tpu.vector_store %arg10[%c36, %c0_32], %28 {strides = array<i32>} : memref<128x896xbf16, #tpu.memory_space<vmem>>, vector<4x896xbf16>,
    %c0_33 = arith.constant 0 : index
    %c0_34 = arith.constant 0 : index
    %c201 = arith.constant 201 : index
    %30 = vector.load %arg1[%c0_33, %c0_34, %c201] : memref<1x4x1408xbf16, #tpu.memory_space<vmem>>, vector<1x4x896xbf16>
    %31 = vector.shape_cast %30 : vector<1x4x896xbf16> to vector<4x896xbf16>
    %c40 = arith.constant 40 : index
    %c0_35 = arith.constant 0 : index
    %32 = vector.load %arg10[%c40, %c0_35] : memref<128x896xbf16, #tpu.memory_space<vmem>>, vector<4x896xbf16>
    tpu.vector_store %arg10[%c40, %c0_35], %31 {strides = array<i32>} : memref<128x896xbf16, #tpu.memory_space<vmem>>, vector<4x896xbf16>,
    %c0_36 = arith.constant 0 : index
    %c0_37 = arith.constant 0 : index
    %c202 = arith.constant 202 : index
    %33 = vector.load %arg1[%c0_36, %c0_37, %c202] : memref<1x4x1408xbf16, #tpu.memory_space<vmem>>, vector<1x4x896xbf16>
    %34 = vector.shape_cast %33 : vector<1x4x896xbf16> to vector<4x896xbf16>
    %c44 = arith.constant 44 : index
    %c0_38 = arith.constant 0 : index
    %35 = vector.load %arg10[%c44, %c0_38] : memref<128x896xbf16, #tpu.memory_space<vmem>>, vector<4x896xbf16>
    tpu.vector_store %arg10[%c44, %c0_38], %34 {strides = array<i32>} : memref<128x896xbf16, #tpu.memory_space<vmem>>, vector<4x896xbf16>,
    %c0_39 = arith.constant 0 : index
    %c0_40 = arith.constant 0 : index
    %c210 = arith.constant 210 : index
    %36 = vector.load %arg1[%c0_39, %c0_40, %c210] : memref<1x4x1408xbf16, #tpu.memory_space<vmem>>, vector<1x4x896xbf16>
    %37 = vector.shape_cast %36 : vector<1x4x896xbf16> to vector<4x896xbf16>
    %c48 = arith.constant 48 : index
    %c0_41 = arith.constant 0 : index
    %38 = vector.load %arg10[%c48, %c0_41] : memref<128x896xbf16, #tpu.memory_space<vmem>>, vector<4x896xbf16>
    tpu.vector_store %arg10[%c48, %c0_41], %37 {strides = array<i32>} : memref<128x896xbf16, #tpu.memory_space<vmem>>, vector<4x896xbf16>,
    %c0_42 = arith.constant 0 : index
    %c0_43 = arith.constant 0 : index
    %c211 = arith.constant 211 : index
    %39 = vector.load %arg1[%c0_42, %c0_43, %c211] : memref<1x4x1408xbf16, #tpu.memory_space<vmem>>, vector<1x4x896xbf16>
    %40 = vector.shape_cast %39 : vector<1x4x896xbf16> to vector<4x896xbf16>
    %c52 = arith.constant 52 : index
    %c0_44 = arith.constant 0 : index
    %41 = vector.load %arg10[%c52, %c0_44] : memref<128x896xbf16, #tpu.memory_space<vmem>>, vector<4x896xbf16>
    tpu.vector_store %arg10[%c52, %c0_44], %40 {strides = array<i32>} : memref<128x896xbf16, #tpu.memory_space<vmem>>, vector<4x896xbf16>,
    %c0_45 = arith.constant 0 : index
    %c0_46 = arith.constant 0 : index
    %c212 = arith.constant 212 : index
    %42 = vector.load %arg1[%c0_45, %c0_46, %c212] : memref<1x4x1408xbf16, #tpu.memory_space<vmem>>, vector<1x4x896xbf16>
    %43 = vector.shape_cast %42 : vector<1x4x896xbf16> to vector<4x896xbf16>
    %c56 = arith.constant 56 : index
    %c0_47 = arith.constant 0 : index
    %44 = vector.load %arg10[%c56, %c0_47] : memref<128x896xbf16, #tpu.memory_space<vmem>>, vector<4x896xbf16>
    tpu.vector_store %arg10[%c56, %c0_47], %43 {strides = array<i32>} : memref<128x896xbf16, #tpu.memory_space<vmem>>, vector<4x896xbf16>,
    %c0_48 = arith.constant 0 : index
    %c0_49 = arith.constant 0 : index
    %c220 = arith.constant 220 : index
    %45 = vector.load %arg1[%c0_48, %c0_49, %c220] : memref<1x4x1408xbf16, #tpu.memory_space<vmem>>, vector<1x4x896xbf16>
    %46 = vector.shape_cast %45 : vector<1x4x896xbf16> to vector<4x896xbf16>
    %c60 = arith.constant 60 : index
    %c0_50 = arith.constant 0 : index
    %47 = vector.load %arg10[%c60, %c0_50] : memref<128x896xbf16, #tpu.memory_space<vmem>>, vector<4x896xbf16>
    tpu.vector_store %arg10[%c60, %c0_50], %46 {strides = array<i32>} : memref<128x896xbf16, #tpu.memory_space<vmem>>, vector<4x896xbf16>,
    %c0_51 = arith.constant 0 : index
    %c0_52 = arith.constant 0 : index
    %c221 = arith.constant 221 : index
    %48 = vector.load %arg1[%c0_51, %c0_52, %c221] : memref<1x4x1408xbf16, #tpu.memory_space<vmem>>, vector<1x4x896xbf16>
    %49 = vector.shape_cast %48 : vector<1x4x896xbf16> to vector<4x896xbf16>
    %c64 = arith.constant 64 : index
    %c0_53 = arith.constant 0 : index
    %50 = vector.load %arg10[%c64, %c0_53] : memref<128x896xbf16, #tpu.memory_space<vmem>>, vector<4x896xbf16>
    tpu.vector_store %arg10[%c64, %c0_53], %49 {strides = array<i32>} : memref<128x896xbf16, #tpu.memory_space<vmem>>, vector<4x896xbf16>,
    %c0_54 = arith.constant 0 : index
    %c0_55 = arith.constant 0 : index
    %c222 = arith.constant 222 : index
    %51 = vector.load %arg1[%c0_54, %c0_55, %c222] : memref<1x4x1408xbf16, #tpu.memory_space<vmem>>, vector<1x4x896xbf16>
    %52 = vector.shape_cast %51 : vector<1x4x896xbf16> to vector<4x896xbf16>
    %c68 = arith.constant 68 : index
    %c0_56 = arith.constant 0 : index
    %53 = vector.load %arg10[%c68, %c0_56] : memref<128x896xbf16, #tpu.memory_space<vmem>>, vector<4x896xbf16>
    tpu.vector_store %arg10[%c68, %c0_56], %52 {strides = array<i32>} : memref<128x896xbf16, #tpu.memory_space<vmem>>, vector<4x896xbf16>,
    %c0_57 = arith.constant 0 : index
    %c0_58 = arith.constant 0 : index
    %c400 = arith.constant 400 : index
    %54 = vector.load %arg1[%c0_57, %c0_58, %c400] : memref<1x4x1408xbf16, #tpu.memory_space<vmem>>, vector<1x4x896xbf16>
    %55 = vector.shape_cast %54 : vector<1x4x896xbf16> to vector<4x896xbf16>
    %c72 = arith.constant 72 : index
    %c0_59 = arith.constant 0 : index
    %56 = vector.load %arg10[%c72, %c0_59] : memref<128x896xbf16, #tpu.memory_space<vmem>>, vector<4x896xbf16>
    tpu.vector_store %arg10[%c72, %c0_59], %55 {strides = array<i32>} : memref<128x896xbf16, #tpu.memory_space<vmem>>, vector<4x896xbf16>,
    %c0_60 = arith.constant 0 : index
    %c0_61 = arith.constant 0 : index
    %c401 = arith.constant 401 : index
    %57 = vector.load %arg1[%c0_60, %c0_61, %c401] : memref<1x4x1408xbf16, #tpu.memory_space<vmem>>, vector<1x4x896xbf16>
    %58 = vector.shape_cast %57 : vector<1x4x896xbf16> to vector<4x896xbf16>
    %c76 = arith.constant 76 : index
    %c0_62 = arith.constant 0 : index
    %59 = vector.load %arg10[%c76, %c0_62] : memref<128x896xbf16, #tpu.memory_space<vmem>>, vector<4x896xbf16>
    tpu.vector_store %arg10[%c76, %c0_62], %58 {strides = array<i32>} : memref<128x896xbf16, #tpu.memory_space<vmem>>, vector<4x896xbf16>,
    %c0_63 = arith.constant 0 : index
    %c0_64 = arith.constant 0 : index
    %c402 = arith.constant 402 : index
    %60 = vector.load %arg1[%c0_63, %c0_64, %c402] : memref<1x4x1408xbf16, #tpu.memory_space<vmem>>, vector<1x4x896xbf16>
    %61 = vector.shape_cast %60 : vector<1x4x896xbf16> to vector<4x896xbf16>
    %c80 = arith.constant 80 : index
    %c0_65 = arith.constant 0 : index
    %62 = vector.load %arg10[%c80, %c0_65] : memref<128x896xbf16, #tpu.memory_space<vmem>>, vector<4x896xbf16>
    tpu.vector_store %arg10[%c80, %c0_65], %61 {strides = array<i32>} : memref<128x896xbf16, #tpu.memory_space<vmem>>, vector<4x896xbf16>,
    %c0_66 = arith.constant 0 : index
    %c0_67 = arith.constant 0 : index
    %c410 = arith.constant 410 : index
    %63 = vector.load %arg1[%c0_66, %c0_67, %c410] : memref<1x4x1408xbf16, #tpu.memory_space<vmem>>, vector<1x4x896xbf16>
    %64 = vector.shape_cast %63 : vector<1x4x896xbf16> to vector<4x896xbf16>
    %c84 = arith.constant 84 : index
    %c0_68 = arith.constant 0 : index
    %65 = vector.load %arg10[%c84, %c0_68] : memref<128x896xbf16, #tpu.memory_space<vmem>>, vector<4x896xbf16>
    tpu.vector_store %arg10[%c84, %c0_68], %64 {strides = array<i32>} : memref<128x896xbf16, #tpu.memory_space<vmem>>, vector<4x896xbf16>,
    %c0_69 = arith.constant 0 : index
    %c0_70 = arith.constant 0 : index
    %c411 = arith.constant 411 : index
    %66 = vector.load %arg1[%c0_69, %c0_70, %c411] : memref<1x4x1408xbf16, #tpu.memory_space<vmem>>, vector<1x4x896xbf16>
    %67 = vector.shape_cast %66 : vector<1x4x896xbf16> to vector<4x896xbf16>
    %c88 = arith.constant 88 : index
    %c0_71 = arith.constant 0 : index
    %68 = vector.load %arg10[%c88, %c0_71] : memref<128x896xbf16, #tpu.memory_space<vmem>>, vector<4x896xbf16>
    tpu.vector_store %arg10[%c88, %c0_71], %67 {strides = array<i32>} : memref<128x896xbf16, #tpu.memory_space<vmem>>, vector<4x896xbf16>,
    %c0_72 = arith.constant 0 : index
    %c0_73 = arith.constant 0 : index
    %c412 = arith.constant 412 : index
    %69 = vector.load %arg1[%c0_72, %c0_73, %c412] : memref<1x4x1408xbf16, #tpu.memory_space<vmem>>, vector<1x4x896xbf16>
    %70 = vector.shape_cast %69 : vector<1x4x896xbf16> to vector<4x896xbf16>
    %c92 = arith.constant 92 : index
    %c0_74 = arith.constant 0 : index
    %71 = vector.load %arg10[%c92, %c0_74] : memref<128x896xbf16, #tpu.memory_space<vmem>>, vector<4x896xbf16>
    tpu.vector_store %arg10[%c92, %c0_74], %70 {strides = array<i32>} : memref<128x896xbf16, #tpu.memory_space<vmem>>, vector<4x896xbf16>,
    %c0_75 = arith.constant 0 : index
    %c0_76 = arith.constant 0 : index
    %c420 = arith.constant 420 : index
    %72 = vector.load %arg1[%c0_75, %c0_76, %c420] : memref<1x4x1408xbf16, #tpu.memory_space<vmem>>, vector<1x4x896xbf16>
    %73 = vector.shape_cast %72 : vector<1x4x896xbf16> to vector<4x896xbf16>
    %c96 = arith.constant 96 : index
    %c0_77 = arith.constant 0 : index
    %74 = vector.load %arg10[%c96, %c0_77] : memref<128x896xbf16, #tpu.memory_space<vmem>>, vector<4x896xbf16>
    tpu.vector_store %arg10[%c96, %c0_77], %73 {strides = array<i32>} : memref<128x896xbf16, #tpu.memory_space<vmem>>, vector<4x896xbf16>,
    %c0_78 = arith.constant 0 : index
    %c0_79 = arith.constant 0 : index
    %c421 = arith.constant 421 : index
    %75 = vector.load %arg1[%c0_78, %c0_79, %c421] : memref<1x4x1408xbf16, #tpu.memory_space<vmem>>, vector<1x4x896xbf16>
    %76 = vector.shape_cast %75 : vector<1x4x896xbf16> to vector<4x896xbf16>
    %c100 = arith.constant 100 : index
    %c0_80 = arith.constant 0 : index
    %77 = vector.load %arg10[%c100, %c0_80] : memref<128x896xbf16, #tpu.memory_space<vmem>>, vector<4x896xbf16>
    tpu.vector_store %arg10[%c100, %c0_80], %76 {strides = array<i32>} : memref<128x896xbf16, #tpu.memory_space<vmem>>, vector<4x896xbf16>,
    %c0_81 = arith.constant 0 : index
    %c0_82 = arith.constant 0 : index
    %c422 = arith.constant 422 : index
    %78 = vector.load %arg1[%c0_81, %c0_82, %c422] : memref<1x4x1408xbf16, #tpu.memory_space<vmem>>, vector<1x4x896xbf16>
    %79 = vector.shape_cast %78 : vector<1x4x896xbf16> to vector<4x896xbf16>
    %c104 = arith.constant 104 : index
    %c0_83 = arith.constant 0 : index
    %80 = vector.load %arg10[%c104, %c0_83] : memref<128x896xbf16, #tpu.memory_space<vmem>>, vector<4x896xbf16>
    tpu.vector_store %arg10[%c104, %c0_83], %79 {strides = array<i32>} : memref<128x896xbf16, #tpu.memory_space<vmem>>, vector<4x896xbf16>,
    %cst = arith.constant 0.000000e+00 : bf16
    %81 = vector.broadcast %cst : bf16 to vector<20x896xbf16>
    %c108 = arith.constant 108 : index
    %c0_84 = arith.constant 0 : index
    %82 = vector.load %arg10[%c108, %c0_84] : memref<128x896xbf16, #tpu.memory_space<vmem>>, vector<20x896xbf16>
    tpu.vector_store %arg10[%c108, %c0_84], %81 {strides = array<i32>} : memref<128x896xbf16, #tpu.memory_space<vmem>>, vector<20x896xbf16>,
    %c0_85 = arith.constant 0 : index
    %c0_86 = arith.constant 0 : index
    %83 = vector.load %arg3[%c0_85, %c0_86] : memref<8x128xbf16, #tpu.memory_space<vmem>>, vector<8x128xbf16>
    %c0_87 = arith.constant 0 : index
    %c0_88 = arith.constant 0 : index
    %84 = vector.load %arg10[%c0_87, %c0_88] : memref<128x896xbf16, #tpu.memory_space<vmem>>, vector<128x896xbf16>
    %cst_89 = arith.constant dense<0.000000e+00> : vector<8x896xf32>
    %85 = tpu.matmul %83, %84, %cst_89 {dimension_numbers = #tpu.dot_dimension_numbers<[1], [0], [0], [1], [0, 0, 1, 1], [], []>} : vector<8x128xbf16>, vector<128x896xbf16>, vector<8x896xf32> -> vector<8x896xf32>
    %c0_90 = arith.constant 0 : index
    %c0_91 = arith.constant 0 : index
    %86 = vector.load %arg4[%c0_90, %c0_91] : memref<8x1xf32, #tpu.memory_space<vmem>>, vector<8x1xf32>
    %87 = vector.broadcast %86 : vector<8x1xf32> to vector<8x896xf32>
    %88 = arith.addf %85, %87 : vector<8x896xf32>
    %cst_92 = arith.constant 0.000000e+00 : f32
    %89 = vector.broadcast %cst_92 : f32 to vector<8x896xf32>
    %90 = arith.maximumf %88, %89 : vector<8x896xf32>
    %cst_93 = arith.constant 0.000000e+00 : bf16
    %91 = vector.broadcast %cst_93 : bf16 to vector<8x1408xbf16>
    %c0_94 = arith.constant 0 : index
    %c0_95 = arith.constant 0 : index
    %92 = vector.load %arg11[%c0_94, %c0_95] : memref<8x1408xbf16, #tpu.memory_space<vmem>>, vector<8x1408xbf16>
    tpu.vector_store %arg11[%c0_94, %c0_95], %91 {strides = array<i32>} : memref<8x1408xbf16, #tpu.memory_space<vmem>>, vector<8x1408xbf16>,
    %c0_96 = arith.constant 0 : index
    %c0_97 = arith.constant 0 : index
    %93 = vector.load %arg2[%c0_96, %c0_97] : memref<1x896xf32, #tpu.memory_space<vmem>>, vector<1x896xf32>
    %94 = vector.broadcast %93 : vector<1x896xf32> to vector<8x896xf32>
    %95 = arith.mulf %90, %94 : vector<8x896xf32>
    %96 = arith.truncf %95 : vector<8x896xf32> to vector<8x896xbf16>
    %c0_98 = arith.constant 0 : index
    %c256 = arith.constant 256 : index
    %97 = vector.load %arg11[%c0_98, %c256] : memref<8x1408xbf16, #tpu.memory_space<vmem>>, vector<8x896xbf16>
    tpu.vector_store %arg11[%c0_98, %c256], %96 {strides = array<i32>} : memref<8x1408xbf16, #tpu.memory_space<vmem>>, vector<8x896xbf16>,
    %c0_99 = arith.constant 0 : index
    %c45 = arith.constant 45 : index
    %98 = vector.load %arg11[%c0_99, %c45] : memref<8x1408xbf16, #tpu.memory_space<vmem>>, vector<8x896xbf16>
    %c0_100 = arith.constant 0 : index
    %c0_101 = arith.constant 0 : index
    %99 = vector.load %arg12[%c0_100, %c0_101] : memref<256x896xbf16, #tpu.memory_space<vmem>>, vector<8x896xbf16>
    tpu.vector_store %arg12[%c0_100, %c0_101], %98 {strides = array<i32>} : memref<256x896xbf16, #tpu.memory_space<vmem>>, vector<8x896xbf16>,
    %c0_102 = arith.constant 0 : index
    %c46 = arith.constant 46 : index
    %100 = vector.load %arg11[%c0_102, %c46] : memref<8x1408xbf16, #tpu.memory_space<vmem>>, vector<8x896xbf16>
    %c8_103 = arith.constant 8 : index
    %c0_104 = arith.constant 0 : index
    %101 = vector.load %arg12[%c8_103, %c0_104] : memref<256x896xbf16, #tpu.memory_space<vmem>>, vector<8x896xbf16>
    tpu.vector_store %arg12[%c8_103, %c0_104], %100 {strides = array<i32>} : memref<256x896xbf16, #tpu.memory_space<vmem>>, vector<8x896xbf16>,
    %c0_105 = arith.constant 0 : index
    %c47 = arith.constant 47 : index
    %102 = vector.load %arg11[%c0_105, %c47] : memref<8x1408xbf16, #tpu.memory_space<vmem>>, vector<8x896xbf16>
    %c16_106 = arith.constant 16 : index
    %c0_107 = arith.constant 0 : index
    %103 = vector.load %arg12[%c16_106, %c0_107] : memref<256x896xbf16, #tpu.memory_space<vmem>>, vector<8x896xbf16>
    tpu.vector_store %arg12[%c16_106, %c0_107], %102 {strides = array<i32>} : memref<256x896xbf16, #tpu.memory_space<vmem>>, vector<8x896xbf16>,
    %c0_108 = arith.constant 0 : index
    %c55 = arith.constant 55 : index
    %104 = vector.load %arg11[%c0_108, %c55] : memref<8x1408xbf16, #tpu.memory_space<vmem>>, vector<8x896xbf16>
    %c24_109 = arith.constant 24 : index
    %c0_110 = arith.constant 0 : index
    %105 = vector.load %arg12[%c24_109, %c0_110] : memref<256x896xbf16, #tpu.memory_space<vmem>>, vector<8x896xbf16>
    tpu.vector_store %arg12[%c24_109, %c0_110], %104 {strides = array<i32>} : memref<256x896xbf16, #tpu.memory_space<vmem>>, vector<8x896xbf16>,
    %c0_111 = arith.constant 0 : index
    %c56_112 = arith.constant 56 : index
    %106 = vector.load %arg11[%c0_111, %c56_112] : memref<8x1408xbf16, #tpu.memory_space<vmem>>, vector<8x896xbf16>
    %c32_113 = arith.constant 32 : index
    %c0_114 = arith.constant 0 : index
    %107 = vector.load %arg12[%c32_113, %c0_114] : memref<256x896xbf16, #tpu.memory_space<vmem>>, vector<8x896xbf16>
    tpu.vector_store %arg12[%c32_113, %c0_114], %106 {strides = array<i32>} : memref<256x896xbf16, #tpu.memory_space<vmem>>, vector<8x896xbf16>,
    %c0_115 = arith.constant 0 : index
    %c57 = arith.constant 57 : index
    %108 = vector.load %arg11[%c0_115, %c57] : memref<8x1408xbf16, #tpu.memory_space<vmem>>, vector<8x896xbf16>
    %c40_116 = arith.constant 40 : index
    %c0_117 = arith.constant 0 : index
    %109 = vector.load %arg12[%c40_116, %c0_117] : memref<256x896xbf16, #tpu.memory_space<vmem>>, vector<8x896xbf16>
    tpu.vector_store %arg12[%c40_116, %c0_117], %108 {strides = array<i32>} : memref<256x896xbf16, #tpu.memory_space<vmem>>, vector<8x896xbf16>,
    %c0_118 = arith.constant 0 : index
    %c65 = arith.constant 65 : index
    %110 = vector.load %arg11[%c0_118, %c65] : memref<8x1408xbf16, #tpu.memory_space<vmem>>, vector<8x896xbf16>
    %c48_119 = arith.constant 48 : index
    %c0_120 = arith.constant 0 : index
    %111 = vector.load %arg12[%c48_119, %c0_120] : memref<256x896xbf16, #tpu.memory_space<vmem>>, vector<8x896xbf16>
    tpu.vector_store %arg12[%c48_119, %c0_120], %110 {strides = array<i32>} : memref<256x896xbf16, #tpu.memory_space<vmem>>, vector<8x896xbf16>,
    %c0_121 = arith.constant 0 : index
    %c66 = arith.constant 66 : index
    %112 = vector.load %arg11[%c0_121, %c66] : memref<8x1408xbf16, #tpu.memory_space<vmem>>, vector<8x896xbf16>
    %c56_122 = arith.constant 56 : index
    %c0_123 = arith.constant 0 : index
    %113 = vector.load %arg12[%c56_122, %c0_123] : memref<256x896xbf16, #tpu.memory_space<vmem>>, vector<8x896xbf16>
    tpu.vector_store %arg12[%c56_122, %c0_123], %112 {strides = array<i32>} : memref<256x896xbf16, #tpu.memory_space<vmem>>, vector<8x896xbf16>,
    %c0_124 = arith.constant 0 : index
    %c67 = arith.constant 67 : index
    %114 = vector.load %arg11[%c0_124, %c67] : memref<8x1408xbf16, #tpu.memory_space<vmem>>, vector<8x896xbf16>
    %c64_125 = arith.constant 64 : index
    %c0_126 = arith.constant 0 : index
    %115 = vector.load %arg12[%c64_125, %c0_126] : memref<256x896xbf16, #tpu.memory_space<vmem>>, vector<8x896xbf16>
    tpu.vector_store %arg12[%c64_125, %c0_126], %114 {strides = array<i32>} : memref<256x896xbf16, #tpu.memory_space<vmem>>, vector<8x896xbf16>,
    %c0_127 = arith.constant 0 : index
    %c245 = arith.constant 245 : index
    %116 = vector.load %arg11[%c0_127, %c245] : memref<8x1408xbf16, #tpu.memory_space<vmem>>, vector<8x896xbf16>
    %c72_128 = arith.constant 72 : index
    %c0_129 = arith.constant 0 : index
    %117 = vector.load %arg12[%c72_128, %c0_129] : memref<256x896xbf16, #tpu.memory_space<vmem>>, vector<8x896xbf16>
    tpu.vector_store %arg12[%c72_128, %c0_129], %116 {strides = array<i32>} : memref<256x896xbf16, #tpu.memory_space<vmem>>, vector<8x896xbf16>,
    %c0_130 = arith.constant 0 : index
    %c246 = arith.constant 246 : index
    %118 = vector.load %arg11[%c0_130, %c246] : memref<8x1408xbf16, #tpu.memory_space<vmem>>, vector<8x896xbf16>
    %c80_131 = arith.constant 80 : index
    %c0_132 = arith.constant 0 : index
    %119 = vector.load %arg12[%c80_131, %c0_132] : memref<256x896xbf16, #tpu.memory_space<vmem>>, vector<8x896xbf16>
    tpu.vector_store %arg12[%c80_131, %c0_132], %118 {strides = array<i32>} : memref<256x896xbf16, #tpu.memory_space<vmem>>, vector<8x896xbf16>,
    %c0_133 = arith.constant 0 : index
    %c247 = arith.constant 247 : index
    %120 = vector.load %arg11[%c0_133, %c247] : memref<8x1408xbf16, #tpu.memory_space<vmem>>, vector<8x896xbf16>
    %c88_134 = arith.constant 88 : index
    %c0_135 = arith.constant 0 : index
    %121 = vector.load %arg12[%c88_134, %c0_135] : memref<256x896xbf16, #tpu.memory_space<vmem>>, vector<8x896xbf16>
    tpu.vector_store %arg12[%c88_134, %c0_135], %120 {strides = array<i32>} : memref<256x896xbf16, #tpu.memory_space<vmem>>, vector<8x896xbf16>,
    %c0_136 = arith.constant 0 : index
    %c255 = arith.constant 255 : index
    %122 = vector.load %arg11[%c0_136, %c255] : memref<8x1408xbf16, #tpu.memory_space<vmem>>, vector<8x896xbf16>
    %c96_137 = arith.constant 96 : index
    %c0_138 = arith.constant 0 : index
    %123 = vector.load %arg12[%c96_137, %c0_138] : memref<256x896xbf16, #tpu.memory_space<vmem>>, vector<8x896xbf16>
    tpu.vector_store %arg12[%c96_137, %c0_138], %122 {strides = array<i32>} : memref<256x896xbf16, #tpu.memory_space<vmem>>, vector<8x896xbf16>,
    %c0_139 = arith.constant 0 : index
    %c256_140 = arith.constant 256 : index
    %124 = vector.load %arg11[%c0_139, %c256_140] : memref<8x1408xbf16, #tpu.memory_space<vmem>>, vector<8x896xbf16>
    %c104_141 = arith.constant 104 : index
    %c0_142 = arith.constant 0 : index
    %125 = vector.load %arg12[%c104_141, %c0_142] : memref<256x896xbf16, #tpu.memory_space<vmem>>, vector<8x896xbf16>
    tpu.vector_store %arg12[%c104_141, %c0_142], %124 {strides = array<i32>} : memref<256x896xbf16, #tpu.memory_space<vmem>>, vector<8x896xbf16>,
    %c0_143 = arith.constant 0 : index
    %c257 = arith.constant 257 : index
    %126 = vector.load %arg11[%c0_143, %c257] : memref<8x1408xbf16, #tpu.memory_space<vmem>>, vector<8x896xbf16>
    %c112 = arith.constant 112 : index
    %c0_144 = arith.constant 0 : index
    %127 = vector.load %arg12[%c112, %c0_144] : memref<256x896xbf16, #tpu.memory_space<vmem>>, vector<8x896xbf16>
    tpu.vector_store %arg12[%c112, %c0_144], %126 {strides = array<i32>} : memref<256x896xbf16, #tpu.memory_space<vmem>>, vector<8x896xbf16>,
    %c0_145 = arith.constant 0 : index
    %c265 = arith.constant 265 : index
    %128 = vector.load %arg11[%c0_145, %c265] : memref<8x1408xbf16, #tpu.memory_space<vmem>>, vector<8x896xbf16>
    %c120 = arith.constant 120 : index
    %c0_146 = arith.constant 0 : index
    %129 = vector.load %arg12[%c120, %c0_146] : memref<256x896xbf16, #tpu.memory_space<vmem>>, vector<8x896xbf16>
    tpu.vector_store %arg12[%c120, %c0_146], %128 {strides = array<i32>} : memref<256x896xbf16, #tpu.memory_space<vmem>>, vector<8x896xbf16>,
    %c0_147 = arith.constant 0 : index
    %c266 = arith.constant 266 : index
    %130 = vector.load %arg11[%c0_147, %c266] : memref<8x1408xbf16, #tpu.memory_space<vmem>>, vector<8x896xbf16>
    %c128 = arith.constant 128 : index
    %c0_148 = arith.constant 0 : index
    %131 = vector.load %arg12[%c128, %c0_148] : memref<256x896xbf16, #tpu.memory_space<vmem>>, vector<8x896xbf16>
    tpu.vector_store %arg12[%c128, %c0_148], %130 {strides = array<i32>} : memref<256x896xbf16, #tpu.memory_space<vmem>>, vector<8x896xbf16>,
    %c0_149 = arith.constant 0 : index
    %c267 = arith.constant 267 : index
    %132 = vector.load %arg11[%c0_149, %c267] : memref<8x1408xbf16, #tpu.memory_space<vmem>>, vector<8x896xbf16>
    %c136 = arith.constant 136 : index
    %c0_150 = arith.constant 0 : index
    %133 = vector.load %arg12[%c136, %c0_150] : memref<256x896xbf16, #tpu.memory_space<vmem>>, vector<8x896xbf16>
    tpu.vector_store %arg12[%c136, %c0_150], %132 {strides = array<i32>} : memref<256x896xbf16, #tpu.memory_space<vmem>>, vector<8x896xbf16>,
    %c0_151 = arith.constant 0 : index
    %c445 = arith.constant 445 : index
    %134 = vector.load %arg11[%c0_151, %c445] : memref<8x1408xbf16, #tpu.memory_space<vmem>>, vector<8x896xbf16>
    %c144 = arith.constant 144 : index
    %c0_152 = arith.constant 0 : index
    %135 = vector.load %arg12[%c144, %c0_152] : memref<256x896xbf16, #tpu.memory_space<vmem>>, vector<8x896xbf16>
    tpu.vector_store %arg12[%c144, %c0_152], %134 {strides = array<i32>} : memref<256x896xbf16, #tpu.memory_space<vmem>>, vector<8x896xbf16>,
    %c0_153 = arith.constant 0 : index
    %c446 = arith.constant 446 : index
    %136 = vector.load %arg11[%c0_153, %c446] : memref<8x1408xbf16, #tpu.memory_space<vmem>>, vector<8x896xbf16>
    %c152 = arith.constant 152 : index
    %c0_154 = arith.constant 0 : index
    %137 = vector.load %arg12[%c152, %c0_154] : memref<256x896xbf16, #tpu.memory_space<vmem>>, vector<8x896xbf16>
    tpu.vector_store %arg12[%c152, %c0_154], %136 {strides = array<i32>} : memref<256x896xbf16, #tpu.memory_space<vmem>>, vector<8x896xbf16>,
    %c0_155 = arith.constant 0 : index
    %c447 = arith.constant 447 : index
    %138 = vector.load %arg11[%c0_155, %c447] : memref<8x1408xbf16, #tpu.memory_space<vmem>>, vector<8x896xbf16>
    %c160 = arith.constant 160 : index
    %c0_156 = arith.constant 0 : index
    %139 = vector.load %arg12[%c160, %c0_156] : memref<256x896xbf16, #tpu.memory_space<vmem>>, vector<8x896xbf16>
    tpu.vector_store %arg12[%c160, %c0_156], %138 {strides = array<i32>} : memref<256x896xbf16, #tpu.memory_space<vmem>>, vector<8x896xbf16>,
    %c0_157 = arith.constant 0 : index
    %c455 = arith.constant 455 : index
    %140 = vector.load %arg11[%c0_157, %c455] : memref<8x1408xbf16, #tpu.memory_space<vmem>>, vector<8x896xbf16>
    %c168 = arith.constant 168 : index
    %c0_158 = arith.constant 0 : index
    %141 = vector.load %arg12[%c168, %c0_158] : memref<256x896xbf16, #tpu.memory_space<vmem>>, vector<8x896xbf16>
    tpu.vector_store %arg12[%c168, %c0_158], %140 {strides = array<i32>} : memref<256x896xbf16, #tpu.memory_space<vmem>>, vector<8x896xbf16>,
    %c0_159 = arith.constant 0 : index
    %c456 = arith.constant 456 : index
    %142 = vector.load %arg11[%c0_159, %c456] : memref<8x1408xbf16, #tpu.memory_space<vmem>>, vector<8x896xbf16>
    %c176 = arith.constant 176 : index
    %c0_160 = arith.constant 0 : index
    %143 = vector.load %arg12[%c176, %c0_160] : memref<256x896xbf16, #tpu.memory_space<vmem>>, vector<8x896xbf16>
    tpu.vector_store %arg12[%c176, %c0_160], %142 {strides = array<i32>} : memref<256x896xbf16, #tpu.memory_space<vmem>>, vector<8x896xbf16>,
    %c0_161 = arith.constant 0 : index
    %c457 = arith.constant 457 : index
    %144 = vector.load %arg11[%c0_161, %c457] : memref<8x1408xbf16, #tpu.memory_space<vmem>>, vector<8x896xbf16>
    %c184 = arith.constant 184 : index
    %c0_162 = arith.constant 0 : index
    %145 = vector.load %arg12[%c184, %c0_162] : memref<256x896xbf16, #tpu.memory_space<vmem>>, vector<8x896xbf16>
    tpu.vector_store %arg12[%c184, %c0_162], %144 {strides = array<i32>} : memref<256x896xbf16, #tpu.memory_space<vmem>>, vector<8x896xbf16>,
    %c0_163 = arith.constant 0 : index
    %c465 = arith.constant 465 : index
    %146 = vector.load %arg11[%c0_163, %c465] : memref<8x1408xbf16, #tpu.memory_space<vmem>>, vector<8x896xbf16>
    %c192 = arith.constant 192 : index
    %c0_164 = arith.constant 0 : index
    %147 = vector.load %arg12[%c192, %c0_164] : memref<256x896xbf16, #tpu.memory_space<vmem>>, vector<8x896xbf16>
    tpu.vector_store %arg12[%c192, %c0_164], %146 {strides = array<i32>} : memref<256x896xbf16, #tpu.memory_space<vmem>>, vector<8x896xbf16>,
    %c0_165 = arith.constant 0 : index
    %c466 = arith.constant 466 : index
    %148 = vector.load %arg11[%c0_165, %c466] : memref<8x1408xbf16, #tpu.memory_space<vmem>>, vector<8x896xbf16>
    %c200_166 = arith.constant 200 : index
    %c0_167 = arith.constant 0 : index
    %149 = vector.load %arg12[%c200_166, %c0_167] : memref<256x896xbf16, #tpu.memory_space<vmem>>, vector<8x896xbf16>
    tpu.vector_store %arg12[%c200_166, %c0_167], %148 {strides = array<i32>} : memref<256x896xbf16, #tpu.memory_space<vmem>>, vector<8x896xbf16>,
    %c0_168 = arith.constant 0 : index
    %c467 = arith.constant 467 : index
    %150 = vector.load %arg11[%c0_168, %c467] : memref<8x1408xbf16, #tpu.memory_space<vmem>>, vector<8x896xbf16>
    %c208 = arith.constant 208 : index
    %c0_169 = arith.constant 0 : index
    %151 = vector.load %arg12[%c208, %c0_169] : memref<256x896xbf16, #tpu.memory_space<vmem>>, vector<8x896xbf16>
    tpu.vector_store %arg12[%c208, %c0_169], %150 {strides = array<i32>} : memref<256x896xbf16, #tpu.memory_space<vmem>>, vector<8x896xbf16>,
    %cst_170 = arith.constant 0.000000e+00 : bf16
    %152 = vector.broadcast %cst_170 : bf16 to vector<40x896xbf16>
    %c216 = arith.constant 216 : index
    %c0_171 = arith.constant 0 : index
    %153 = vector.load %arg12[%c216, %c0_171] : memref<256x896xbf16, #tpu.memory_space<vmem>>, vector<40x896xbf16>
    tpu.vector_store %arg12[%c216, %c0_171], %152 {strides = array<i32>} : memref<256x896xbf16, #tpu.memory_space<vmem>>, vector<40x896xbf16>,
    %c0_172 = arith.constant 0 : index
    %c0_173 = arith.constant 0 : index
    %154 = vector.load %arg5[%c0_172, %c0_173] : memref<8x256xbf16, #tpu.memory_space<vmem>>, vector<8x256xbf16>
    %c0_174 = arith.constant 0 : index
    %c0_175 = arith.constant 0 : index
    %155 = vector.load %arg12[%c0_174, %c0_175] : memref<256x896xbf16, #tpu.memory_space<vmem>>, vector<256x896xbf16>
    %cst_176 = arith.constant dense<0.000000e+00> : vector<8x896xf32>
    %156 = tpu.matmul %154, %155, %cst_176 {dimension_numbers = #tpu.dot_dimension_numbers<[1], [0], [0], [1], [0, 0, 1, 1], [], []>} : vector<8x256xbf16>, vector<256x896xbf16>, vector<8x896xf32> -> vector<8x896xf32>
    %c0_177 = arith.constant 0 : index
    %c0_178 = arith.constant 0 : index
    %157 = vector.load %arg6[%c0_177, %c0_178] : memref<8x1xf32, #tpu.memory_space<vmem>>, vector<8x1xf32>
    %158 = vector.broadcast %157 : vector<8x1xf32> to vector<8x896xf32>
    %159 = arith.addf %156, %158 : vector<8x896xf32>
    %cst_179 = arith.constant 0.000000e+00 : f32
    %160 = vector.broadcast %cst_179 : f32 to vector<8x896xf32>
    %161 = arith.maximumf %159, %160 : vector<8x896xf32>
    %c0_180 = arith.constant 0 : index
    %c0_181 = arith.constant 0 : index
    %c211_182 = arith.constant 211 : index
    %162 = vector.load %arg1[%c0_180, %c0_181, %c211_182] : memref<1x4x1408xbf16, #tpu.memory_space<vmem>>, vector<1x4x896xbf16>
    %163 = vector.shape_cast %162 : vector<1x4x896xbf16> to vector<4x896xbf16>
    %c0_183 = arith.constant 0 : index
    %c0_184 = arith.constant 0 : index
    %164 = vector.load %arg7[%c0_183, %c0_184] : memref<8x4xbf16, #tpu.memory_space<vmem>>, vector<8x4xbf16>
    %cst_185 = arith.constant dense<0.000000e+00> : vector<8x896xf32>
    %165 = tpu.matmul %164, %163, %cst_185 {dimension_numbers = #tpu.dot_dimension_numbers<[1], [0], [0], [1], [0, 0, 1, 1], [], []>} : vector<8x4xbf16>, vector<4x896xbf16>, vector<8x896xf32> -> vector<8x896xf32>
    %c0_186 = arith.constant 0 : index
    %c0_187 = arith.constant 0 : index
    %166 = vector.load %arg8[%c0_186, %c0_187] : memref<8x1xf32, #tpu.memory_space<vmem>>, vector<8x1xf32>
    %167 = vector.broadcast %166 : vector<8x1xf32> to vector<8x896xf32>
    %168 = arith.addf %165, %167 : vector<8x896xf32>
    %169 = arith.addf %161, %168 : vector<8x896xf32>
    %cst_188 = arith.constant 0.000000e+00 : f32
    %170 = vector.broadcast %cst_188 : f32 to vector<8x896xf32>
    %171 = arith.maximumf %169, %170 : vector<8x896xf32>
    %c0_189 = arith.constant 0 : index
    %c0_190 = arith.constant 0 : index
    %c0_191 = arith.constant 0 : index
    %172 = vector.load %arg9[%c0_189, %c0_190, %c0_191] : memref<1x8x896xf32, #tpu.memory_space<vmem>>, vector<1x8x896xf32>
    %173 = vector.shape_cast %172 : vector<1x8x896xf32> to vector<8x896xf32>
    %174 = vector.shape_cast %171 : vector<8x896xf32> to vector<1x8x896xf32>
    tpu.vector_store %arg9[%c0_189, %c0_190, %c0_191], %174 {strides = array<i32>} : memref<1x8x896xf32, #tpu.memory_space<vmem>>, vector<1x8x896xf32>,
    return
  }
  func.func @transform_0(%arg0: i32) -> (i32, i32, i32) {
    %c0_i32 = arith.constant 0 : i32
    %c0_i32_0 = arith.constant 0 : i32
    %c0_i32_1 = arith.constant 0 : i32
    return %arg0, %c0_i32, %c0_i32_0 : i32, i32, i32
  }
  func.func @transform_1(%arg0: i32) -> (i32, i32) {
    %c0_i32 = arith.constant 0 : i32
    %c0_i32_0 = arith.constant 0 : i32
    %c0_i32_1 = arith.constant 0 : i32
    return %c0_i32, %c0_i32_0 : i32, i32
  }
  func.func @transform_2(%arg0: i32) -> (i32, i32) {
    %c0_i32 = arith.constant 0 : i32
    %c0_i32_0 = arith.constant 0 : i32
    %c0_i32_1 = arith.constant 0 : i32
    return %c0_i32, %c0_i32_0 : i32, i32
  }
  func.func @transform_3(%arg0: i32) -> (i32, i32) {
    %c0_i32 = arith.constant 0 : i32
    %c0_i32_0 = arith.constant 0 : i32
    %c0_i32_1 = arith.constant 0 : i32
    return %c0_i32, %c0_i32_0 : i32, i32
  }
  func.func @transform_4(%arg0: i32) -> (i32, i32) {
    %c0_i32 = arith.constant 0 : i32
    %c0_i32_0 = arith.constant 0 : i32
    %c0_i32_1 = arith.constant 0 : i32
    return %c0_i32, %c0_i32_0 : i32, i32
  }
  func.func @transform_5(%arg0: i32) -> (i32, i32) {
    %c0_i32 = arith.constant 0 : i32
    %c0_i32_0 = arith.constant 0 : i32
    %c0_i32_1 = arith.constant 0 : i32
    return %c0_i32, %c0_i32_0 : i32, i32
  }
  func.func @transform_6(%arg0: i32) -> (i32, i32) {
    %c0_i32 = arith.constant 0 : i32
    %c0_i32_0 = arith.constant 0 : i32
    %c0_i32_1 = arith.constant 0 : i32
    return %c0_i32, %c0_i32_0 : i32, i32
  }
  func.func @transform_7(%arg0: i32) -> (i32, i32) {
    %c0_i32 = arith.constant 0 : i32
    %c0_i32_0 = arith.constant 0 : i32
    %c0_i32_1 = arith.constant 0 : i32
    return %c0_i32, %c0_i32_0 : i32, i32
  }
  func.func @transform_8(%arg0: i32) -> (i32, i32, i32) {
    %c0_i32 = arith.constant 0 : i32
    %c0_i32_0 = arith.constant 0 : i32
    %c0_i32_1 = arith.constant 0 : i32
    return %arg0, %c0_i32, %c0_i32_0 : i32, i32, i32
  }
}

</mosaic_0001>

<bundles_post_ra>
// kernel: residual_block.1
= control target key start
LH: loop header
LB: loop body
LE: loop exit
PB: predicated region body
PF: predicated region fallthrough
CT: control target
= control target key end

     0   :  { %s5473_s27 = smov 0   ;;  %s7423_s0 = inlined_call_operand.vmem [shape: bf16[2,4,1408], index: 0, kind: input, shape index: {}]   ;;  %s7424_s1 = inlined_call_operand.vmem [shape: f32[1,896], index: 1, kind: input, shape index: {}]   ;;  %s7425_s2 = inlined_call_operand.vmem [shape: bf16[8,128], index: 2, kind: input, shape index: {}]   ;;  %s7426_s3 = inlined_call_operand.vmem [shape: f32[8,1], index: 3, kind: input, shape index: {}]   ;;  %s7427_s4 = inlined_call_operand.vmem [shape: bf16[8,256], index: 4, kind: input, shape index: {}]   ;;  %s7428_s5 = inlined_call_operand.vmem [shape: f32[8,1], index: 5, kind: input, shape index: {}]   ;;  %s7429_s6 = inlined_call_operand.vmem [shape: bf16[8,4], index: 6, kind: input, shape index: {}]   ;;  %s7430_s7 = inlined_call_operand.vmem [shape: f32[8,1], index: 7, kind: input, shape index: {}]   ;;  %s7431_s8 = inlined_call_operand.vmem [shape: f32[2,8,896], index: 8, kind: output, shape index: {}]  }
   0x1 LB: > { %s4955_s28 = sadd.s32 4294967295, %s5377_s27   ;;  %p4959_p0 = scmp.ge.s32.totalorder %s5377_s27, 1  ;;  %s5377_s27 = sphi %s5473_s27, %s18_s27  }
   0x2   : > { %p262_p1 = scmp.lt.s32.totalorder %s5377_s27, 3 }
   0x4   : > { %p263_p2 = pnand %p4959_p0, %p262_p1 }
   0x5   : > { %p296_p3 = scmp.lt.s32.totalorder (!%p263_p2), %s4955_s28, 1  ;;  %v315_v0 = vlaneseq (!%p263_p2)  ;;  %v5379_v1 = vmov (!%p263_p2), 1983009808   ;;  %s7436_s11 = smov (!%p263_p2), 127   ;;  %vm7441_vm0 = vcmask (!%p263_p2), 1039360   ;;  %vm488_vm1 = vcmask (!%p263_p2), 1031168  }
   0x6   : > { %266 = sbr.rel (%p263_p2) target bundleno = 1511 (0x5e7), region = 52  ;;  %v313_v2 = vunpack.c.l.s4 (!%p263_p2), %v5379_v1  ;;  %s5381_s12 = smov (!%p263_p2), 126   ;;  %vm7440_vm2 = vcmask (!%p263_p2), 965632   ;;  %vm7439_vm3 = vcmask (!%p263_p2), 957440   ;;  %vm716_vm4 = vcmask (!%p263_p2), 949248  }
   0x7   : > { %v5483_v3 = vshrl.u32 (!%p263_p2), %v315_v0, 7  ;;  %s7434_s13 = smov (!%p263_p2), 118   ;;  %s7432_s14 = smov (!%p263_p2), 117   ;;  %vm792_vm5 = vcmask (!%p263_p2), 883712   ;;  %vm7442_vm6 = vcmask (!%p263_p2), 875520   ;;  %vm7450_vm7 = vcmask (!%p263_p2), 867328  }
   0x8   : > { %v314_v4 = vunpack.c.0.s8 (!%p263_p2), %v313_v2  ;;  %s5384_s15 = smov (!%p263_p2), 116   ;;  %s5385_s16 = smov (!%p263_p2), 108   ;;  %vm7445_vm8 = vcmask (!%p263_p2), 457728   ;;  %vm7443_vm9 = vcmask (!%p263_p2), 449536   ;;  %vm7444_vm10 = vcmask (!%p263_p2), 441344  }
   0x9   : > { %s7438_s17 = smov (!%p263_p2), 107   ;;  %s5387_s18 = smov (!%p263_p2), 106   ;;  %vm1248_vm11 = vcmask (!%p263_p2), 375808   ;;  %vm1324_vm12 = vcmask (!%p263_p2), 367616   ;;  %vm1400_vm13 = vcmask (!%p263_p2), 359424   ;;  %vm1476_vm14 = vcmask (!%p263_p2), 293888  }
   0xa   : > { %v5487_v5 = vsub.s32 (!%p263_p2), %v314_v4, %v5483_v3  ;;  %s5388_s19 = smov (!%p263_p2), 56   ;;  %s5389_s20 = smov (!%p263_p2), 55   ;;  %vm1552_vm15 = vcmask (!%p263_p2), 285696  }
   0xb   : > { %s5390_s21 = smov (!%p263_p2), 54   ;;  %s7466_s22 = smov (!%p263_p2), 46  }
   0xc   : > { %s5392_s23 = smov (!%p263_p2), 45   ;;  %s5393_s24 = smov (!%p263_p2), 44  }
   0xd   : > { %s7562_s28 = smov (!%p296_p3, %s4955_s28), 1  ;;  %s5394_s25 = smov 36  }
   0xe   : > { %s5259_s29 = smul.u32 22, %s7562_s28  ;;  %s5395_s26 = smov 35  }
   0xf   : > { %s5397_s30 = smov 112   ;;  %s5398_s9 = smov 111  }
  0x10   : > { %s5492_s10 = scalar_lea.vmem %s7423_s0, %s5259_s29  ;;  %s5396_s29 = smov 34  }
  0x11   : > { %v359_v6 = vld [vmem:[%s5492_s10 + $0x8] sm:$0xff]  ;;  %v358_v7 = vld [vmem:[%s5492_s10] sm:$0xff] }
  0x12   : > { %v5497_v8 = vrot.slane %v359_v6, %v5487_v5  ;;  %v5500_v9 = vrot.slane %v358_v7, %v5487_v5  ;;  %v362_v10 = vcombine.low %v358_v7, %v358_v7  ;;  %4962 = vst.sshfl [vmem:[#allocation2] sm:$0x3 pattern:$0x76325410] %v358_v7  ;;  %v438_v11 = vcombine.high %v358_v7, %v358_v7  ;;  %v308_v28 = vld [vmem:[%s5492_s10 + $0x8] sm:$0x3f] }
  0x13   : > { %v379_v12 = vcombine.low %v359_v6, %v359_v6  ;;  %v455_v22 = vcombine.high %v359_v6, %v359_v6  ;;  %v335_v29 = vrot.slane %v308_v28, %v5487_v5  ;;  %4964 = vst.sshfl [vmem:[#allocation2 + $0x20] sm:$0x3 pattern:$0x76325410] %v308_v28  ;;  %v328_v31 = vcombine.high %v308_v28, %v308_v28  ;;  %v966_v34 = vld [vmem:[%s5492_s10 + $0x2] sm:$0xff] }
  0x14   : > { %408 = vrot.lane.b32.xlu0 %v5497_v8, %s7436_s11  ;;  %400 = vrot.lane.b32.xlu1 %v5500_v9, %s7436_s11  ;;  %v5508_v13 = vcombine.high %v5500_v9, %v5500_v9  ;;  %v5511_v14 = vrot.slane %v362_v10, %v5487_v5  ;;  %4963 = vst.sshfl [vmem:[#allocation2 + $0x10] sm:$0x3 pattern:$0x76325410] %v438_v11 }
  0x15   : > { %v5516_v15 = vcombine.high %v5497_v8, %v5497_v8  ;;  %v5523_v16 = vrot.slane %v379_v12, %v5487_v5  ;;  %v5537_v19 = vcombine.low %v5500_v9, %v5500_v9  ;;  %v5540_v20 = vrot.slane %v438_v11, %v5487_v5  ;;  %4965 = vst.sshfl [vmem:[#allocation2 + $0x30] sm:$0x3 pattern:$0x76325410] %v328_v31 }
  0x16   : > { %352 = vst [vmem:[#allocation2 + $0x8] sm:$0x3] %v5508_v13  ;;  %v377_v18 = vcombine.high %v5511_v14, %v5511_v14  ;;  %v5549_v23 = vcombine.low %v5497_v8, %v5497_v8  ;;  %v469_v24 = vrot.slane %v455_v22, %v5487_v5  ;;  %v529_v27 = vcombine.low %v5511_v14, %v5511_v14  ;;  %v1650_v22 = vld [vmem:[%s5492_s10 + $0x6] sm:$0xff] }
  0x17   : > { %v394_v17 = vcombine.high %v5523_v16, %v5523_v16  ;;  %v454_v21 = vcombine.low %v5540_v20, %v5540_v20  ;;  %v5556_v26 = vcombine.high %v5540_v20, %v5540_v20  ;;  %v343_v30 = vcombine.high %v335_v29, %v335_v29 }
  0x18   : > { %402 = vrot.lane.b32.xlu1 %v5508_v13, %s7436_s11  ;;  %396 = vrot.lane.b32.xlu0 %v5511_v14, %s7436_s11  ;;  %v471_v25 = vcombine.low %v469_v24, %v469_v24  ;;  %v546_v32 = vcombine.low %v5523_v16, %v5523_v16  ;;  %v623_v33 = vcombine.high %v469_v24, %v469_v24 }
  0x19   : > { %354 = vst [vmem:[#allocation2 + $0x18] sm:$0x3] %v5556_v26  ;;  %356 = vst [vmem:[#allocation2 + $0x28] sm:$0x3] %v343_v30  ;;  %v970_v35 = vcombine.low %v966_v34, %v966_v34  ;;  %v1046_v38 = vcombine.high %v966_v34, %v966_v34  ;;  %v5631_v39 = vrot.slane %v966_v34, %v5487_v5 }
  0x1a   : > { %v1654_v28 = vcombine.high %v1650_v22, %v1650_v22  ;;  %v5719_v34 = vrot.slane %v1650_v22, %v5487_v5 }
  0x1b   : > { %v5616_v36 = vrot.slane %v970_v35, %v5487_v5  ;;  %v5634_v40 = vrot.slane %v1046_v38, %v5487_v5  ;;  %v5651_v47 = vcombine.low %v5631_v39, %v5631_v39  ;;  %v5669_v58 = vcombine.high %v5631_v39, %v5631_v39 }
  0x1c   : > { %410 = vrot.lane.b32.xlu1 %v5516_v15, %s7436_s11  ;;  %404 = vrot.lane.b32.xlu0 %v5523_v16, %s7436_s11  ;;  %v1730_v35 = vcombine.low %v1650_v22, %v1650_v22  ;;  %v5722_v38 = vrot.slane %v1654_v28, %v5487_v5 }
  0x1d   : > { %v5624_v37 = vcombine.high %v5616_v36, %v5616_v36  ;;  %v5642_v43 = vcombine.low %v5634_v40, %v5634_v40  ;;  %v1137_v59 = vcombine.low %v5616_v36, %v5616_v36 }
  0x20   : > { %406 = vrot.lane.b32.xlu1 %v394_v17, %s7436_s11  ;;  %398 = vrot.lane.b32.xlu0 %v377_v18, %s7436_s11  ;;  %s5405_s11 = smov 91  }
  0x24   : > { %474 = vrot.lane.b32.xlu1 %v5500_v9, %s5381_s12  ;;  %472 = vrot.lane.b32.xlu0 %v5537_v19, %s5381_s12 }
  0x28   : > { %478 = vrot.lane.b32.xlu1 %v5540_v20, %s5381_s12  ;;  %476 = vrot.lane.b32.xlu0 %v454_v21, %s5381_s12 }
  0x2c   : > { %482 = vrot.lane.b32.xlu1 %v5497_v8, %s5381_s12  ;;  %480 = vrot.lane.b32.xlu0 %v5549_v23, %s5381_s12 }
  0x30   : > { %486 = vrot.lane.b32.xlu1 %v469_v24, %s5381_s12  ;;  %484 = vrot.lane.b32.xlu0 %v471_v25, %s5381_s12  ;;  %s5399_s12 = smov 110  }
  0x34   : > { %550 = vrot.lane.b32.xlu1 %v5511_v14, %s7434_s13  ;;  %548 = vrot.lane.b32.xlu0 %v529_v27, %s7434_s13 }
  0x38   : > { %554 = vrot.lane.b32.xlu1 %v5500_v9, %s7434_s13  ;;  %552 = vrot.lane.b32.xlu0 %v5537_v19, %s7434_s13 }
  0x3c   : > { %558 = vrot.lane.b32.xlu1 %v5523_v16, %s7434_s13  ;;  %556 = vrot.lane.b32.xlu0 %v546_v32, %s7434_s13 }
  0x40   : > { %562 = vrot.lane.b32.xlu1 %v5497_v8, %s7434_s13  ;;  %560 = vrot.lane.b32.xlu0 %v5549_v23, %s7434_s13  ;;  %s5403_s13 = smov 92  }
  0x44   : > { %626 = vrot.lane.b32.xlu1 %v5508_v13, %s7432_s14  ;;  %624 = vrot.lane.b32.xlu0 %v5500_v9, %s7432_s14 }
  0x48   : > { %630 = vrot.lane.b32.xlu1 %v5556_v26, %s7432_s14  ;;  %628 = vrot.lane.b32.xlu0 %v5540_v20, %s7432_s14 }
  0x4c   : > { %634 = vrot.lane.b32.xlu1 %v5516_v15, %s7432_s14  ;;  %632 = vrot.lane.b32.xlu0 %v5497_v8, %s7432_s14 }
  0x50   : > { %638 = vrot.lane.b32.xlu1 %v623_v33, %s7432_s14  ;;  %636 = vrot.lane.b32.xlu0 %v469_v24, %s7432_s14  ;;  %s7446_s14 = smov 100  }
  0x54   : > { %702 = vrot.lane.b32.xlu1 %v377_v18, %s5384_s15  ;;  %700 = vrot.lane.b32.xlu0 %v5511_v14, %s5384_s15 }
  0x58   : > { %706 = vrot.lane.b32.xlu1 %v5508_v13, %s5384_s15  ;;  %704 = vrot.lane.b32.xlu0 %v5500_v9, %s5384_s15 }
  0x5c   : > { %710 = vrot.lane.b32.xlu1 %v394_v17, %s5384_s15  ;;  %708 = vrot.lane.b32.xlu0 %v5523_v16, %s5384_s15 }
  0x60   : > { %714 = vrot.lane.b32.xlu1 %v5516_v15, %s5384_s15  ;;  %712 = vrot.lane.b32.xlu0 %v5497_v8, %s5384_s15  ;;  %s7447_s15 = smov 102  }
  0x64   : > { %778 = vrot.lane.b32.xlu1 %v5500_v9, %s5385_s16  ;;  %776 = vrot.lane.b32.xlu0 %v5537_v19, %s5385_s16 }
  0x68   : > { %782 = vrot.lane.b32.xlu1 %v5540_v20, %s5385_s16  ;;  %780 = vrot.lane.b32.xlu0 %v454_v21, %s5385_s16 }
  0x6c   : > { %786 = vrot.lane.b32.xlu1 %v5497_v8, %s5385_s16  ;;  %784 = vrot.lane.b32.xlu0 %v5549_v23, %s5385_s16 }
  0x70   : > { %790 = vrot.lane.b32.xlu1 %v469_v24, %s5385_s16  ;;  %788 = vrot.lane.b32.xlu0 %v471_v25, %s5385_s16  ;;  %s5401_s16 = smov 101  }
  0x74   : > { %854 = vrot.lane.b32.xlu1 %v5511_v14, %s7438_s17  ;;  %852 = vrot.lane.b32.xlu0 %v529_v27, %s7438_s17 }
  0x78   : > { %858 = vrot.lane.b32.xlu1 %v5500_v9, %s7438_s17  ;;  %856 = vrot.lane.b32.xlu0 %v5537_v19, %s7438_s17 }
  0x7c   : > { %862 = vrot.lane.b32.xlu1 %v5523_v16, %s7438_s17  ;;  %860 = vrot.lane.b32.xlu0 %v546_v32, %s7438_s17 }
  0x80   : > { %930 = vrot.lane.b32.xlu1 %v5508_v13, %s5387_s18  ;;  %864 = vrot.lane.b32.xlu0 %v5549_v23, %s7438_s17  ;;  %s5406_s17 = smov 90  }
  0x84   : > { %1006 = vrot.lane.b32.xlu1 %v5624_v37, %s5388_s19  ;;  %932 = vrot.lane.b32.xlu0 %v5540_v20, %s5387_s18 }
  0x86   : > { %v409_v41 = vpop.permute.xlu0 %408  ;;  %v401_v42 = vpop.permute.xlu1 %400 }
  0x88   : > { %1082 = vrot.lane.b32.xlu1 %v5631_v39, %s5389_s20  ;;  %1008 = vrot.lane.b32.xlu0 %v5631_v39, %s5388_s19 }
  0x8a   : > { %v403_v44 = vpop.permute.xlu1 %402  ;;  %v397_v45 = vpop.permute.xlu0 %396 }
  0x8b   : > { %v415_v46 = vsel %vm7441_vm0, %v401_v42, %v403_v44 }
  0x8c   : > { %429 = vst [vmem:[#allocation2 + $0x10] sm:$0xc] %v415_v46  ;;  %1158 = vrot.lane.b32.xlu1 %v5616_v36, %s5390_s21  ;;  %1084 = vrot.lane.b32.xlu0 %v5642_v43, %s5389_s20  ;;  %v5734_v46 = vcombine.low %v5722_v38, %v5722_v38 }
  0x8e   : > { %v411_v48 = vpop.permute.xlu1 %410  ;;  %v405_v49 = vpop.permute.xlu0 %404 }
  0x8f   : > { %v419_v50 = vsel %vm7441_vm0, %v409_v41, %v411_v48  ;;  %v416_v51 = vsel %vm7441_vm0, %v403_v44, %v405_v49 }
  0x90   : > { %433 = vst [vmem:[#allocation2 + $0x30] sm:$0xc] %v419_v50  ;;  %430 = vst [vmem:[#allocation2 + $0x18] sm:$0xc] %v416_v51  ;;  %928 = vrot.lane.b32.xlu1 %v5500_v9, %s5387_s18  ;;  %1160 = vrot.lane.b32.xlu0 %v5651_v47, %s5390_s21 }
  0x92   : > { %v407_v52 = vpop.permute.xlu1 %406  ;;  %v399_v53 = vpop.permute.xlu0 %398 }
  0x93   : > { %v417_v54 = vsel %vm7441_vm0, %v405_v49, %v407_v52  ;;  %v418_v55 = vsel %vm7441_vm0, %v407_v52, %v409_v41  ;;  %v413_v56 = vsel %vm7441_vm0, %v397_v45, %v399_v53  ;;  %v414_v57 = vsel %vm7441_vm0, %v399_v53, %v401_v42 }
  0x94   : > { %431 = vst [vmem:[#allocation2 + $0x20] sm:$0xc] %v417_v54  ;;  %432 = vst [vmem:[#allocation2 + $0x28] sm:$0xc] %v418_v55  ;;  %1080 = vrot.lane.b32.xlu1 %v5651_v47, %s5389_s20  ;;  %1004 = vrot.lane.b32.xlu0 %v5616_v36, %s5388_s19  ;;  %v5744_v52 = vcombine.low %v5719_v34, %v5719_v34  ;;  %vm7449_vm0 = vcmask 826368  }
  0x95   : > { %427 = vst [vmem:[#allocation2] sm:$0xc] %v413_v56  ;;  %428 = vst [vmem:[#allocation2 + $0x8] sm:$0xc] %v414_v57 }
  0x96   : > { %v475_v60 = vpop.permute.xlu1 %474  ;;  %v473_v61 = vpop.permute.xlu0 %472 }
  0x97   : > { %v489_v62 = vsel %vm488_vm1, %v473_v61, %v475_v60 }
  0x98   : > { %503 = vst [vmem:[#allocation2] sm:$0x30] %v489_v62  ;;  %1234 = vrot.lane.b32.xlu1 %v5669_v58, %s7466_s22  ;;  %1156 = vrot.lane.b32.xlu0 %v1137_v59, %s5390_s21  ;;  %v5760_v62 = vcombine.high %v5719_v34, %v5719_v34 }
  0x9a   : > { %v479_v63 = vpop.permute.xlu1 %478  ;;  %v477_v0 = vpop.permute.xlu0 %476 }
  0x9b   : > { %v490_v1 = vsel %vm488_vm1, %v475_v60, %v477_v0  ;;  %v491_v2 = vsel %vm488_vm1, %v477_v0, %v479_v63 }
  0x9c   : > { %504 = vst [vmem:[#allocation2 + $0x8] sm:$0x30] %v490_v1  ;;  %505 = vst [vmem:[#allocation2 + $0x10] sm:$0x30] %v491_v2  ;;  %1310 = vrot.lane.b32.xlu1 %v5624_v37, %s5392_s23  ;;  %1236 = vrot.lane.b32.xlu0 %v5634_v40, %s7466_s22 }
  0x9e   : > { %v483_v4 = vpop.permute.xlu1 %482  ;;  %v481_v6 = vpop.permute.xlu0 %480 }
  0x9f   : > { %v492_v7 = vsel %vm488_vm1, %v479_v63, %v481_v6  ;;  %v493_v9 = vsel %vm488_vm1, %v481_v6, %v483_v4 }
  0xa0   : > { %506 = vst [vmem:[#allocation2 + $0x18] sm:$0x30] %v492_v7  ;;  %507 = vst [vmem:[#allocation2 + $0x20] sm:$0x30] %v493_v9  ;;  %1386 = vrot.lane.b32.xlu1 %v5631_v39, %s5393_s24  ;;  %1312 = vrot.lane.b32.xlu0 %v5631_v39, %s5392_s23 }
  0xa2   : > { %v487_v10 = vpop.permute.xlu1 %486  ;;  %v485_v11 = vpop.permute.xlu0 %484 }
  0xa3   : > { %v494_v12 = vsel %vm488_vm1, %v483_v4, %v485_v11  ;;  %v495_v13 = vsel %vm488_vm1, %v485_v11, %v487_v10  ;;  %vm1628_vm1 = vcmask 277504  }
  0xa4   : > { %508 = vst [vmem:[#allocation2 + $0x28] sm:$0x30] %v494_v12  ;;  %509 = vst [vmem:[#allocation2 + $0x30] sm:$0x30] %v495_v13  ;;  %1462 = vrot.lane.b32.xlu1 %v5616_v36, %s5394_s25  ;;  %1388 = vrot.lane.b32.xlu0 %v5642_v43, %s5393_s24 }
  0xa6   : > { %v551_v14 = vpop.permute.xlu1 %550  ;;  %v549_v16 = vpop.permute.xlu0 %548 }
  0xa7   : > { %v565_v17 = vsel %vm7440_vm2, %v549_v16, %v551_v14 }
  0xa8   : > { %579 = vst [vmem:[#allocation2] sm:$0xc0] %v565_v17  ;;  %1232 = vrot.lane.b32.xlu1 %v5631_v39, %s7466_s22  ;;  %1464 = vrot.lane.b32.xlu0 %v5651_v47, %s5394_s25 }
  0xaa   : > { %v555_v18 = vpop.permute.xlu1 %554  ;;  %v553_v19 = vpop.permute.xlu0 %552 }
  0xab   : > { %v566_v20 = vsel %vm7440_vm2, %v551_v14, %v553_v19  ;;  %v567_v21 = vsel %vm7440_vm2, %v553_v19, %v555_v18 }
  0xac   : > { %580 = vst [vmem:[#allocation2 + $0x8] sm:$0xc0] %v566_v20  ;;  %581 = vst [vmem:[#allocation2 + $0x10] sm:$0xc0] %v567_v21  ;;  %1384 = vrot.lane.b32.xlu1 %v5651_v47, %s5393_s24  ;;  %1308 = vrot.lane.b32.xlu0 %v5616_v36, %s5392_s23 }
  0xae   : > { %v559_v23 = vpop.permute.xlu1 %558  ;;  %v557_v24 = vpop.permute.xlu0 %556 }
  0xaf   : > { %v568_v25 = vsel %vm7440_vm2, %v555_v18, %v557_v24  ;;  %v569_v27 = vsel %vm7440_vm2, %v557_v24, %v559_v23  ;;  %v2349_v41 = vld [vmem:[#allocation2] sm:$0xff] }
  0xb0   : > { %582 = vst [vmem:[#allocation2 + $0x18] sm:$0xc0] %v568_v25  ;;  %583 = vst [vmem:[#allocation2 + $0x20] sm:$0xc0] %v569_v27  ;;  %1538 = vrot.lane.b32.xlu1 %v5669_v58, %s5395_s26  ;;  %1460 = vrot.lane.b32.xlu0 %v1137_v59, %s5394_s25  ;;  %v5802_v27 = vld [vmem:[%s5492_s10 + $0xa] sm:$0xff] }
  0xb2   : > { %v563_v29 = vpop.permute.xlu1 %562  ;;  %v561_v30 = vpop.permute.xlu0 %560 }
  0xb3   : > { %v570_v31 = vsel %vm7440_vm2, %v559_v23, %v561_v30  ;;  %v571_v32 = vsel %vm7440_vm2, %v561_v30, %v563_v29  ;;  %v2350_v33 = vld [vmem:[#allocation2 + $0x8] sm:$0xff]  ;;  %v2351_v47 = vld [vmem:[#allocation2 + $0x10] sm:$0xff]  ;;  %vm7451_vm2 = vcmask 834560  }
  0xb4   : > { %584 = vst [vmem:[#allocation2 + $0x28] sm:$0xc0] %v570_v31  ;;  %585 = vst [vmem:[#allocation2 + $0x30] sm:$0xc0] %v571_v32  ;;  %1614 = vrot.lane.b32.xlu1 %v5624_v37, %s5396_s29  ;;  %1540 = vrot.lane.b32.xlu0 %v5634_v40, %s5395_s26  ;;  %v5730_v37 = vrot.slane %v1730_v35, %v5487_v5  ;;  %v987_v32 = vcombine.low %v5802_v27, %v5802_v27 }
  0xb5   : > { %2411 = vmatprep.subr.bf16.mxu0 %v2350_v33 }
  0xb6   : > { %2412 = vmatpush1.bf16.msra.mxu0 %v2349_v41  ;;  %v627_v42 = vpop.permute.xlu1 %626  ;;  %v625_v43 = vpop.permute.xlu0 %624  ;;  %v1745_v63 = vcombine.low %v5730_v37, %v5730_v37 }
  0xb7   : > { %v641_v44 = vsel %vm7439_vm3, %v625_v43, %v627_v42  ;;  %v2352_v45 = vld [vmem:[#allocation2 + $0x18] sm:$0xff]  ;;  %v5822_v43 = vrot.slane %v5802_v27, %v5487_v5 }
  0xb8   : > { %655 = vst [vmem:[#allocation2 + $0x38] sm:$0x3] %v641_v44  ;;  %1690 = vrot.lane.b32.xlu1 %v5719_v34, %s5397_s30  ;;  %1616 = vrot.lane.b32.xlu0 %v5631_v39, %s5396_s29 }
  0xb9   : > { %2452 = vmatprep.subr.bf16.mxu1 %v2352_v45 }
  0xba   : > { %2453 = vmatpush1.bf16.msra.mxu1 %v2351_v47  ;;  %v631_v48 = vpop.permute.xlu1 %630  ;;  %v629_v49 = vpop.permute.xlu0 %628 }
  0xbb   : > { %v642_v50 = vsel %vm7439_vm3, %v627_v42, %v629_v49  ;;  %v643_v51 = vsel %vm7439_vm3, %v629_v49, %v631_v48 }
  0xbc   : > { %656 = vst [vmem:[#allocation2 + $0x40] sm:$0x3] %v642_v50  ;;  %657 = vst [vmem:[#allocation2 + $0x48] sm:$0x3] %v643_v51  ;;  %1766 = vrot.lane.b32.xlu1 %v5730_v37, %s5398_s9  ;;  %1692 = vrot.lane.b32.xlu0 %v5734_v46, %s5397_s30 }
  0xbe   : > { %v635_v53 = vpop.permute.xlu1 %634  ;;  %v633_v54 = vpop.permute.xlu0 %632 }
  0xbf   : > { %v644_v55 = vsel %vm7439_vm3, %v631_v48, %v633_v54  ;;  %v645_v56 = vsel %vm7439_vm3, %v633_v54, %v635_v53  ;;  %v5831_v48 = vcombine.low %v5822_v43, %v5822_v43 }
  0xc0   : > { %658 = vst [vmem:[#allocation2 + $0x50] sm:$0x3] %v644_v55  ;;  %659 = vst [vmem:[#allocation2 + $0x58] sm:$0x3] %v645_v56  ;;  %1536 = vrot.lane.b32.xlu1 %v5631_v39, %s5395_s26  ;;  %1768 = vrot.lane.b32.xlu0 %v5744_v52, %s5398_s9 }
  0xc2   : > { %v639_v57 = vpop.permute.xlu1 %638  ;;  %v637_v59 = vpop.permute.xlu0 %636 }
  0xc3   : > { %v646_v60 = vsel %vm7439_vm3, %v635_v53, %v637_v59  ;;  %v647_v61 = vsel %vm7439_vm3, %v637_v59, %v639_v57  ;;  %vm1856_vm3 = vcmask 900096  }
  0xc4   : > { %660 = vst [vmem:[#allocation2 + $0x60] sm:$0x3] %v646_v60  ;;  %661 = vst [vmem:[#allocation2 + $0x68] sm:$0x3] %v647_v61  ;;  %1688 = vrot.lane.b32.xlu1 %v5744_v52, %s5397_s30  ;;  %1612 = vrot.lane.b32.xlu0 %v5616_v36, %s5396_s29  ;;  %v5770_v36 = vcombine.high %v5730_v37, %v5730_v37  ;;  %v5404_v60 = vmov 0  }
  0xc5   : > { %2335 = vst [vmem:[#allocation2 + $0x158] sm:$0xc0] %v5404_v60  ;;  %2334 = vst [vmem:[#allocation2 + $0x150] sm:$0xc0] %v5404_v60  ;;  %2443 = vmatprep.mubr.bf16.mxu0 %v5404_v60  ;;  %2484 = vmatprep.mubr.bf16.mxu1 %v5404_v60 }
  0xc6   : > { %v703_v0 = vpop.permute.xlu1 %702  ;;  %v701_v1 = vpop.permute.xlu0 %700  ;;  %2336 = vst [vmem:[#allocation2 + $0x160] sm:$0xc0] %v5404_v60  ;;  %2337 = vst [vmem:[#allocation2 + $0x168] sm:$0xc0] %v5404_v60  ;;  %5318 = vset.pattern.permute.xlu0 %v5404_v60  ;;  %5319 = vset.pattern.permute.xlu1 %v5404_v60 }
  0xc7   : > { %v717_v2 = vsel %vm716_vm4, %v701_v1, %v703_v0  ;;  %2338 = vst [vmem:[#allocation2 + $0x170] sm:$0xc0] %v5404_v60  ;;  %2339 = vst [vmem:[#allocation2 + $0x178] sm:$0xc0] %v5404_v60 }
  0xc8   : > { %731 = vst [vmem:[#allocation2 + $0x38] sm:$0xc] %v717_v2  ;;  %1842 = vrot.lane.b32.xlu1 %v5760_v62, %s5399_s12  ;;  %1764 = vrot.lane.b32.xlu0 %v1745_v63, %s5398_s9  ;;  %2340 = vst [vmem:[#allocation2 + $0x180] sm:$0xc0] %v5404_v60 }
  0xc9   : > { %2341 = vst [vmem:[#allocation2 + $0x188] sm:$0xff] %v5404_v60  ;;  %2581 = vst [vmem:[#allocation3] sm:$0xff] %v5404_v60 }
  0xca   : > { %v707_v4 = vpop.permute.xlu1 %706  ;;  %v705_v6 = vpop.permute.xlu0 %704  ;;  %2585 = vst [vmem:[#allocation3 + $0x20] sm:$0xff] %v5404_v60  ;;  %2586 = vst [vmem:[#allocation3 + $0x28] sm:$0xf] %v5404_v60 }
  0xcb   : > { %v718_v7 = vsel %vm716_vm4, %v703_v0, %v705_v6  ;;  %v719_v9 = vsel %vm716_vm4, %v705_v6, %v707_v4  ;;  %4305 = vst [vmem:[#allocation4 + $0x2d8] sm:$0xf0] %v5404_v60  ;;  %4306 = vst [vmem:[#allocation4 + $0x2e0] sm:$0xf0] %v5404_v60 }
  0xcc   : > { %732 = vst [vmem:[#allocation2 + $0x40] sm:$0xc] %v718_v7  ;;  %733 = vst [vmem:[#allocation2 + $0x48] sm:$0xc] %v719_v9  ;;  %1918 = vrot.lane.b32.xlu1 %v5770_v36, %s7447_s15  ;;  %1844 = vrot.lane.b32.xlu0 %v5722_v38, %s5399_s12 }
  0xcd   : > { %4307 = vst [vmem:[#allocation4 + $0x2e8] sm:$0xf0] %v5404_v60  ;;  %4308 = vst [vmem:[#allocation4 + $0x2f0] sm:$0xf0] %v5404_v60 }
  0xce   : > { %v711_v10 = vpop.permute.xlu1 %710  ;;  %v709_v11 = vpop.permute.xlu0 %708  ;;  %4309 = vst [vmem:[#allocation4 + $0x2f8] sm:$0xf0] %v5404_v60  ;;  %4310 = vst [vmem:[#allocation4 + $0x300] sm:$0xf0] %v5404_v60 }
  0xcf   : > { %v720_v12 = vsel %vm716_vm4, %v707_v4, %v709_v11  ;;  %v721_v13 = vsel %vm716_vm4, %v709_v11, %v711_v10  ;;  %4311 = vst [vmem:[#allocation4 + $0x308] sm:$0xf0] %v5404_v60 }
  0xd0   : > { %734 = vst [vmem:[#allocation2 + $0x50] sm:$0xc] %v720_v12  ;;  %735 = vst [vmem:[#allocation2 + $0x58] sm:$0xc] %v721_v13  ;;  %1994 = vrot.lane.b32.xlu1 %v5719_v34, %s5401_s16  ;;  %1920 = vrot.lane.b32.xlu0 %v5719_v34, %s7447_s15 }
  0xd2   : > { %v715_v14 = vpop.permute.xlu1 %714  ;;  %v713_v16 = vpop.permute.xlu0 %712 }
  0xd3   : > { %v722_v17 = vsel %vm716_vm4, %v711_v10, %v713_v16  ;;  %v723_v18 = vsel %vm716_vm4, %v713_v16, %v715_v14  ;;  %vm1704_vm4 = vcmask 916480  }
  0xd4   : > { %736 = vst [vmem:[#allocation2 + $0x60] sm:$0xc] %v722_v17  ;;  %737 = vst [vmem:[#allocation2 + $0x68] sm:$0xc] %v723_v18  ;;  %2070 = vrot.lane.b32.xlu1 %v5730_v37, %s7446_s14  ;;  %1996 = vrot.lane.b32.xlu0 %v5734_v46, %s5401_s16  ;;  %v1214_v17 = vcombine.high %v5634_v40, %v5634_v40 }
  0xd6   : > { %v779_v19 = vpop.permute.xlu1 %778  ;;  %v777_v20 = vpop.permute.xlu0 %776 }
  0xd7   : > { %v793_v21 = vsel %vm792_vm5, %v777_v20, %v779_v19 }
  0xd8   : > { %807 = vst [vmem:[#allocation2 + $0x38] sm:$0x30] %v793_v21  ;;  %1840 = vrot.lane.b32.xlu1 %v5719_v34, %s5399_s12  ;;  %2072 = vrot.lane.b32.xlu0 %v5744_v52, %s7446_s14 }
  0xda   : > { %v783_v22 = vpop.permute.xlu1 %782  ;;  %v781_v23 = vpop.permute.xlu0 %780 }
  0xdb   : > { %v794_v24 = vsel %vm792_vm5, %v779_v19, %v781_v23  ;;  %v795_v25 = vsel %vm792_vm5, %v781_v23, %v783_v22 }
  0xdc   : > { %808 = vst [vmem:[#allocation2 + $0x40] sm:$0x30] %v794_v24  ;;  %809 = vst [vmem:[#allocation2 + $0x48] sm:$0x30] %v795_v25  ;;  %1992 = vrot.lane.b32.xlu1 %v5744_v52, %s5401_s16  ;;  %1916 = vrot.lane.b32.xlu0 %v5730_v37, %s7447_s15 }
  0xde   : > { %v787_v28 = vpop.permute.xlu1 %786  ;;  %v785_v29 = vpop.permute.xlu0 %784 }
  0xdf   : > { %v796_v30 = vsel %vm792_vm5, %v783_v22, %v785_v29  ;;  %v797_v31 = vsel %vm792_vm5, %v785_v29, %v787_v28 }
  0xe0   : > { %810 = vst [vmem:[#allocation2 + $0x50] sm:$0x30] %v796_v30  ;;  %811 = vst [vmem:[#allocation2 + $0x58] sm:$0x30] %v797_v31  ;;  %934 = vrot.lane.b32.xlu1 %v5556_v26, %s5387_s18  ;;  %2068 = vrot.lane.b32.xlu0 %v1745_v63, %s7446_s14  ;;  %v5818_v26 = vrot.slane %v987_v32, %v5487_v5  ;;  %v5933_v32 = vld [vmem:[%s5492_s10 + $0xe] sm:$0xff] }
  0xe2   : > { %v791_v33 = vpop.permute.xlu1 %790  ;;  %v789_v35 = vpop.permute.xlu0 %788  ;;  %v5841_v54 = vcombine.low %v5818_v26, %v5818_v26 }
  0xe3   : > { %v798_v41 = vsel %vm792_vm5, %v787_v28, %v789_v35  ;;  %v799_v42 = vsel %vm792_vm5, %v789_v35, %v791_v33  ;;  %vm1780_vm5 = vcmask 908288  }
  0xe4   : > { %812 = vst [vmem:[#allocation2 + $0x60] sm:$0x30] %v798_v41  ;;  %813 = vst [vmem:[#allocation2 + $0x68] sm:$0x30] %v799_v42  ;;  %1010 = vrot.lane.b32.xlu1 %v5669_v58, %s5388_s19  ;;  %936 = vrot.lane.b32.xlu0 %v5497_v8, %s5387_s18  ;;  %v1747_v42 = vcombine.low %v5933_v32, %v5933_v32 }
  0xe6   : > { %v855_v44 = vpop.permute.xlu1 %854  ;;  %v853_v45 = vpop.permute.xlu0 %852 }
  0xe7   : > { %v869_v47 = vsel %vm7442_vm6, %v853_v45, %v855_v44 }
  0xe8   : > { %883 = vst [vmem:[#allocation2 + $0x38] sm:$0xc0] %v869_v47  ;;  %1086 = vrot.lane.b32.xlu1 %v5634_v40, %s5389_s20  ;;  %1012 = vrot.lane.b32.xlu0 %v5818_v26, %s5388_s19 }
  0xea   : > { %v859_v49 = vpop.permute.xlu1 %858  ;;  %v857_v50 = vpop.permute.xlu0 %856 }
  0xeb   : > { %v870_v51 = vsel %vm7442_vm6, %v855_v44, %v857_v50  ;;  %v871_v53 = vsel %vm7442_vm6, %v857_v50, %v859_v49  ;;  %v5961_v50 = vrot.slane %v1747_v42, %v5487_v5 }
  0xec   : > { %884 = vst [vmem:[#allocation2 + $0x40] sm:$0xc0] %v870_v51  ;;  %885 = vst [vmem:[#allocation2 + $0x48] sm:$0xc0] %v871_v53  ;;  %1162 = vrot.lane.b32.xlu1 %v5631_v39, %s5390_s21  ;;  %1088 = vrot.lane.b32.xlu0 %v5831_v48, %s5389_s20 }
  0xee   : > { %v863_v55 = vpop.permute.xlu1 %862  ;;  %v861_v56 = vpop.permute.xlu0 %860 }
  0xef   : > { %v872_v57 = vsel %vm7442_vm6, %v859_v49, %v861_v56  ;;  %v873_v59 = vsel %vm7442_vm6, %v861_v56, %v863_v55  ;;  %v2356_v2 = vld [vmem:[#allocation2 + $0x38] sm:$0xff] }
  0xf0   : > { %886 = vst [vmem:[#allocation2 + $0x50] sm:$0xc0] %v872_v57  ;;  %887 = vst [vmem:[#allocation2 + $0x58] sm:$0xc0] %v873_v59  ;;  %2146 = vrot.lane.b32.xlu1 %v5760_v62, %s5403_s13  ;;  %1164 = vrot.lane.b32.xlu0 %v5841_v54, %s5390_s21 }
  0xf2   : > { %v931_v61 = vpop.permute.xlu1 %930  ;;  %v5869_v63 = vpop.permute.xlu0 %864 }
  0xf3   : > { %v874_v0 = vsel %vm7442_vm6, %v863_v55, %v5869_v63  ;;  %v2357_v1 = vld [vmem:[#allocation2 + $0x40] sm:$0xff]  ;;  %vm7448_vm6 = vcmask 818176  }
  0xf4   : > { %888 = vst [vmem:[#allocation2 + $0x60] sm:$0xc0] %v874_v0  ;;  %2222 = vrot.lane.b32.xlu1 %v5770_v36, %s5405_s11  ;;  %2148 = vrot.lane.b32.xlu0 %v5722_v38, %s5403_s13  ;;  %v2358_v36 = vld [vmem:[#allocation2 + $0x48] sm:$0xff]  ;;  %v5978_v0 = vcombine.high %v5722_v38, %v5722_v38 }
  0xf5   : > { %2413 = vmatprep.subr.bf16.mxu0 %v2357_v1 }
  0xf6   : > { %2414 = vmatpush1.bf16.msra.mxu0 %v2356_v2  ;;  %v1007_v4 = vpop.permute.xlu1 %1006  ;;  %v5879_v6 = vpop.permute.xlu0 %932 }
  0xf7   : > { %v946_v7 = vsel %vm7450_vm7, %v931_v61, %v5879_v6  ;;  %v2359_v9 = vld [vmem:[#allocation2 + $0x50] sm:$0xff] }
  0xf8   : > { %960 = vst [vmem:[#allocation2 + $0x78] sm:$0x3] %v946_v7  ;;  %2298 = vrot.lane.b32.xlu1 %v5719_v34, %s5406_s17  ;;  %2224 = vrot.lane.b32.xlu0 %v5719_v34, %s5405_s11 }
  0xf9   : > { %2454 = vmatprep.subr.bf16.mxu1 %v2359_v9 }
  0xfa   : > { %2455 = vmatpush1.bf16.msra.mxu1 %v2358_v36  ;;  %v1083_v10 = vpop.permute.xlu1 %1082  ;;  %v5887_v11 = vpop.permute.xlu0 %1008 }
  0xfb   : > { %v1022_v12 = vsel %vm7445_vm8, %v1007_v4, %v5887_v11 }
  0xfc   : > { %1036 = vst [vmem:[#allocation2 + $0x78] sm:$0xc] %v1022_v12  ;;  %2144 = vrot.lane.b32.xlu1 %v5719_v34, %s5403_s13  ;;  %2300 = vrot.lane.b32.xlu0 %v5734_v46, %s5406_s17 }
  0xfe   : > { %v1159_v13 = vpop.permute.xlu1 %1158  ;;  %v5895_v14 = vpop.permute.xlu0 %1084 }
  0xff   : > { %v1098_v16 = vsel %vm7443_vm9, %v1083_v10, %v5895_v14 }
 0x100   : > { %1112 = vst [vmem:[#allocation2 + $0x78] sm:$0x30] %v1098_v16  ;;  %2296 = vrot.lane.b32.xlu1 %v5744_v52, %s5406_s17  ;;  %2220 = vrot.lane.b32.xlu0 %v5730_v37, %s5405_s11 }
 0x102   : > { %v929_v18 = vpop.permute.xlu1 %928  ;;  %v5905_v46 = vpop.permute.xlu0 %1160 }
 0x103   : > { %v945_v19 = vsel %vm7450_vm7, %v929_v18, %v931_v61  ;;  %v1174_v20 = vsel %vm7444_vm10, %v1159_v13, %v5905_v46  ;;  %v5359_v18 = vld [vmem:[%s5492_s10 + $0x8] sm:$0xff] }
 0x104   : > { %959 = vst [vmem:[#allocation2 + $0x70] sm:$0x3] %v945_v19  ;;  %1188 = vst [vmem:[#allocation2 + $0x78] sm:$0xc0] %v1174_v20  ;;  %1240 = vrot.lane.b32.xlu1 %v5822_v43, %s7466_s22  ;;  %1238 = vrot.lane.b32.xlu0 %v1214_v17, %s7466_s22  ;;  %v911_v19 = vcombine.high %v5359_v18, %v5359_v18 }
 0x106   : > { %v1081_v52 = vpop.permute.xlu1 %1080  ;;  %v1005_v21 = vpop.permute.xlu0 %1004 }
 0x107   : > { %v1097_v37 = vsel %vm7443_vm9, %v1081_v52, %v1083_v10  ;;  %v1021_v22 = vsel %vm7445_vm8, %v1005_v21, %v1007_v4 }
 0x108   : > { %1111 = vst [vmem:[#allocation2 + $0x70] sm:$0x30] %v1097_v37  ;;  %1035 = vst [vmem:[#allocation2 + $0x70] sm:$0xc] %v1021_v22  ;;  %1316 = vrot.lane.b32.xlu1 %v5818_v26, %s5392_s23  ;;  %1314 = vrot.lane.b32.xlu0 %v5669_v58, %s5392_s23  ;;  %v6013_v37 = vrot.slane %v911_v19, %v5487_v5  ;;  %v1063_v22 = vcombine.high %v5802_v27, %v5802_v27 }
 0x10a   : > { %v1235_v23 = vpop.permute.xlu1 %1234  ;;  %v1157_v24 = vpop.permute.xlu0 %1156  ;;  %v6031_v27 = vrot.slane %v1063_v22, %v5487_v5 }
 0x10b   : > { %v1173_v25 = vsel %vm7444_vm10, %v1157_v24, %v1159_v13  ;;  %v2364_v28 = vld [vmem:[#allocation2 + $0x78] sm:$0xff] }
 0x10c   : > { %1187 = vst [vmem:[#allocation2 + $0x70] sm:$0xc0] %v1173_v25  ;;  %1392 = vrot.lane.b32.xlu1 %v5831_v48, %s5393_s24  ;;  %1390 = vrot.lane.b32.xlu0 %v5634_v40, %s5393_s24 }
 0x10d   : > { %2415 = vmatprep.subr.bf16.mxu0 %v2364_v28 }
 0x10e   : > { %v1311_v29 = vpop.permute.xlu1 %1310  ;;  %v5924_v30 = vpop.permute.xlu0 %1236 }
 0x10f   : > { %v1250_v31 = vsel %vm1248_vm11, %v1235_v23, %v5924_v30 }
 0x110   : > { %1264 = vst [vmem:[#allocation2 + $0xb0] sm:$0x3] %v1250_v31  ;;  %1468 = vrot.lane.b32.xlu1 %v5841_v54, %s5394_s25  ;;  %1466 = vrot.lane.b32.xlu0 %v5631_v39, %s5394_s25  ;;  %v5944_v39 = vrot.slane %v5933_v32, %v5487_v5 }
 0x112   : > { %v1387_v33 = vpop.permute.xlu1 %1386  ;;  %v5935_v40 = vpop.permute.xlu0 %1312  ;;  %v5958_v49 = vcombine.low %v5944_v39, %v5944_v39 }
 0x113   : > { %v1326_v35 = vsel %vm1324_vm12, %v1311_v29, %v5935_v40  ;;  %v2363_v41 = vld [vmem:[#allocation2 + $0x70] sm:$0xff] }
 0x114   : > { %1340 = vst [vmem:[#allocation2 + $0xb0] sm:$0xc] %v1326_v35  ;;  %1544 = vrot.lane.b32.xlu1 %v5822_v43, %s5395_s26  ;;  %1542 = vrot.lane.b32.xlu0 %v1214_v17, %s5395_s26 }
 0x115   : > { %2416 = vmatpush1.bf16.msra.mxu0 %v2363_v41 }
 0x116   : > { %v1463_v44 = vpop.permute.xlu1 %1462  ;;  %v5948_v45 = vpop.permute.xlu0 %1388 }
 0x117   : > { %v1402_v47 = vsel %vm1400_vm13, %v1387_v33, %v5948_v45 }
 0x118   : > { %1416 = vst [vmem:[#allocation2 + $0xb0] sm:$0x30] %v1402_v47  ;;  %1620 = vrot.lane.b32.xlu1 %v5818_v26, %s5396_s29  ;;  %1618 = vrot.lane.b32.xlu0 %v5669_v58, %s5396_s29  ;;  %v1762_v58 = vcombine.low %v5961_v50, %v5961_v50 }
 0x11a   : > { %v1233_v51 = vpop.permute.xlu1 %1232  ;;  %v5963_v53 = vpop.permute.xlu0 %1464 }
 0x11b   : > { %v1249_v54 = vsel %vm1248_vm11, %v1233_v51, %v1235_v23  ;;  %v1478_v55 = vsel %vm1476_vm14, %v1463_v44, %v5963_v53 }
 0x11c   : > { %1263 = vst [vmem:[#allocation2 + $0xa8] sm:$0x3] %v1249_v54  ;;  %1492 = vst [vmem:[#allocation2 + $0xb0] sm:$0xc0] %v1478_v55  ;;  %1696 = vrot.lane.b32.xlu1 %v5958_v49, %s5397_s30  ;;  %1694 = vrot.lane.b32.xlu0 %v5722_v38, %s5397_s30 }
 0x11e   : > { %v1385_v56 = vpop.permute.xlu1 %1384  ;;  %v1309_v57 = vpop.permute.xlu0 %1308 }
 0x11f   : > { %v1401_v59 = vsel %vm1400_vm13, %v1385_v56, %v1387_v33  ;;  %v1325_v61 = vsel %vm1324_vm12, %v1309_v57, %v1311_v29 }
 0x120   : > { %1415 = vst [vmem:[#allocation2 + $0xa8] sm:$0x30] %v1401_v59  ;;  %1339 = vst [vmem:[#allocation2 + $0xa8] sm:$0xc] %v1325_v61  ;;  %1772 = vrot.lane.b32.xlu1 %v1762_v58, %s5398_s9  ;;  %1770 = vrot.lane.b32.xlu0 %v5719_v34, %s5398_s9 }
 0x122   : > { %v1539_v1 = vpop.permute.xlu1 %1538  ;;  %v1461_v2 = vpop.permute.xlu0 %1460 }
 0x123   : > { %v1477_v4 = vsel %vm1476_vm14, %v1461_v2, %v1463_v44  ;;  %v2371_v7 = vld [vmem:[#allocation2 + $0xb0] sm:$0xff] }
 0x124   : > { %1491 = vst [vmem:[#allocation2 + $0xa8] sm:$0xc0] %v1477_v4  ;;  %1848 = vrot.lane.b32.xlu1 %v5944_v39, %s5399_s12  ;;  %1846 = vrot.lane.b32.xlu0 %v5978_v0, %s5399_s12 }
 0x125   : > { %2417 = vmatprep.subr.bf16.mxu0 %v2371_v7 }
 0x126   : > { %v1615_v9 = vpop.permute.xlu1 %1614  ;;  %v5988_v36 = vpop.permute.xlu0 %1540 }
 0x127   : > { %v1554_v10 = vsel %vm1552_vm15, %v1539_v1, %v5988_v36 }
 0x128   : > { %1568 = vst [vmem:[#allocation2 + $0xe8] sm:$0x3] %v1554_v10  ;;  %1924 = vrot.lane.b32.xlu1 %v5961_v50, %s7447_s15  ;;  %1922 = vrot.lane.b32.xlu0 %v5760_v62, %s7447_s15 }
 0x12a   : > { %v1691_v12 = vpop.permute.xlu1 %1690  ;;  %v5996_v13 = vpop.permute.xlu0 %1616 }
 0x12b   : > { %v1630_v16 = vsel %vm1628_vm1, %v1615_v9, %v5996_v13  ;;  %v2370_v17 = vld [vmem:[#allocation2 + $0xa8] sm:$0xff] }
 0x12c   : > { %1644 = vst [vmem:[#allocation2 + $0xe8] sm:$0xc] %v1630_v16  ;;  %2000 = vrot.lane.b32.xlu1 %v5958_v49, %s5401_s16  ;;  %1998 = vrot.lane.b32.xlu0 %v5722_v38, %s5401_s16 }
 0x12d   : > { %2418 = vmatpush1.bf16.msra.mxu0 %v2370_v17 }
 0x12e   : > { %v1767_v20 = vpop.permute.xlu1 %1766  ;;  %v6005_v52 = vpop.permute.xlu0 %1692 }
 0x12f   : > { %v1706_v21 = vsel %vm1704_vm4, %v1691_v12, %v6005_v52 }
 0x130   : > { %1720 = vst [vmem:[#allocation2 + $0xe8] sm:$0x30] %v1706_v21  ;;  %2076 = vrot.lane.b32.xlu1 %v1762_v58, %s7446_s14  ;;  %2074 = vrot.lane.b32.xlu0 %v5719_v34, %s7446_s14  ;;  %v6028_v34 = vcombine.high %v5818_v26, %v5818_v26 }
 0x132   : > { %v1537_v23 = vpop.permute.xlu1 %1536  ;;  %v6017_v24 = vpop.permute.xlu0 %1768 }
 0x133   : > { %v1553_v25 = vsel %vm1552_vm15, %v1537_v23, %v1539_v1  ;;  %v1782_v28 = vsel %vm1780_vm5, %v1767_v20, %v6017_v24 }
 0x134   : > { %1567 = vst [vmem:[#allocation2 + $0xe0] sm:$0x3] %v1553_v25  ;;  %1796 = vst [vmem:[#allocation2 + $0xe8] sm:$0xc0] %v1782_v28  ;;  %940 = vrot.lane.b32.xlu1 %v6013_v37, %s5387_s18  ;;  %938 = vrot.lane.b32.xlu0 %v5516_v15, %s5387_s18  ;;  %v6041_v15 = vcombine.low %v6031_v27, %v6031_v27 }
 0x136   : > { %v1689_v29 = vpop.permute.xlu1 %1688  ;;  %v1613_v31 = vpop.permute.xlu0 %1612 }
 0x137   : > { %v1705_v33 = vsel %vm1704_vm4, %v1689_v29, %v1691_v12  ;;  %v1629_v35 = vsel %vm1628_vm1, %v1613_v31, %v1615_v9 }
 0x138   : > { %1719 = vst [vmem:[#allocation2 + $0xe0] sm:$0x30] %v1705_v33  ;;  %1643 = vst [vmem:[#allocation2 + $0xe0] sm:$0xc] %v1629_v35  ;;  %1016 = vrot.lane.b32.xlu1 %v5822_v43, %s5388_s19  ;;  %1014 = vrot.lane.b32.xlu0 %v6028_v34, %s5388_s19  ;;  %v1671_v35 = vcombine.high %v5933_v32, %v5933_v32 }
 0x13a   : > { %v1843_v41 = vpop.permute.xlu1 %1842  ;;  %v1765_v42 = vpop.permute.xlu0 %1764 }
 0x13b   : > { %v1781_v44 = vsel %vm1780_vm5, %v1765_v42, %v1767_v20  ;;  %v2378_v47 = vld [vmem:[#allocation2 + $0xe8] sm:$0xff] }
 0x13c   : > { %1795 = vst [vmem:[#allocation2 + $0xe0] sm:$0xc0] %v1781_v44  ;;  %1092 = vrot.lane.b32.xlu1 %v6041_v15, %s5389_s20  ;;  %1090 = vrot.lane.b32.xlu0 %v5822_v43, %s5389_s20 }
 0x13d   : > { %2419 = vmatprep.subr.bf16.mxu0 %v2378_v47 }
 0x13e   : > { %v1919_v51 = vpop.permute.xlu1 %1918  ;;  %v6048_v54 = vpop.permute.xlu0 %1844 }
 0x13f   : > { %v1858_v55 = vsel %vm1856_vm3, %v1843_v41, %v6048_v54 }
 0x140   : > { %1872 = vst [vmem:[#allocation2 + $0x120] sm:$0x3] %v1858_v55  ;;  %1168 = vrot.lane.b32.xlu1 %v5831_v48, %s5390_s21  ;;  %1166 = vrot.lane.b32.xlu0 %v5818_v26, %s5390_s21 }
 0x142   : > { %v1995_v58 = vpop.permute.xlu1 %1994  ;;  %v6056_v56 = vpop.permute.xlu0 %1920 }
 0x143   : > { %v1934_v57 = vsel %vm7451_vm2, %v1919_v51, %v6056_v56  ;;  %v2377_v59 = vld [vmem:[#allocation2 + $0xe0] sm:$0xff] }
 0x144   : > { %1948 = vst [vmem:[#allocation2 + $0x120] sm:$0xc] %v1934_v57  ;;  %2152 = vrot.lane.b32.xlu1 %v5944_v39, %s5403_s13  ;;  %2150 = vrot.lane.b32.xlu0 %v5978_v0, %s5403_s13 }
 0x145   : > { %2420 = vmatpush1.bf16.msra.mxu0 %v2377_v59 }
 0x146   : > { %v2071_v61 = vpop.permute.xlu1 %2070  ;;  %v6064_v1 = vpop.permute.xlu0 %1996 }
 0x147   : > { %v2010_v2 = vsel %vm7449_vm0, %v1995_v58, %v6064_v1 }
 0x148   : > { %2024 = vst [vmem:[#allocation2 + $0x120] sm:$0x30] %v2010_v2  ;;  %2228 = vrot.lane.b32.xlu1 %v5961_v50, %s5405_s11  ;;  %2226 = vrot.lane.b32.xlu0 %v5760_v62, %s5405_s11  ;;  %v6083_v62 = vcombine.high %v5822_v43, %v5822_v43 }
 0x14a   : > { %v1841_v4 = vpop.permute.xlu1 %1840  ;;  %v6072_v7 = vpop.permute.xlu0 %2072 }
 0x14b   : > { %v1857_v0 = vsel %vm1856_vm3, %v1841_v4, %v1843_v41  ;;  %v2086_v9 = vsel %vm7448_vm6, %v2071_v61, %v6072_v7 }
 0x14c   : > { %1871 = vst [vmem:[#allocation2 + $0x118] sm:$0x3] %v1857_v0  ;;  %2100 = vst [vmem:[#allocation2 + $0x120] sm:$0xc0] %v2086_v9  ;;  %2304 = vrot.lane.b32.xlu1 %v5958_v49, %s5406_s17  ;;  %2302 = vrot.lane.b32.xlu0 %v5722_v38, %s5406_s17 }
 0x14e   : > { %v1993_v10 = vpop.permute.xlu1 %1992  ;;  %v1917_v12 = vpop.permute.xlu0 %1916 }
 0x14f   : > { %v2009_v16 = vsel %vm7449_vm0, %v1993_v10, %v1995_v58  ;;  %v1933_v17 = vsel %vm7451_vm2, %v1917_v12, %v1919_v51  ;;  %v1914_v12 = vcombine.high %v5961_v50, %v5961_v50 }
 0x150   : > { %2023 = vst [vmem:[#allocation2 + $0x118] sm:$0x30] %v2009_v16  ;;  %1947 = vst [vmem:[#allocation2 + $0x118] sm:$0xc] %v1933_v17  ;;  %1244 = vrot.lane.b32.xlu1 %v6031_v27, %s7466_s22  ;;  %1242 = vrot.lane.b32.xlu0 %v6083_v62, %s7466_s22 }
 0x152   : > { %v935_v18 = vpop.permute.xlu1 %934  ;;  %v2069_v38 = vpop.permute.xlu0 %2068 }
 0x153   : > { %v947_v19 = vsel %vm7450_vm7, %v5879_v6, %v935_v18  ;;  %v2085_v20 = vsel %vm7448_vm6, %v2069_v38, %v2071_v61  ;;  %v2385_v21 = vld [vmem:[#allocation2 + $0x120] sm:$0xff]  ;;  %v6163_v61 = vcombine.high %v5944_v39, %v5944_v39 }
 0x154   : > { %961 = vst [vmem:[#allocation2 + $0x80] sm:$0x3] %v947_v19  ;;  %2099 = vst [vmem:[#allocation2 + $0x118] sm:$0xc0] %v2085_v20  ;;  %1320 = vrot.lane.b32.xlu1 %v5822_v43, %s5392_s23  ;;  %1318 = vrot.lane.b32.xlu0 %v6028_v34, %s5392_s23 }
 0x155   : > { %2421 = vmatprep.subr.bf16.mxu0 %v2385_v21 }
 0x156   : > { %v1011_v22 = vpop.permute.xlu1 %1010  ;;  %v6098_v23 = vpop.permute.xlu0 %936 }
 0x157   : > { %v1023_v25 = vsel %vm7445_vm8, %v5887_v11, %v1011_v22  ;;  %v948_v6 = vsel %vm7450_vm7, %v935_v18, %v6098_v23 }
 0x158   : > { %1037 = vst [vmem:[#allocation2 + $0x80] sm:$0xc] %v1023_v25  ;;  %962 = vst [vmem:[#allocation2 + $0x88] sm:$0x3] %v948_v6  ;;  %1396 = vrot.lane.b32.xlu1 %v6041_v15, %s5393_s24  ;;  %1394 = vrot.lane.b32.xlu0 %v5822_v43, %s5393_s24 }
 0x15a   : > { %v1087_v28 = vpop.permute.xlu1 %1086  ;;  %v6108_v29 = vpop.permute.xlu0 %1012 }
 0x15b   : > { %v1099_v31 = vsel %vm7443_vm9, %v5895_v14, %v1087_v28  ;;  %v1024_v11 = vsel %vm7445_vm8, %v1011_v22, %v6108_v29  ;;  %v2384_v33 = vld [vmem:[#allocation2 + $0x118] sm:$0xff]  ;;  %vm2312_vm8 = vcmask 736256  }
 0x15c   : > { %1113 = vst [vmem:[#allocation2 + $0x80] sm:$0x30] %v1099_v31  ;;  %1038 = vst [vmem:[#allocation2 + $0x88] sm:$0xc] %v1024_v11  ;;  %1472 = vrot.lane.b32.xlu1 %v5831_v48, %s5394_s25  ;;  %1470 = vrot.lane.b32.xlu0 %v5818_v26, %s5394_s25  ;;  %v6131_v26 = vrot.slane %v1671_v35, %v5487_v5 }
 0x15d   : > { %2422 = vmatpush1.bf16.msra.mxu0 %v2384_v33 }
 0x15e   : > { %v1163_v15 = vpop.permute.xlu1 %1162  ;;  %v6120_v41 = vpop.permute.xlu0 %1088  ;;  %v6143_v44 = vcombine.low %v6131_v26, %v6131_v26 }
 0x15f   : > { %v1175_v14 = vsel %vm7444_vm10, %v5905_v46, %v1163_v15  ;;  %v1100_v42 = vsel %vm7443_vm9, %v1087_v28, %v6120_v41  ;;  %vm2160_vm9 = vcmask 752640  }
 0x160   : > { %1189 = vst [vmem:[#allocation2 + $0x80] sm:$0xc0] %v1175_v14  ;;  %1114 = vst [vmem:[#allocation2 + $0x88] sm:$0x30] %v1100_v42  ;;  %1548 = vrot.lane.b32.xlu1 %v6031_v27, %s5395_s26  ;;  %1546 = vrot.lane.b32.xlu0 %v6083_v62, %s5395_s26 }
 0x162   : > { %v2147_v48 = vpop.permute.xlu1 %2146  ;;  %v6133_v32 = vpop.permute.xlu0 %1164 }
 0x163   : > { %v1176_v46 = vsel %vm7444_vm10, %v1163_v15, %v6133_v32  ;;  %vm2236_vm10 = vcmask 744448  }
 0x164   : > { %1190 = vst [vmem:[#allocation2 + $0x88] sm:$0xc0] %v1176_v46  ;;  %1624 = vrot.lane.b32.xlu1 %v5822_v43, %s5396_s29  ;;  %1622 = vrot.lane.b32.xlu0 %v6028_v34, %s5396_s29  ;;  %v2353_v46 = vld [vmem:[#allocation2 + $0x20] sm:$0xff] }
 0x166   : > { %v2223_v47 = vpop.permute.xlu1 %2222  ;;  %v6145_v51 = vpop.permute.xlu0 %2148 }
 0x167   : > { %v2162_v55 = vsel %vm2160_vm9, %v2147_v48, %v6145_v51  ;;  %v2365_v2 = vld [vmem:[#allocation2 + $0x80] sm:$0xff] }
 0x168   : > { %2176 = vst [vmem:[#allocation2 + $0x158] sm:$0x3] %v2162_v55  ;;  %1700 = vrot.lane.b32.xlu1 %v6143_v44, %s5397_s30  ;;  %1698 = vrot.lane.b32.xlu0 %v5944_v39, %s5397_s30 }
 0x16a   : > { %v2299_v34 = vpop.permute.xlu1 %2298  ;;  %v6153_v58 = vpop.permute.xlu0 %2224 }
 0x16b   : > { %v2238_v57 = vsel %vm2236_vm10, %v2223_v47, %v6153_v58  ;;  %v2366_v59 = vld [vmem:[#allocation2 + $0x88] sm:$0xff] }
 0x16c   : > { %2252 = vst [vmem:[#allocation2 + $0x158] sm:$0xc] %v2238_v57  ;;  %1776 = vrot.lane.b32.xlu1 %v5958_v49, %s5398_s9  ;;  %1774 = vrot.lane.b32.xlu0 %v5961_v50, %s5398_s9 }
 0x16d   : > { %2456 = vmatprep.subr.bf16.mxu1 %v2366_v59  ;;  %v927_v59 = vcombine.high %v6013_v37, %v6013_v37 }
 0x16e   : > { %2457 = vmatpush1.bf16.msra.mxu1 %v2365_v2  ;;  %v2145_v4 = vpop.permute.xlu1 %2144  ;;  %v6165_v0 = vpop.permute.xlu0 %2300  ;;  %v2360_v2 = vld [vmem:[#allocation2 + $0x58] sm:$0xff] }
 0x16f   : > { %v2161_v9 = vsel %vm2160_vm9, %v2145_v4, %v2147_v48  ;;  %v2314_v10 = vsel %vm2312_vm8, %v2299_v34, %v6165_v0 }
 0x170   : > { %2175 = vst [vmem:[#allocation2 + $0x150] sm:$0x3] %v2161_v9  ;;  %2328 = vst [vmem:[#allocation2 + $0x158] sm:$0x30] %v2314_v10  ;;  %1852 = vrot.lane.b32.xlu1 %v6131_v26, %s5399_s12  ;;  %1850 = vrot.lane.b32.xlu0 %v6163_v61, %s5399_s12 }
 0x172   : > { %v2297_v16 = vpop.permute.xlu1 %2296  ;;  %v2221_v17 = vpop.permute.xlu0 %2220 }
 0x173   : > { %v2313_v18 = vsel %vm2312_vm8, %v2297_v16, %v2299_v34  ;;  %v2237_v38 = vsel %vm2236_vm10, %v2221_v17, %v2223_v47  ;;  %v2361_v47 = vld [vmem:[#allocation2 + $0x60] sm:$0xff] }
 0x174   : > { %2327 = vst [vmem:[#allocation2 + $0x150] sm:$0x30] %v2313_v18  ;;  %2251 = vst [vmem:[#allocation2 + $0x150] sm:$0xc] %v2237_v38  ;;  %1928 = vrot.lane.b32.xlu1 %v5944_v39, %s7447_s15  ;;  %1926 = vrot.lane.b32.xlu0 %v1914_v12, %s7447_s15  ;;  %s5415_s15 = smov 63  }
 0x176   : > { %v6181_v19 = vpop.permute.xlu1 %1240  ;;  %v1239_v20 = vpop.permute.xlu0 %1238 }
 0x177   : > { %v1251_v21 = vsel %vm1248_vm11, %v5924_v30, %v1239_v20  ;;  %v1252_v22 = vsel %vm1248_vm11, %v1239_v20, %v6181_v19  ;;  %v2392_v25 = vld [vmem:[#allocation2 + $0x158] sm:$0xff] }
 0x178   : > { %1265 = vst [vmem:[#allocation2 + $0xb8] sm:$0x3] %v1251_v21  ;;  %1266 = vst [vmem:[#allocation2 + $0xc0] sm:$0x3] %v1252_v22  ;;  %2004 = vrot.lane.b32.xlu1 %v6143_v44, %s5401_s16  ;;  %2002 = vrot.lane.b32.xlu0 %v5944_v39, %s5401_s16 }
 0x179   : > { %2423 = vmatprep.subr.bf16.mxu0 %v2392_v25 }
 0x17a   : > { %v6191_v6 = vpop.permute.xlu1 %1316  ;;  %v1315_v28 = vpop.permute.xlu0 %1314 }
 0x17b   : > { %v1327_v31 = vsel %vm1324_vm12, %v5935_v40, %v1315_v28  ;;  %v1328_v30 = vsel %vm1324_vm12, %v1315_v28, %v6191_v6  ;;  %v2391_v11 = vld [vmem:[#allocation2 + $0x150] sm:$0xff] }
 0x17c   : > { %1341 = vst [vmem:[#allocation2 + $0xb8] sm:$0xc] %v1327_v31  ;;  %1342 = vst [vmem:[#allocation2 + $0xc0] sm:$0xc] %v1328_v30  ;;  %2080 = vrot.lane.b32.xlu1 %v5958_v49, %s7446_s14  ;;  %2078 = vrot.lane.b32.xlu0 %v5961_v50, %s7446_s14  ;;  %v2354_v49 = vld [vmem:[#allocation2 + $0x28] sm:$0xff]  ;;  %s7476_s14 = smov 107  }
 0x17d   : > { %2424 = vmatpush1.bf16.msra.mxu0 %v2391_v11 }
 0x17e   : > { %v6201_v33 = vpop.permute.xlu1 %1392  ;;  %v1391_v35 = vpop.permute.xlu0 %1390  ;;  %2425 = vmatprep.subr.bf16.mxu0 %v5404_v60 }
 0x17f   : > { %v1403_v40 = vsel %vm1400_vm13, %v5948_v45, %v1391_v35  ;;  %v1404_v15 = vsel %vm1400_vm13, %v1391_v35, %v6201_v33  ;;  %v6218_v45 = vld [vmem:[%s7425_s2] sm:$0xf] }
 0x180   : > { %1417 = vst [vmem:[#allocation2 + $0xb8] sm:$0x30] %v1403_v40  ;;  %1418 = vst [vmem:[#allocation2 + $0xc0] sm:$0x30] %v1404_v15  ;;  %2156 = vrot.lane.b32.xlu1 %v6131_v26, %s5403_s13  ;;  %2154 = vrot.lane.b32.xlu0 %v6163_v61, %s5403_s13 }
 0x181   : > { %2426 = vmatpush1.bf16.msra.mxu0 %v5404_v60 }
 0x182   : > { %2493 = vmatprep.subr.bf16.mxu0 %v2354_v49  ;;  %v6213_v50 = vpop.permute.xlu1 %1468  ;;  %v1467_v14 = vpop.permute.xlu0 %1466 }
 0x183   : > { %v1479_v42 = vsel %vm1476_vm14, %v5963_v53, %v1467_v14  ;;  %v1480_v48 = vsel %vm1476_vm14, %v1467_v14, %v6213_v50 }
 0x184   : > { %1493 = vst [vmem:[#allocation2 + $0xb8] sm:$0xc0] %v1479_v42  ;;  %1494 = vst [vmem:[#allocation2 + $0xc0] sm:$0xc0] %v1480_v48  ;;  %2232 = vrot.lane.b32.xlu1 %v5944_v39, %s5405_s11  ;;  %2230 = vrot.lane.b32.xlu0 %v1914_v12, %s5405_s11 }
 0x185   : > { %2444 = vmatmul.mubr.bf16.vlgmr.msra.gmra.mrb[0].mxu0 %v6218_v45 }
 0x186   : > { %2494 = vmatpush1.bf16.msra.mxu0 %v2353_v46  ;;  %v6228_v55 = vpop.permute.xlu1 %1544  ;;  %v1543_v34 = vpop.permute.xlu0 %1542  ;;  %2525 = vmatprep.mubr.bf16.mxu0 %v5404_v60 }
 0x187   : > { %2495 = vmatprep.subr.bf16.mxu0 %v2361_v47  ;;  %v1555_v53 = vsel %vm1552_vm15, %v5988_v36, %v1543_v34  ;;  %v1556_v57 = vsel %vm1552_vm15, %v1543_v34, %v6228_v55 }
 0x188   : > { %1569 = vst [vmem:[#allocation2 + $0xf0] sm:$0x3] %v1555_v53  ;;  %1570 = vst [vmem:[#allocation2 + $0xf8] sm:$0x3] %v1556_v57  ;;  %2308 = vrot.lane.b32.xlu1 %v6143_v44, %s5406_s17  ;;  %2306 = vrot.lane.b32.xlu0 %v5944_v39, %s5406_s17 }
 0x18a   : > { %2496 = vmatpush1.bf16.msra.mxu0 %v2360_v2  ;;  %v6241_v60 = vpop.permute.xlu1 %1620  ;;  %v1619_v4 = vpop.permute.xlu0 %1618 }
 0x18b   : > { %v1631_v36 = vsel %vm1628_vm1, %v5996_v13, %v1619_v4  ;;  %v1632_v9 = vsel %vm1628_vm1, %v1619_v4, %v6241_v60  ;;  %v2373_v10 = vld [vmem:[#allocation2 + $0xc0] sm:$0xff]  ;;  %v2372_v12 = vld [vmem:[#allocation2 + $0xb8] sm:$0xff] }
 0x18c   : > { %1645 = vst [vmem:[#allocation2 + $0xf0] sm:$0xc] %v1631_v36  ;;  %1646 = vst [vmem:[#allocation2 + $0xf8] sm:$0xc] %v1632_v9  ;;  %942 = vrot.lane.b32.xlu1 %v927_v59, %s5387_s18  ;;  %866 = vrot.lane.b32.xlu0 %v5497_v8, %s7476_s14  ;;  %v1231_v8 = vcombine.high %v6031_v27, %v6031_v27  ;;  %s7477_s18 = smov 102   ;;  %s7463_s14 = smov 61  }
 0x18d   : > { %2458 = vmatprep.subr.bf16.mxu1 %v2373_v10  ;;  %v2405_v10 = vld [vmem:[%s7426_s3] sm:$0xff] }
 0x18e   : > { %2459 = vmatpush1.bf16.msra.mxu1 %v2372_v12  ;;  %v6250_v37 = vpop.permute.xlu1 %1696  ;;  %v1695_v44 = vpop.permute.xlu0 %1694 }
 0x18f   : > { %v1707_v13 = vsel %vm1704_vm4, %v6005_v52, %v1695_v44  ;;  %v1708_v16 = vsel %vm1704_vm4, %v1695_v44, %v6250_v37 }
 0x190   : > { %1721 = vst [vmem:[#allocation2 + $0xf0] sm:$0x30] %v1707_v13  ;;  %1722 = vst [vmem:[#allocation2 + $0xf8] sm:$0x30] %v1708_v16  ;;  %1094 = vrot.lane.b32.xlu1 %v6031_v27, %s5389_s20  ;;  %1018 = vrot.lane.b32.xlu0 %v6083_v62, %s5388_s19 }
 0x192   : > { %v6262_v17 = vpop.permute.xlu1 %1772  ;;  %v1771_v18 = vpop.permute.xlu0 %1770 }
 0x193   : > { %v1783_v52 = vsel %vm1780_vm5, %v6017_v24, %v1771_v18  ;;  %v1784_v38 = vsel %vm1780_vm5, %v1771_v18, %v6262_v17 }
 0x194   : > { %1797 = vst [vmem:[#allocation2 + $0xf0] sm:$0xc0] %v1783_v52  ;;  %1798 = vst [vmem:[#allocation2 + $0xf8] sm:$0xc0] %v1784_v38  ;;  %1246 = vrot.lane.b32.xlu1 %v1231_v8, %s7466_s22  ;;  %1170 = vrot.lane.b32.xlu0 %v5822_v43, %s5390_s21  ;;  %s7480_s21 = smov 100  }
 0x196   : > { %v6271_v20 = vpop.permute.xlu1 %1848  ;;  %v1847_v21 = vpop.permute.xlu0 %1846 }
 0x197   : > { %v1859_v22 = vsel %vm1856_vm3, %v6048_v54, %v1847_v21  ;;  %v1860_v25 = vsel %vm1856_vm3, %v1847_v21, %v6271_v20 }
 0x198   : > { %1873 = vst [vmem:[#allocation2 + $0x128] sm:$0x3] %v1859_v22  ;;  %1874 = vst [vmem:[#allocation2 + $0x130] sm:$0x3] %v1860_v25  ;;  %1398 = vrot.lane.b32.xlu1 %v6031_v27, %s5393_s24  ;;  %1322 = vrot.lane.b32.xlu0 %v6083_v62, %s5392_s23  ;;  %s7453_s24 = smov 1  }
 0x19a   : > { %v6281_v24 = vpop.permute.xlu1 %1924  ;;  %v1923_v28 = vpop.permute.xlu0 %1922 }
 0x19b   : > { %v1935_v31 = vsel %vm7451_vm2, %v6056_v56, %v1923_v28  ;;  %v1936_v54 = vsel %vm7451_vm2, %v1923_v28, %v6281_v24  ;;  %v2380_v30 = vld [vmem:[#allocation2 + $0xf8] sm:$0xff]  ;;  %v2379_v11 = vld [vmem:[#allocation2 + $0xf0] sm:$0xff] }
 0x19c   : > { %1949 = vst [vmem:[#allocation2 + $0x128] sm:$0xc] %v1935_v31  ;;  %1950 = vst [vmem:[#allocation2 + $0x130] sm:$0xc] %v1936_v54  ;;  %1550 = vrot.lane.b32.xlu1 %v1231_v8, %s5395_s26  ;;  %1474 = vrot.lane.b32.xlu0 %v5822_v43, %s5394_s25  ;;  %v1839_v43 = vcombine.high %v6131_v26, %v6131_v26  ;;  %s5410_s26 = smov 82   ;;  %s7500_s25 = smov 118  }
 0x19d   : > { %2460 = vmatprep.subr.bf16.mxu1 %v2380_v30 }
 0x19e   : > { %2461 = vmatpush1.bf16.msra.mxu1 %v2379_v11  ;;  %v6290_v27 = vpop.permute.xlu1 %2000  ;;  %v1999_v35 = vpop.permute.xlu0 %1998 }
 0x19f   : > { %v2011_v56 = vsel %vm7449_vm0, %v6064_v1, %v1999_v35  ;;  %v2012_v40 = vsel %vm7449_vm0, %v1999_v35, %v6290_v27 }
 0x1a0   : > { %2025 = vst [vmem:[#allocation2 + $0x128] sm:$0x30] %v2011_v56  ;;  %2026 = vst [vmem:[#allocation2 + $0x130] sm:$0x30] %v2012_v40  ;;  %1702 = vrot.lane.b32.xlu1 %v6131_v26, %s5397_s30  ;;  %1626 = vrot.lane.b32.xlu0 %v6083_v62, %s5396_s29  ;;  %s5411_s29 = smov 81   ;;  %s5412_s30 = smov 73  }
 0x1a2   : > { %v6302_v15 = vpop.permute.xlu1 %2076  ;;  %v2075_v49 = vpop.permute.xlu0 %2074 }
 0x1a3   : > { %v2087_v1 = vsel %vm7448_vm6, %v6072_v7, %v2075_v49  ;;  %v2088_v14 = vsel %vm7448_vm6, %v2075_v49, %v6302_v15  ;;  %vm7478_vm6 = vcmask 457728  }
 0x1a4   : > { %2101 = vst [vmem:[#allocation2 + $0x128] sm:$0xc0] %v2087_v1  ;;  %2102 = vst [vmem:[#allocation2 + $0x130] sm:$0xc0] %v2088_v14  ;;  %1854 = vrot.lane.b32.xlu1 %v1839_v43, %s5399_s12  ;;  %1778 = vrot.lane.b32.xlu0 %v5944_v39, %s5398_s9  ;;  %s5413_s9 = smov 72   ;;  %s5414_s12 = smov 71  }
 0x1a5   : > { %vm7479_vm0 = vmmov %vm7478_vm6 }
 0x1a6   : > { %v6311_v62 = vpop.permute.xlu1 %940  ;;  %v939_v42 = vpop.permute.xlu0 %938 }
 0x1a7   : > { %v949_v48 = vsel %vm7450_vm7, %v6098_v23, %v939_v42  ;;  %v950_v46 = vsel %vm7450_vm7, %v939_v42, %v6311_v62  ;;  %vm7481_vm7 = vcmask 449536   ;;  %v5407_v42 = vmov 0.0  }
 0x1a8   : > { %963 = vst [vmem:[#allocation2 + $0x90] sm:$0x3] %v949_v48  ;;  %964 = vst [vmem:[#allocation2 + $0x98] sm:$0x3] %v950_v46  ;;  %2006 = vrot.lane.b32.xlu1 %v6131_v26, %s5401_s16  ;;  %1930 = vrot.lane.b32.xlu0 %v6163_v61, %s7477_s18  ;;  %s5416_s16 = smov 62   ;;  %s7461_s18 = smov 11  }
 0x1aa   : > { %v6321_v7 = vpop.permute.xlu1 %1016  ;;  %v1015_v47 = vpop.permute.xlu0 %1014 }
 0x1ab   : > { %v1025_v34 = vsel %vm7478_vm6, %v6108_v29, %v1015_v47  ;;  %v1026_v23 = vsel %vm7479_vm0, %v1015_v47, %v6321_v7  ;;  %v2387_v53 = vld [vmem:[#allocation2 + $0x130] sm:$0xff]  ;;  %v2386_v57 = vld [vmem:[#allocation2 + $0x128] sm:$0xff]  ;;  %vm7482_vm6 = vmmov %vm7481_vm7  ;;  %vm7483_vm0 = vcmask 441344  }
 0x1ac   : > { %1039 = vst [vmem:[#allocation2 + $0x90] sm:$0xc] %v1025_v34  ;;  %1040 = vst [vmem:[#allocation2 + $0x98] sm:$0xc] %v1026_v23  ;;  %2158 = vrot.lane.b32.xlu1 %v1839_v43, %s5403_s13  ;;  %2082 = vrot.lane.b32.xlu0 %v5944_v39, %s7480_s21  ;;  %v6381_v43 = vld [vmem:[#allocation2 + $0x188] sm:$0xff]  ;;  %s7459_s21 = smov 10  }
 0x1ad   : > { %2462 = vmatprep.subr.bf16.mxu1 %v2387_v53  ;;  %vm7484_vm2 = vmmov %vm7483_vm0  ;;  %s7457_s13 = smov 9  }
 0x1ae   : > { %2463 = vmatpush1.bf16.msra.mxu1 %v2386_v57  ;;  %v6330_v59 = vpop.permute.xlu1 %1092  ;;  %v1091_v2 = vpop.permute.xlu0 %1090 }
 0x1af   : > { %v1101_v29 = vsel %vm7481_vm7, %v6120_v41, %v1091_v2  ;;  %v1102_v4 = vsel %vm7482_vm6, %v1091_v2, %v6330_v59  ;;  %vm7485_vm7 = vcmask 834560  }
 0x1b0   : > { %1115 = vst [vmem:[#allocation2 + $0x90] sm:$0x30] %v1101_v29  ;;  %1116 = vst [vmem:[#allocation2 + $0x98] sm:$0x30] %v1102_v4  ;;  %2310 = vrot.lane.b32.xlu1 %v6131_v26, %s5406_s17  ;;  %2234 = vrot.lane.b32.xlu0 %v6163_v61, %s5405_s11  ;;  %s5409_s11 = smov 83   ;;  %s7455_s17 = smov 119  }
 0x1b1   : > { %vm7486_vm6 = vmmov %vm7485_vm7 }
 0x1b2   : > { %v6340_v39 = vpop.permute.xlu1 %1168  ;;  %v1167_v36 = vpop.permute.xlu0 %1166 }
 0x1b3   : > { %v1177_v9 = vsel %vm7483_vm0, %v6133_v32, %v1167_v36  ;;  %v1178_v41 = vsel %vm7484_vm2, %v1167_v36, %v6340_v39  ;;  %vm7452_vm2 = vmmov 0   ;;  %vm7487_vm0 = vcmask 826368  }
 0x1b4   : > { %1191 = vst [vmem:[#allocation2 + $0x90] sm:$0xc0] %v1177_v9  ;;  %1192 = vst [vmem:[#allocation2 + $0x98] sm:$0xc0] %v1178_v41  ;;  %2408 = vperm.xlu0 %5318, %v2405_v10  }
 0x1b6   : > { %v6349_v26 = vpop.permute.xlu1 %2152  ;;  %v2151_v12 = vpop.permute.xlu0 %2150 }
 0x1b7   : > { %v2163_v61 = vsel %vm2160_vm9, %v6145_v51, %v2151_v12  ;;  %v2164_v44 = vsel %vm2160_vm9, %v2151_v12, %v6349_v26 }
 0x1b8   : > { %2177 = vst [vmem:[#allocation2 + $0x160] sm:$0x3] %v2163_v61  ;;  %2178 = vst [vmem:[#allocation2 + $0x168] sm:$0x3] %v2164_v44 }
 0x1ba   : > { %v6355_v32 = vpop.permute.xlu1 %2228  ;;  %v2227_v13 = vpop.permute.xlu0 %2226 }
 0x1bb   : > { %v2239_v16 = vsel %vm2236_vm10, %v6153_v58, %v2227_v13  ;;  %v2240_v8 = vsel %vm2236_vm10, %v2227_v13, %v6355_v32  ;;  %v2368_v18 = vld [vmem:[#allocation2 + $0x98] sm:$0xff]  ;;  %v2367_v52 = vld [vmem:[#allocation2 + $0x90] sm:$0xff] }
 0x1bc   : > { %2253 = vst [vmem:[#allocation2 + $0x160] sm:$0xc] %v2239_v16  ;;  %2254 = vst [vmem:[#allocation2 + $0x168] sm:$0xc] %v2240_v8  ;;  %2497 = vmatprep.subr.bf16.mxu0 %v2368_v18 }
 0x1bd   : > { %2498 = vmatpush1.bf16.msra.mxu0 %v2367_v52 }
 0x1be   : > { %v6361_v51 = vpop.permute.xlu1 %2304  ;;  %v2303_v38 = vpop.permute.xlu0 %2302 }
 0x1bf   : > { %v2315_v21 = vsel %vm2312_vm8, %v6165_v0, %v2303_v38  ;;  %v2316_v22 = vsel %vm2312_vm8, %v2303_v38, %v6361_v51 }
 0x1c0   : > { %2329 = vst [vmem:[#allocation2 + $0x160] sm:$0x30] %v2315_v21  ;;  %2330 = vst [vmem:[#allocation2 + $0x168] sm:$0x30] %v2316_v22 }
 0x1c2   : > { %v6367_v58 = vpop.permute.xlu1 %1244  ;;  %v1243_v25 = vpop.permute.xlu0 %1242 }
 0x1c3   : > { %v1253_v28 = vsel %vm1248_vm11, %v6181_v19, %v1243_v25  ;;  %v1254_v31 = vsel %vm1248_vm11, %v1243_v25, %v6367_v58 }
 0x1c4   : > { %1267 = vst [vmem:[#allocation2 + $0xc8] sm:$0x3] %v1253_v28  ;;  %1268 = vst [vmem:[#allocation2 + $0xd0] sm:$0x3] %v1254_v31 }
 0x1c6   : > { %v6373_v54 = vpop.permute.xlu1 %1320  ;;  %v1319_v30 = vpop.permute.xlu0 %1318 }
 0x1c7   : > { %v1329_v0 = vsel %vm1324_vm12, %v6191_v6, %v1319_v30  ;;  %v1330_v11 = vsel %vm1324_vm12, %v1319_v30, %v6373_v54  ;;  %v2394_v35 = vld [vmem:[#allocation2 + $0x168] sm:$0xff]  ;;  %v2393_v56 = vld [vmem:[#allocation2 + $0x160] sm:$0xff] }
 0x1c8   : > { %1343 = vst [vmem:[#allocation2 + $0xc8] sm:$0xc] %v1329_v0  ;;  %1344 = vst [vmem:[#allocation2 + $0xd0] sm:$0xc] %v1330_v11  ;;  %2464 = vmatprep.subr.bf16.mxu1 %v2394_v35 }
 0x1c9   : > { %2465 = vmatpush1.bf16.msra.mxu1 %v2393_v56 }
 0x1ca   : > { %v6379_v19 = vpop.permute.xlu1 %1396  ;;  %v1395_v40 = vpop.permute.xlu0 %1394  ;;  %2466 = vmatprep.subr.bf16.mxu1 %v6381_v43 }
 0x1cb   : > { %v1405_v49 = vsel %vm1400_vm13, %v6201_v33, %v1395_v40  ;;  %v1406_v6 = vsel %vm1400_vm13, %v1395_v40, %v6379_v19  ;;  %v2355_v33 = vld [vmem:[#allocation2 + $0x30] sm:$0xff] }
 0x1cc   : > { %1419 = vst [vmem:[#allocation2 + $0xc8] sm:$0x30] %v1405_v49  ;;  %1420 = vst [vmem:[#allocation2 + $0xd0] sm:$0x30] %v1406_v6 }
 0x1cd   : > { %2467 = vmatpush1.bf16.msra.mxu1 %v6381_v43 }
 0x1ce   : > { %v6389_v1 = vpop.permute.xlu1 %1472  ;;  %v1471_v14 = vpop.permute.xlu0 %1470  ;;  %5233 = vmatprep.subr.bf16.mxu1 %v5407_v42 }
 0x1cf   : > { %v1481_v48 = vsel %vm1476_vm14, %v6213_v50, %v1471_v14  ;;  %v1482_v46 = vsel %vm1476_vm14, %v1471_v14, %v6389_v1 }
 0x1d0   : > { %1495 = vst [vmem:[#allocation2 + $0xc8] sm:$0xc0] %v1481_v48  ;;  %1496 = vst [vmem:[#allocation2 + $0xd0] sm:$0xc0] %v1482_v46  ;;  %2485 = vmatmul.mubr.bf16.vlgmr.msra.gmra.mrb[0].mxu1 %v6218_v45 }
 0x1d1   : > { %5234 = vmatpush3.bf16.msra.mxu1 %v2355_v33  ;;  %5249 = vmatprep.mubr.msk.bf16.mxu1 %vm7452_vm2, %v5407_v42  ;;  %vm7488_vm2 = vmmov %vm7487_vm0 }
 0x1d2   : > { %v6399_v47 = vpop.permute.xlu1 %1548  ;;  %v1547_v34 = vpop.permute.xlu0 %1546  ;;  %5235 = vmatprep.subr.bf16.mxu1 %v5407_v42 }
 0x1d3   : > { %v1557_v50 = vsel %vm1552_vm15, %v6228_v55, %v1547_v34  ;;  %v1558_v23 = vsel %vm1552_vm15, %v1547_v34, %v6399_v47 }
 0x1d4   : > { %1571 = vst [vmem:[#allocation2 + $0x100] sm:$0x3] %v1557_v50  ;;  %1572 = vst [vmem:[#allocation2 + $0x108] sm:$0x3] %v1558_v23 }
 0x1d6   : > { %v6406_v53 = vpop.permute.xlu1 %1624  ;;  %v1623_v57 = vpop.permute.xlu0 %1622 }
 0x1d7   : > { %v1633_v2 = vsel %vm1628_vm1, %v6241_v60, %v1623_v57  ;;  %v1634_v29 = vsel %vm1628_vm1, %v1623_v57, %v6406_v53  ;;  %v2375_v4 = vld [vmem:[#allocation2 + $0xd0] sm:$0xff]  ;;  %v2374_v36 = vld [vmem:[#allocation2 + $0xc8] sm:$0xff] }
 0x1d8   : > { %1647 = vst [vmem:[#allocation2 + $0x100] sm:$0xc] %v1633_v2  ;;  %1648 = vst [vmem:[#allocation2 + $0x108] sm:$0xc] %v1634_v29  ;;  %2499 = vmatprep.subr.bf16.mxu0 %v2375_v4 }
 0x1d9   : > { %2500 = vmatpush1.bf16.msra.mxu0 %v2374_v36 }
 0x1da   : > { %v6412_v55 = vpop.permute.xlu1 %1700  ;;  %v1699_v9 = vpop.permute.xlu0 %1698 }
 0x1db   : > { %v1709_v41 = vsel %vm1704_vm4, %v6250_v37, %v1699_v9  ;;  %v1710_v10 = vsel %vm1704_vm4, %v1699_v9, %v6412_v55 }
 0x1dc   : > { %1723 = vst [vmem:[#allocation2 + $0x100] sm:$0x30] %v1709_v41  ;;  %1724 = vst [vmem:[#allocation2 + $0x108] sm:$0x30] %v1710_v10 }
 0x1de   : > { %v6418_v60 = vpop.permute.xlu1 %1776  ;;  %v1775_v12 = vpop.permute.xlu0 %1774 }
 0x1df   : > { %v1785_v61 = vsel %vm1780_vm5, %v6262_v17, %v1775_v12  ;;  %v1786_v44 = vsel %vm1780_vm5, %v1775_v12, %v6418_v60 }
 0x1e0   : > { %1799 = vst [vmem:[#allocation2 + $0x100] sm:$0xc0] %v1785_v61  ;;  %1800 = vst [vmem:[#allocation2 + $0x108] sm:$0xc0] %v1786_v44 }
 0x1e2   : > { %v6424_v13 = vpop.permute.xlu1 %1852  ;;  %v1851_v16 = vpop.permute.xlu0 %1850 }
 0x1e3   : > { %v1861_v37 = vsel %vm1856_vm3, %v6271_v20, %v1851_v16  ;;  %v1862_v8 = vsel %vm1856_vm3, %v1851_v16, %v6424_v13 }
 0x1e4   : > { %1875 = vst [vmem:[#allocation2 + $0x138] sm:$0x3] %v1861_v37  ;;  %1876 = vst [vmem:[#allocation2 + $0x140] sm:$0x3] %v1862_v8 }
 0x1e6   : > { %v6430_v18 = vpop.permute.xlu1 %1928  ;;  %v1927_v52 = vpop.permute.xlu0 %1926 }
 0x1e7   : > { %v1937_v17 = vsel %vm7485_vm7, %v6281_v24, %v1927_v52  ;;  %v1938_v38 = vsel %vm7486_vm6, %v1927_v52, %v6430_v18  ;;  %v2382_v21 = vld [vmem:[#allocation2 + $0x108] sm:$0xff]  ;;  %v2381_v22 = vld [vmem:[#allocation2 + $0x100] sm:$0xff]  ;;  %vm7489_vm7 = vcmask 818176  }
 0x1e8   : > { %1951 = vst [vmem:[#allocation2 + $0x138] sm:$0xc] %v1937_v17  ;;  %1952 = vst [vmem:[#allocation2 + $0x140] sm:$0xc] %v1938_v38  ;;  %2501 = vmatprep.subr.bf16.mxu0 %v2382_v21 }
 0x1e9   : > { %2502 = vmatpush1.bf16.msra.mxu0 %v2381_v22  ;;  %vm7490_vm6 = vmmov %vm7489_vm7 }
 0x1ea   : > { %v6436_v20 = vpop.permute.xlu1 %2004  ;;  %v2003_v25 = vpop.permute.xlu0 %2002 }
 0x1eb   : > { %v2013_v28 = vsel %vm7487_vm0, %v6290_v27, %v2003_v25  ;;  %v2014_v31 = vsel %vm7488_vm2, %v2003_v25, %v6436_v20  ;;  %vm7491_vm2 = vcmask 867328   ;;  %vm7492_vm0 = vcmask 875520  }
 0x1ec   : > { %2027 = vst [vmem:[#allocation2 + $0x138] sm:$0x30] %v2013_v28  ;;  %2028 = vst [vmem:[#allocation2 + $0x140] sm:$0x30] %v2014_v31 }
 0x1ee   : > { %v6442_v24 = vpop.permute.xlu1 %2080  ;;  %v2079_v30 = vpop.permute.xlu0 %2078 }
 0x1ef   : > { %v2089_v0 = vsel %vm7489_vm7, %v6302_v15, %v2079_v30  ;;  %v2090_v11 = vsel %vm7490_vm6, %v2079_v30, %v6442_v24  ;;  %vm7493_vm7 = vcmask 449536   ;;  %vm7494_vm6 = vcmask 457728  }
 0x1f0   : > { %2103 = vst [vmem:[#allocation2 + $0x138] sm:$0xc0] %v2089_v0  ;;  %2104 = vst [vmem:[#allocation2 + $0x140] sm:$0xc0] %v2090_v11 }
 0x1f2   : > { %v6448_v35 = vpop.permute.xlu1 %2156  ;;  %v2155_v56 = vpop.permute.xlu0 %2154 }
 0x1f3   : > { %v2165_v27 = vsel %vm2160_vm9, %v6349_v26, %v2155_v56  ;;  %v2166_v40 = vsel %vm2160_vm9, %v2155_v56, %v6448_v35 }
 0x1f4   : > { %2179 = vst [vmem:[#allocation2 + $0x170] sm:$0x3] %v2165_v27  ;;  %2180 = vst [vmem:[#allocation2 + $0x178] sm:$0x3] %v2166_v40  ;;  %v6517_v40 = vcombine.low %v6381_v43, %v6381_v43 }
 0x1f6   : > { %v6454_v49 = vpop.permute.xlu1 %2232  ;;  %v2231_v6 = vpop.permute.xlu0 %2230  ;;  %2688 = vrot.lane.b32.xlu1 %v6517_v40, %s5409_s11 }
 0x1f7   : > { %v2241_v15 = vsel %vm2236_vm10, %v6355_v32, %v2231_v6  ;;  %v2242_v14 = vsel %vm2236_vm10, %v2231_v6, %v6454_v49  ;;  %v2389_v48 = vld [vmem:[#allocation2 + $0x140] sm:$0xff]  ;;  %v2388_v46 = vld [vmem:[#allocation2 + $0x138] sm:$0xff]  ;;  %v2591_v6 = vsub.s32 0, %v5483_v3 }
 0x1f8   : > { %2255 = vst [vmem:[#allocation2 + $0x170] sm:$0xc] %v2241_v15  ;;  %2256 = vst [vmem:[#allocation2 + $0x178] sm:$0xc] %v2242_v14  ;;  %2503 = vmatprep.subr.bf16.mxu0 %v2389_v48  ;;  %v6535_v14 = vld [vmem:[%s7424_s1] sm:$0xff]  ;;  %v2595_v48 = vsub.s32 1, %v5483_v3 }
 0x1f9   : > { %2504 = vmatpush1.bf16.msra.mxu0 %v2388_v46 }
 0x1fa   : > { %v6460_v26 = vpop.permute.xlu1 %2308  ;;  %v2307_v33 = vpop.permute.xlu0 %2306 }
 0x1fb   : > { %v2317_v34 = vsel %vm2312_vm8, %v6361_v51, %v2307_v33  ;;  %v2318_v50 = vsel %vm2312_vm8, %v2307_v33, %v6460_v26 }
 0x1fc   : > { %2331 = vst [vmem:[#allocation2 + $0x170] sm:$0x30] %v2317_v34  ;;  %2332 = vst [vmem:[#allocation2 + $0x178] sm:$0x30] %v2318_v50  ;;  %v2596_v34 = vrot.slane %v6535_v14, %v2595_v48 }
 0x1fe   : > { %v943_v32 = vpop.permute.xlu1 %942  ;;  %v867_v23 = vpop.permute.xlu0 %866 }
 0x1ff   : > { %v951_v57 = vsel %vm7491_vm2, %v6311_v62, %v943_v32  ;;  %v875_v2 = vsel %vm7492_vm0, %v5869_v63, %v867_v23  ;;  %vm7495_vm2 = vcmask 441344   ;;  %vm7475_vm0 = vcmask 506880  }
 0x200   : > { %965 = vst [vmem:[#allocation2 + $0xa0] sm:$0x3] %v951_v57  ;;  %889 = vst [vmem:[#allocation2 + $0x68] sm:$0xc0] %v875_v2 }
 0x202   : > { %v1095_v29 = vpop.permute.xlu1 %1094  ;;  %v1019_v4 = vpop.permute.xlu0 %1018 }
 0x203   : > { %v1103_v51 = vsel %vm7493_vm7, %v6330_v59, %v1095_v29  ;;  %v1027_v36 = vsel %vm7494_vm6, %v6321_v7, %v1019_v4  ;;  %v2396_v9 = vld [vmem:[#allocation2 + $0x178] sm:$0xff]  ;;  %v2395_v41 = vld [vmem:[#allocation2 + $0x170] sm:$0xff]  ;;  %vm7474_vm7 = vcmask 498688   ;;  %vm7473_vm6 = vcmask 89088  }
 0x204   : > { %1117 = vst [vmem:[#allocation2 + $0xa0] sm:$0x30] %v1103_v51  ;;  %1041 = vst [vmem:[#allocation2 + $0xa0] sm:$0xc] %v1027_v36  ;;  %2505 = vmatprep.subr.bf16.mxu0 %v2396_v9 }
 0x205   : > { %2506 = vmatpush1.bf16.msra.mxu0 %v2395_v41 }
 0x206   : > { %v1247_v62 = vpop.permute.xlu1 %1246  ;;  %v1171_v10 = vpop.permute.xlu0 %1170  ;;  %2507 = vmatprep.subr.bf16.mxu0 %v6381_v43 }
 0x207   : > { %v1255_v63 = vsel %vm1248_vm11, %v6367_v58, %v1247_v62  ;;  %v1179_v12 = vsel %vm7495_vm2, %v6340_v39, %v1171_v10  ;;  %v2362_v59 = vld [vmem:[#allocation2 + $0x68] sm:$0xff]  ;;  %v2599_v10 = vsub.s32 2, %v5483_v3  ;;  %vm7472_vm2 = vcmask 80896  }
 0x208   : > { %1269 = vst [vmem:[#allocation2 + $0xd8] sm:$0x3] %v1255_v63  ;;  %1193 = vst [vmem:[#allocation2 + $0xa0] sm:$0xc0] %v1179_v12  ;;  %5236 = vmatpush3.bf16.msra.mxu1 %v2362_v59  ;;  %v2603_v63 = vsub.s32 3, %v5483_v3 }
 0x209   : > { %2508 = vmatpush1.bf16.msra.mxu0 %v6381_v43  ;;  %5237 = vmatprep.subr.bf16.mxu1 %v5407_v42 }
 0x20a   : > { %v1399_v7 = vpop.permute.xlu1 %1398  ;;  %v1323_v61 = vpop.permute.xlu0 %1322 }
 0x20b   : > { %v1407_v44 = vsel %vm1400_vm13, %v6379_v19, %v1399_v7  ;;  %v1331_v16 = vsel %vm1324_vm12, %v6373_v54, %v1323_v61  ;;  %vm7496_vm13 = vcmask 826368   ;;  %v2600_v7 = vrot.slane %v6535_v14, %v2599_v10 }
 0x20c   : > { %1421 = vst [vmem:[#allocation2 + $0xd8] sm:$0x30] %v1407_v44  ;;  %1345 = vst [vmem:[#allocation2 + $0xd8] sm:$0xc] %v1331_v16  ;;  %2526 = vmatmul.mubr.bf16.vlgmr.msra.gmra.mrb[4].mxu0 %v6218_v45  ;;  %v2604_v16 = vrot.slane %v6535_v14, %v2603_v63 }
 0x20e   : > { %v1551_v39 = vpop.permute.xlu1 %1550  ;;  %v1475_v58 = vpop.permute.xlu0 %1474 }
 0x20f   : > { %v1559_v37 = vsel %vm1552_vm15, %v6399_v47, %v1551_v39  ;;  %v1483_v8 = vsel %vm1476_vm14, %v6389_v1, %v1475_v58  ;;  %v2369_v52 = vld [vmem:[#allocation2 + $0xa0] sm:$0xff]  ;;  %vm7497_vm14 = vcmask 834560   ;;  %vm2890_vm15 = vcmask 596992  }
 0x210   : > { %1573 = vst [vmem:[#allocation2 + $0x110] sm:$0x3] %v1559_v37  ;;  %1497 = vst [vmem:[#allocation2 + $0xd8] sm:$0xc0] %v1483_v8  ;;  %5238 = vmatpush3.bf16.msra.mxu1 %v2369_v52 }
 0x211   : > { %5239 = vmatprep.subr.bf16.mxu1 %v5407_v42 }
 0x212   : > { %v1703_v19 = vpop.permute.xlu1 %1702  ;;  %v1627_v54 = vpop.permute.xlu0 %1626 }
 0x213   : > { %v1711_v17 = vsel %vm1704_vm4, %v6412_v55, %v1703_v19  ;;  %v1635_v38 = vsel %vm1628_vm1, %v6406_v53, %v1627_v54  ;;  %vm2952_vm1 = vcmask 588800   ;;  %vm3014_vm4 = vcmask 580608  }
 0x214   : > { %1725 = vst [vmem:[#allocation2 + $0x110] sm:$0x30] %v1711_v17  ;;  %1649 = vst [vmem:[#allocation2 + $0x110] sm:$0xc] %v1635_v38 }
 0x216   : > { %v1855_v47 = vpop.permute.xlu1 %1854  ;;  %v1779_v21 = vpop.permute.xlu0 %1778 }
 0x217   : > { %v1863_v1 = vsel %vm1856_vm3, %v6424_v13, %v1855_v47  ;;  %v1787_v22 = vsel %vm1780_vm5, %v6418_v60, %v1779_v21  ;;  %v2376_v25 = vld [vmem:[#allocation2 + $0xd8] sm:$0xff]  ;;  %vm7498_vm3 = vcmask 818176   ;;  %vm3076_vm5 = vcmask 515072  }
 0x218   : > { %1877 = vst [vmem:[#allocation2 + $0x148] sm:$0x3] %v1863_v1  ;;  %1801 = vst [vmem:[#allocation2 + $0x110] sm:$0xc0] %v1787_v22  ;;  %5240 = vmatpush3.bf16.msra.mxu1 %v2376_v25 }
 0x219   : > { %5241 = vmatprep.subr.bf16.mxu1 %v5407_v42 }
 0x21a   : > { %v2007_v55 = vpop.permute.xlu1 %2006  ;;  %v1931_v28 = vpop.permute.xlu0 %1930 }
 0x21b   : > { %v2015_v53 = vsel %vm7496_vm13, %v6436_v20, %v2007_v55  ;;  %v1939_v31 = vsel %vm7497_vm14, %v6430_v18, %v1931_v28  ;;  %vm7471_vm13 = vcmask 72704   ;;  %vm7465_vm14 = vcmask 7168  }
 0x21c   : > { %2029 = vst [vmem:[#allocation2 + $0x148] sm:$0x30] %v2015_v53  ;;  %1953 = vst [vmem:[#allocation2 + $0x148] sm:$0xc] %v1939_v31 }
 0x21e   : > { %v2159_v13 = vpop.permute.xlu1 %2158  ;;  %v2083_v30 = vpop.permute.xlu0 %2082 }
 0x21f   : > { %v2167_v60 = vsel %vm2160_vm9, %v6448_v35, %v2159_v13  ;;  %v2091_v0 = vsel %vm7498_vm3, %v6442_v24, %v2083_v30  ;;  %v2383_v11 = vld [vmem:[#allocation2 + $0x110] sm:$0xff]  ;;  %v2607_v30 = vsub.s32 4, %v5483_v3  ;;  %vm2766_vm9 = vcmask 670720  }
 0x220   : > { %2181 = vst [vmem:[#allocation2 + $0x180] sm:$0x3] %v2167_v60  ;;  %2105 = vst [vmem:[#allocation2 + $0x148] sm:$0xc0] %v2091_v0  ;;  %5242 = vmatpush3.bf16.msra.mxu1 %v2383_v11  ;;  %v2611_v60 = vsub.s32 5, %v5483_v3  ;;  %vm7502_vm3 = vcmask 1039360  }
 0x221   : > { %5243 = vmatprep.subr.bf16.mxu1 %v5407_v42 }
 0x222   : > { %v2311_v20 = vpop.permute.xlu1 %2310  ;;  %v2235_v56 = vpop.permute.xlu0 %2234 }
 0x223   : > { %v2319_v18 = vsel %vm2312_vm8, %v6460_v26, %v2311_v20  ;;  %v2243_v27 = vsel %vm2236_vm10, %v6454_v49, %v2235_v56  ;;  %v6523_v49 = vcombine.high %v6381_v43, %v6381_v43  ;;  %vm2704_vm8 = vcmask 678912  }
 0x224   : > { %2333 = vst [vmem:[#allocation2 + $0x180] sm:$0x30] %v2319_v18  ;;  %2257 = vst [vmem:[#allocation2 + $0x180] sm:$0xc] %v2243_v27  ;;  %v2608_v20 = vrot.slane %v6535_v14, %v2607_v30  ;;  %v2612_v27 = vrot.slane %v6535_v14, %v2611_v60  ;;  %vm2828_vm10 = vcmask 662528  }
 0x225   : > { %2690 = vrot.lane.b32.xlu1 %v6523_v49, %s5409_s11 }
 0x227   : > { %v2390_v35 = vld [vmem:[#allocation2 + $0x148] sm:$0xff] }
 0x228   : > { %5244 = vmatpush3.bf16.msra.mxu1 %v2390_v35 }
 0x229   : > { %5245 = vmatprep.subr.bf16.mxu1 %v5407_v42 }
 0x22b   : > { %v2397_v24 = vld [vmem:[#allocation2 + $0x180] sm:$0xff] }
 0x22c   : > { %5246 = vmatpush3.bf16.msra.mxu1 %v2397_v24 }
 0x22d   : > { %5247 = vmatprep.subr.bf16.mxu1 %v5407_v42 }
 0x230   : > { %5248 = vmatpush3.bf16.msra.mxu1 %v6381_v43 }
 0x233   : > { %5250 = vmatmul.mubr.bf16.vlgmr.msra.gmra.mrb[4].mxu1 %v6218_v45  ;;  %v6530_v15 = vpop.permute.xlu0 %2408  ;;  %v2592_v45 = vrot.slane %v6535_v14, %v2591_v6 }
 0x258   : > { %v2445_v46 = vpop.f32.mrb[0].mxu0 }
 0x259   : > { %v2446_v26 = vadd.f32 %v2445_v46, %v6530_v15  ;;  %v2447_v43 = vpop.f32.mrb[1].mxu0 }
 0x25a   : > { %v2448_v33 = vadd.f32 %v2447_v43, %v6530_v15  ;;  %v2449_v50 = vpop.f32.mrb[2].mxu0 }
 0x25b   : > { %v2574_v32 = vmax.f32 %v2446_v26, 0.0  ;;  %v2450_v23 = vpop.f32.mrb[3].mxu0 }
 0x25c   : > { %v2575_v57 = vmax.f32 %v2448_v33, 0.0  ;;  %v2615_v23 = vsub.s32 6, %v5483_v3 }
 0x25d   : > { %v2624_v2 = vmul.f32 %v2592_v45, %v2574_v32 }
 0x25e   : > { %v2625_v29 = vmul.f32 %v2596_v34, %v2575_v57 }
 0x25f   : > { %v6542_v51 = vpack.c.bf16 %v2624_v2, %v2624_v2 }
 0x260   : > { %v5196_v4 = vpack.c.bf16 %v2625_v29, %v2624_v2  ;;  %v6544_v36 = vpack.c.bf16 %v2625_v29, %v2625_v29  ;;  %v2616_v29 = vrot.slane %v6535_v14, %v2615_v23 }
 0x261   : > { %2692 = vrot.lane.b32.xlu0 %v6542_v51, %s5409_s11 }
 0x262   : > { %2660 = vst [vmem:[#allocation3 + $0x8] sm:$0xff] %v5196_v4  ;;  %2694 = vrot.lane.b32.xlu1 %v6544_v36, %s5409_s11 }
 0x268   : > { %v2689_v47 = vpop.permute.xlu1 %2688 }
 0x269   : > { %v3470_v9 = vld [vmem:[#allocation3 + $0x8] sm:$0xff] }
 0x26a   : > { %v5075_v41 = vcombine.high %v3470_v9, %v3470_v9  ;;  %v5074_v62 = vcombine.low %v3470_v9, %v3470_v9 }
 0x26c   : > { %3500 = vst [vmem:[#allocation4 + $0x158] sm:$0xf0] %v5075_v41  ;;  %3499 = vst [vmem:[#allocation4 + $0x150] sm:$0xf0] %v5074_v62 }
 0x297   : > { %v2691_v25 = vpop.permute.xlu1 %2690 }
 0x298   : > { %v2705_v55 = vsel %vm2704_vm8, %v2689_v47, %v2691_v25 }
 0x299   : > { %2719 = vst [vmem:[#allocation4] sm:$0xf] %v2705_v55 }
 0x2a3   : > { %v2486_v12 = vpop.f32.mrb[0].mxu1 }
 0x2a4   : > { %v2487_v59 = vadd.f32 %v2486_v12, %v6530_v15  ;;  %v2488_v61 = vpop.f32.mrb[1].mxu1 }
 0x2a5   : > { %v2489_v44 = vadd.f32 %v2488_v61, %v6530_v15  ;;  %v2490_v39 = vpop.f32.mrb[2].mxu1  ;;  %v3222_v61 = vld [vmem:[#allocation3 + $0x4] sm:$0xff] }
 0x2a6   : > { %v2576_v58 = vmax.f32 %v2487_v59, 0.0  ;;  %v2491_v37 = vpop.f32.mrb[3].mxu1  ;;  %v5042_v39 = vcombine.low %v3222_v61, %v3222_v61 }
 0x2a7   : > { %v2577_v8 = vmax.f32 %v2489_v44, 0.0 }
 0x2a8   : > { %v2626_v52 = vmul.f32 %v2600_v7, %v2576_v58 }
 0x2a9   : > { %v2627_v19 = vmul.f32 %v2604_v16, %v2577_v8  ;;  %v5043_v16 = vcombine.high %v3222_v61, %v3222_v61 }
 0x2aa   : > { %v6556_v17 = vpack.c.bf16 %v2626_v52, %v2626_v52 }
 0x2ab   : > { %v5197_v54 = vpack.c.bf16 %v2627_v19, %v2626_v52  ;;  %v6558_v38 = vpack.c.bf16 %v2627_v19, %v2627_v19 }
 0x2ac   : > { %2696 = vrot.lane.b32.xlu0 %v6556_v17, %s5409_s11 }
 0x2ad   : > { %2661 = vst [vmem:[#allocation3 + $0x10] sm:$0xff] %v5197_v54  ;;  %2698 = vrot.lane.b32.xlu1 %v6558_v38, %s5409_s11 }
 0x2b4   : > { %v3471_v21 = vld [vmem:[#allocation3 + $0x10] sm:$0xff] }
 0x2b5   : > { %v5077_v1 = vcombine.high %v3471_v21, %v3471_v21  ;;  %v5076_v22 = vcombine.low %v3471_v21, %v3471_v21  ;;  %v3223_v7 = vld [vmem:[#allocation3 + $0xc] sm:$0xff] }
 0x2b6   : > { %v6663_v44 = vcombine.low %v3223_v7, %v3223_v7  ;;  %v6681_v37 = vcombine.high %v3223_v7, %v3223_v7 }
 0x2b7   : > { %3502 = vst [vmem:[#allocation4 + $0x168] sm:$0xf0] %v5077_v1  ;;  %3501 = vst [vmem:[#allocation4 + $0x160] sm:$0xf0] %v5076_v22 }
 0x2d3   : > { %v2693_v28 = vpop.permute.xlu0 %2692 }
 0x2d4   : > { %v6565_v53 = vpop.permute.xlu1 %2694  ;;  %v2706_v31 = vsel %vm2704_vm8, %v2691_v25, %v2693_v28 }
 0x2d5   : > { %v2707_v13 = vsel %vm2704_vm8, %v2693_v28, %v6565_v53  ;;  %2720 = vst [vmem:[#allocation4 + $0x8] sm:$0xf] %v2706_v31 }
 0x2d6   : > { %2721 = vst [vmem:[#allocation4 + $0x10] sm:$0xf] %v2707_v13 }
 0x2df   : > { %v2527_v0 = vpop.f32.mrb[4].mxu0 }
 0x2e0   : > { %v2528_v11 = vadd.f32 %v2527_v0, %v6530_v15  ;;  %v2529_v56 = vpop.f32.mrb[5].mxu0 }
 0x2e1   : > { %v2530_v18 = vadd.f32 %v2529_v56, %v6530_v15  ;;  %v2531_v35 = vpop.f32.mrb[6].mxu0 }
 0x2e2   : > { %v2578_v24 = vmax.f32 %v2528_v11, 0.0  ;;  %v2532_v6 = vpop.f32.mrb[7].mxu0 }
 0x2e3   : > { %v2579_v48 = vmax.f32 %v2530_v18, 0.0 }
 0x2e4   : > { %v2628_v46 = vmul.f32 %v2608_v20, %v2578_v24 }
 0x2e5   : > { %v2629_v26 = vmul.f32 %v2612_v27, %v2579_v48 }
 0x2e6   : > { %v6576_v33 = vpack.c.bf16 %v2628_v46, %v2628_v46 }
 0x2e7   : > { %v5198_v43 = vpack.c.bf16 %v2629_v26, %v2628_v46  ;;  %v5368_v45 = vpack.c.bf16 %v2629_v26, %v2629_v26 }
 0x2e8   : > { %2700 = vrot.lane.b32.xlu0 %v6576_v33, %s5409_s11 }
 0x2e9   : > { %2662 = vst [vmem:[#allocation3 + $0x18] sm:$0xff] %v5198_v43  ;;  %2702 = vrot.lane.b32.xlu1 %v5368_v45, %s5409_s11  ;;  %s7499_s11 = smov 127  }
 0x2ec   : > { %2750 = vrot.lane.b32.xlu0 %v6517_v40, %s5410_s26 }
 0x2ed   : > { %2752 = vrot.lane.b32.xlu1 %v6523_v49, %s5410_s26 }
 0x2f0   : > { %v3472_v34 = vld [vmem:[#allocation3 + $0x18] sm:$0xff]  ;;  %2754 = vrot.lane.b32.xlu0 %v6542_v51, %s5410_s26 }
 0x2f1   : > { %v5079_v50 = vcombine.high %v3472_v34, %v3472_v34  ;;  %v5078_v32 = vcombine.low %v3472_v34, %v3472_v34  ;;  %2756 = vrot.lane.b32.xlu1 %v6544_v36, %s5410_s26  ;;  %v6671_v58 = vld [vmem:[#allocation3 + $0x14] sm:$0xff] }
 0x2f3   : > { %3504 = vst [vmem:[#allocation4 + $0x178] sm:$0xf0] %v5079_v50  ;;  %3503 = vst [vmem:[#allocation4 + $0x170] sm:$0xf0] %v5078_v32 }
 0x2f4   : > { %2758 = vrot.lane.b32.xlu0 %v6556_v17, %s5410_s26 }
 0x2f5   : > { %2760 = vrot.lane.b32.xlu1 %v6558_v38, %s5410_s26 }
 0x2f8   : > { %2814 = vrot.lane.b32.xlu0 %v6523_v49, %s5411_s29 }
 0x2f9   : > { %2816 = vrot.lane.b32.xlu1 %v6542_v51, %s5411_s29 }
 0x2fc   : > { %2876 = vrot.lane.b32.xlu0 %v6523_v49, %s5412_s30 }
 0x2fd   : > { %2878 = vrot.lane.b32.xlu1 %v6542_v51, %s5412_s30 }
 0x300   : > { %2812 = vrot.lane.b32.xlu0 %v6517_v40, %s5411_s29 }
 0x301   : > { %2874 = vrot.lane.b32.xlu1 %v6517_v40, %s5412_s30 }
 0x304   : > { %2818 = vrot.lane.b32.xlu0 %v6544_v36, %s5411_s29 }
 0x305   : > { %2820 = vrot.lane.b32.xlu1 %v6556_v17, %s5411_s29 }
 0x306   : > { %v2568_v57 = vpop.f32.mrb[4].mxu1 }
 0x307   : > { %v2569_v2 = vadd.f32 %v2568_v57, %v6530_v15  ;;  %v5251_v4 = vpop.f32.mrb[5].mxu1 }
 0x308   : > { %v2571_v9 = vpop.f32.mrb[6].mxu1  ;;  %2880 = vrot.lane.b32.xlu0 %v6544_v36, %s5412_s30 }
 0x309   : > { %v2580_v3 = vmax.f32 %v2569_v2, 0.0  ;;  %v5252_v41 = vpop.f32.mrb[7].mxu1  ;;  %2882 = vrot.lane.b32.xlu1 %v6556_v17, %s5412_s30 }
 0x30b   : > { %v2630_v62 = vmul.f32 %v2616_v29, %v2580_v3 }
 0x30c   : > { %2938 = vrot.lane.b32.xlu0 %v6523_v49, %s5413_s9 }
 0x30d   : > { %v5199_v15 = vpack.c.bf16 %v2630_v62, %v2630_v62  ;;  %2940 = vrot.lane.b32.xlu1 %v6542_v51, %s5413_s9 }
 0x30f   : > { %2663 = vst [vmem:[#allocation3 + $0x20] sm:$0xf] %v5199_v15 }
 0x310   : > { %3000 = vrot.lane.b32.xlu0 %v6523_v49, %s5414_s12 }
 0x311   : > { %3002 = vrot.lane.b32.xlu1 %v6542_v51, %s5414_s12 }
 0x314   : > { %2936 = vrot.lane.b32.xlu0 %v6517_v40, %s5413_s9 }
 0x315   : > { %2998 = vrot.lane.b32.xlu1 %v6517_v40, %s5414_s12 }
 0x316   : > { %v5358_v14 = vld [vmem:[#allocation3 + $0x20] ss:$0 sps:$4 sm:$0xff]  }
 0x317   : > { %3505 = vst [vmem:[#allocation4 + $0x180] sm:$0xf0] %v5358_v14 }
 0x318   : > { %2942 = vrot.lane.b32.xlu0 %v6544_v36, %s5413_s9 }
 0x319   : > { %2944 = vrot.lane.b32.xlu1 %v6556_v17, %s5413_s9 }
 0x31c   : > { %3004 = vrot.lane.b32.xlu0 %v6544_v36, %s5414_s12 }
 0x31d   : > { %3006 = vrot.lane.b32.xlu1 %v6556_v17, %s5414_s12 }
 0x31e   : > { %v2697_v10 = vpop.permute.xlu0 %2696 }
 0x31f   : > { %v2699_v63 = vpop.permute.xlu1 %2698  ;;  %v2708_v12 = vsel %vm2704_vm8, %v6565_v53, %v2697_v10 }
 0x320   : > { %v2709_v59 = vsel %vm2704_vm8, %v2697_v10, %v2699_v63  ;;  %3062 = vrot.lane.b32.xlu0 %v6523_v49, %s5415_s15  ;;  %2722 = vst [vmem:[#allocation4 + $0x18] sm:$0xf] %v2708_v12 }
 0x321   : > { %3064 = vrot.lane.b32.xlu1 %v6542_v51, %s5415_s15  ;;  %2723 = vst [vmem:[#allocation4 + $0x20] sm:$0xf] %v2709_v59 }
 0x324   : > { %3124 = vrot.lane.b32.xlu0 %v6523_v49, %s5416_s16 }
 0x325   : > { %3126 = vrot.lane.b32.xlu1 %v6542_v51, %s5416_s16 }
 0x328   : > { %3060 = vrot.lane.b32.xlu0 %v6517_v40, %s5415_s15 }
 0x329   : > { %3122 = vrot.lane.b32.xlu1 %v6517_v40, %s5416_s16 }
 0x32c   : > { %3066 = vrot.lane.b32.xlu0 %v6544_v36, %s5415_s15 }
 0x32d   : > { %3068 = vrot.lane.b32.xlu1 %v6556_v17, %s5415_s15 }
 0x330   : > { %3128 = vrot.lane.b32.xlu0 %v6544_v36, %s5416_s16 }
 0x331   : > { %3130 = vrot.lane.b32.xlu1 %v6556_v17, %s5416_s16 }
 0x334   : > { %3186 = vrot.lane.b32.xlu0 %v6523_v49, %s7463_s14  ;;  %v6679_v49 = vcombine.low %v6671_v58, %v6671_v58 }
 0x335   : > { %3188 = vrot.lane.b32.xlu1 %v6542_v51, %s7463_s14 }
 0x338   : > { %3248 = vrot.lane.b32.xlu0 %v5043_v16, %s7461_s18 }
 0x339   : > { %3250 = vrot.lane.b32.xlu1 %v6663_v44, %s7461_s18 }
 0x33c   : > { %3184 = vrot.lane.b32.xlu0 %v6517_v40, %s7463_s14 }
 0x33d   : > { %3246 = vrot.lane.b32.xlu1 %v5042_v39, %s7461_s18 }
 0x340   : > { %3190 = vrot.lane.b32.xlu0 %v6544_v36, %s7463_s14 }
 0x341   : > { %3192 = vrot.lane.b32.xlu1 %v6556_v17, %s7463_s14  ;;  %s7468_s14 = smov 47  }
 0x344   : > { %3252 = vrot.lane.b32.xlu0 %v6681_v37, %s7461_s18 }
 0x345   : > { %3254 = vrot.lane.b32.xlu1 %v6679_v49, %s7461_s18  ;;  %s5426_s18 = smov 57  }
 0x348   : > { %3310 = vrot.lane.b32.xlu0 %v5043_v16, %s7459_s21 }
 0x349   : > { %3312 = vrot.lane.b32.xlu1 %v6663_v44, %s7459_s21 }
 0x34c   : > { %3372 = vrot.lane.b32.xlu0 %v5043_v16, %s7457_s13 }
 0x34d   : > { %3374 = vrot.lane.b32.xlu1 %v6663_v44, %s7457_s13 }
 0x350   : > { %3308 = vrot.lane.b32.xlu0 %v5042_v39, %s7459_s21 }
 0x351   : > { %3370 = vrot.lane.b32.xlu1 %v5042_v39, %s7457_s13 }
 0x354   : > { %3314 = vrot.lane.b32.xlu0 %v6681_v37, %s7459_s21 }
 0x355   : > { %3316 = vrot.lane.b32.xlu1 %v6679_v49, %s7459_s21  ;;  %s5425_s21 = smov 65  }
 0x358   : > { %3376 = vrot.lane.b32.xlu0 %v6681_v37, %s7457_s13 }
 0x359   : > { %3378 = vrot.lane.b32.xlu1 %v6679_v49, %s7457_s13  ;;  %s5424_s13 = smov 66  }
 0x35a   : > { %v2701_v8 = vpop.permute.xlu0 %2700 }
 0x35b   : > { %v2703_v40 = vpop.permute.xlu1 %2702  ;;  %v2710_v52 = vsel %vm2704_vm8, %v2699_v63, %v2701_v8 }
 0x35c   : > { %v2711_v19 = vsel %vm2704_vm8, %v2701_v8, %v2703_v40  ;;  %2724 = vst [vmem:[#allocation4 + $0x28] sm:$0xf] %v2710_v52  ;;  %3434 = vrot.lane.b32.xlu0 %v5043_v16, %s7453_s24  ;;  %vm7470_vm8 = vcmask 973824  }
 0x35d   : > { %2725 = vst [vmem:[#allocation4 + $0x30] sm:$0xf] %v2711_v19  ;;  %3436 = vrot.lane.b32.xlu1 %v6663_v44, %s7453_s24 }
 0x35e   : > { %v2751_v47 = vpop.permute.xlu0 %2750 }
 0x35f   : > { %v2753_v54 = vpop.permute.xlu1 %2752 }
 0x360   : > { %v2767_v21 = vsel %vm2766_vm9, %v2751_v47, %v2753_v54  ;;  %3432 = vrot.lane.b32.xlu0 %v5042_v39, %s7453_s24 }
 0x361   : > { %2781 = vst [vmem:[#allocation4] sm:$0xf0] %v2767_v21  ;;  %3438 = vrot.lane.b32.xlu1 %v6681_v37, %s7453_s24 }
 0x362   : > { %v2755_v22 = vpop.permute.xlu0 %2754 }
 0x363   : > { %v2757_v1 = vpop.permute.xlu1 %2756  ;;  %v2768_v25 = vsel %vm2766_vm9, %v2753_v54, %v2755_v22 }
 0x364   : > { %v2769_v55 = vsel %vm2766_vm9, %v2755_v22, %v2757_v1  ;;  %2782 = vst [vmem:[#allocation4 + $0x8] sm:$0xf0] %v2768_v25  ;;  %3440 = vrot.lane.b32.xlu0 %v6679_v49, %s7453_s24  ;;  %s7501_s24 = smov 117   ;;  %v6802_v25 = vcombine.high %v6671_v58, %v6671_v58 }
 0x365   : > { %2783 = vst [vmem:[#allocation4 + $0x10] sm:$0xf0] %v2769_v55  ;;  %3532 = vrot.lane.b32.xlu1 %v6544_v36, %s7499_s11 }
 0x366   : > { %v2759_v53 = vpop.permute.xlu0 %2758 }
 0x367   : > { %v6718_v28 = vpop.permute.xlu1 %2760  ;;  %v2770_v31 = vsel %vm2766_vm9, %v2757_v1, %v2759_v53 }
 0x368   : > { %v2771_v13 = vsel %vm2766_vm9, %v2759_v53, %v6718_v28  ;;  %2784 = vst [vmem:[#allocation4 + $0x18] sm:$0xf0] %v2770_v31  ;;  %3534 = vrot.lane.b32.xlu0 %v6556_v17, %s7499_s11  ;;  %v4327_v20 = vld [vmem:[#allocation4] sm:$0xff] }
 0x369   : > { %2785 = vst [vmem:[#allocation4 + $0x20] sm:$0xf0] %v2771_v13  ;;  %3593 = vrot.lane.b32.xlu1 %v6544_v36, %s7455_s17  ;;  %v6805_v13 = vld [vmem:[#allocation3 + $0x1c] sm:$0xff] }
 0x36a   : > { %v2815_v60 = vpop.permute.xlu0 %2814  ;;  %v6813_v58 = vcombine.low %v6805_v13, %v6805_v13 }
 0x36b   : > { %v2817_v30 = vpop.permute.xlu1 %2816  ;;  %v4328_v11 = vld [vmem:[#allocation4 + $0x8] sm:$0xff] }
 0x36c   : > { %v2830_v0 = vsel %vm2828_vm10, %v2815_v60, %v2817_v30  ;;  %3595 = vrot.lane.b32.xlu0 %v6556_v17, %s7455_s17  ;;  %4452 = vmatprep.subr.bf16.mxu0 %v4328_v11  ;;  %v4329_v24 = vld [vmem:[#allocation4 + $0x10] sm:$0xff] }
 0x36d   : > { %2844 = vst [vmem:[#allocation4 + $0x40] sm:$0xf] %v2830_v0  ;;  %3530 = vrot.lane.b32.xlu1 %v6542_v51, %s7499_s11  ;;  %4453 = vmatpush1.bf16.msra.mxu0 %v4327_v20 }
 0x36e   : > { %v2877_v18 = vpop.permute.xlu0 %2876 }
 0x36f   : > { %v2879_v56 = vpop.permute.xlu1 %2878  ;;  %v4330_v35 = vld [vmem:[#allocation4 + $0x18] sm:$0xff] }
 0x370   : > { %v2892_v27 = vsel %vm2890_vm15, %v2877_v18, %v2879_v56  ;;  %3591 = vrot.lane.b32.xlu0 %v6542_v51, %s7455_s17  ;;  %4493 = vmatprep.subr.bf16.mxu1 %v4330_v35 }
 0x371   : > { %2906 = vst [vmem:[#allocation4 + $0x40] sm:$0xf0] %v2892_v27  ;;  %3536 = vrot.lane.b32.xlu1 %v6558_v38, %s7499_s11  ;;  %4494 = vmatpush1.bf16.msra.mxu1 %v4329_v24 }
 0x372   : > { %v2813_v48 = vpop.permute.xlu0 %2812 }
 0x373   : > { %v2875_v6 = vpop.permute.xlu1 %2874  ;;  %v2829_v26 = vsel %vm2828_vm10, %v2813_v48, %v2815_v60 }
 0x374   : > { %v2891_v46 = vsel %vm2890_vm15, %v2875_v6, %v2877_v18  ;;  %2843 = vst [vmem:[#allocation4 + $0x38] sm:$0xf] %v2829_v26  ;;  %3538 = vrot.lane.b32.xlu0 %v6576_v33, %s7499_s11 }
 0x375   : > { %2905 = vst [vmem:[#allocation4 + $0x38] sm:$0xf0] %v2891_v46  ;;  %3597 = vrot.lane.b32.xlu1 %v6558_v38, %s7455_s17 }
 0x376   : > { %v2819_v45 = vpop.permute.xlu0 %2818 }
 0x377   : > { %v6743_v43 = vpop.permute.xlu1 %2820  ;;  %v2831_v34 = vsel %vm2828_vm10, %v2817_v30, %v2819_v45 }
 0x378   : > { %v2832_v50 = vsel %vm2828_vm10, %v2819_v45, %v6743_v43  ;;  %v4335_v32 = vld [vmem:[#allocation4 + $0x40] sm:$0xff]  ;;  %2845 = vst [vmem:[#allocation4 + $0x48] sm:$0xf] %v2831_v34  ;;  %3599 = vrot.lane.b32.xlu0 %v6576_v33, %s7455_s17  ;;  %s5423_s17 = smov 67  }
 0x379   : > { %2846 = vst [vmem:[#allocation4 + $0x50] sm:$0xf] %v2832_v50  ;;  %3655 = vrot.lane.b32.xlu1 %v6544_v36, %s7500_s25  ;;  %4454 = vmatprep.subr.bf16.mxu0 %v4335_v32 }
 0x37a   : > { %v2881_v57 = vpop.permute.xlu0 %2880 }
 0x37b   : > { %v6752_v23 = vpop.permute.xlu1 %2882  ;;  %v2893_v2 = vsel %vm2890_vm15, %v2879_v56, %v2881_v57 }
 0x37c   : > { %v2894_v29 = vsel %vm2890_vm15, %v2881_v57, %v6752_v23  ;;  %v4334_v4 = vld [vmem:[#allocation4 + $0x38] sm:$0xff]  ;;  %2907 = vst [vmem:[#allocation4 + $0x48] sm:$0xf0] %v2893_v2  ;;  %3657 = vrot.lane.b32.xlu0 %v6556_v17, %s7500_s25 }
 0x37d   : > { %2908 = vst [vmem:[#allocation4 + $0x50] sm:$0xf0] %v2894_v29  ;;  %3716 = vrot.lane.b32.xlu1 %v6544_v36, %s7501_s24  ;;  %4455 = vmatpush1.bf16.msra.mxu0 %v4334_v4 }
 0x37e   : > { %v2939_v3 = vpop.permute.xlu0 %2938 }
 0x37f   : > { %v2941_v9 = vpop.permute.xlu1 %2940 }
 0x380   : > { %v2954_v41 = vsel %vm2952_vm1, %v2939_v3, %v2941_v9  ;;  %3718 = vrot.lane.b32.xlu0 %v6556_v17, %s7501_s24 }
 0x381   : > { %2968 = vst [vmem:[#allocation4 + $0x78] sm:$0xf] %v2954_v41  ;;  %3653 = vrot.lane.b32.xlu1 %v6542_v51, %s7500_s25 }
 0x382   : > { %v3001_v15 = vpop.permute.xlu0 %3000 }
 0x383   : > { %v3003_v62 = vpop.permute.xlu1 %3002  ;;  %v4336_v10 = vld [vmem:[#allocation4 + $0x48] sm:$0xff] }
 0x384   : > { %v3016_v36 = vsel %vm3014_vm4, %v3001_v15, %v3003_v62  ;;  %v4337_v14 = vld [vmem:[#allocation4 + $0x50] sm:$0xff]  ;;  %3714 = vrot.lane.b32.xlu0 %v6542_v51, %s7501_s24 }
 0x385   : > { %3030 = vst [vmem:[#allocation4 + $0x78] sm:$0xf0] %v3016_v36  ;;  %3659 = vrot.lane.b32.xlu1 %v6558_v38, %s7500_s25  ;;  %4495 = vmatprep.subr.bf16.mxu1 %v4337_v14 }
 0x386   : > { %4496 = vmatpush1.bf16.msra.mxu1 %v4336_v10  ;;  %v2937_v12 = vpop.permute.xlu0 %2936 }
 0x387   : > { %v2999_v63 = vpop.permute.xlu1 %2998  ;;  %v2953_v59 = vsel %vm2952_vm1, %v2937_v12, %v2939_v3 }
 0x388   : > { %v3015_v17 = vsel %vm3014_vm4, %v2999_v63, %v3001_v15  ;;  %2967 = vst [vmem:[#allocation4 + $0x70] sm:$0xf] %v2953_v59  ;;  %3661 = vrot.lane.b32.xlu0 %v6576_v33, %s7500_s25 }
 0x389   : > { %3029 = vst [vmem:[#allocation4 + $0x70] sm:$0xf0] %v3015_v17  ;;  %3720 = vrot.lane.b32.xlu1 %v6558_v38, %s7501_s24 }
 0x38a   : > { %v2943_v61 = vpop.permute.xlu0 %2942 }
 0x38b   : > { %v6777_v7 = vpop.permute.xlu1 %2944  ;;  %v2955_v51 = vsel %vm2952_vm1, %v2941_v9, %v2943_v61 }
 0x38c   : > { %v2956_v16 = vsel %vm2952_vm1, %v2943_v61, %v6777_v7  ;;  %v4342_v39 = vld [vmem:[#allocation4 + $0x78] sm:$0xff]  ;;  %2969 = vst [vmem:[#allocation4 + $0x80] sm:$0xf] %v2955_v51  ;;  %3722 = vrot.lane.b32.xlu0 %v6576_v33, %s7501_s24 }
 0x38d   : > { %2970 = vst [vmem:[#allocation4 + $0x88] sm:$0xf] %v2956_v16  ;;  %3777 = vrot.lane.b32.xlu1 %v6681_v37, %s5423_s17  ;;  %4456 = vmatprep.subr.bf16.mxu0 %v4342_v39 }
 0x38e   : > { %v3005_v8 = vpop.permute.xlu0 %3004 }
 0x38f   : > { %v6786_v40 = vpop.permute.xlu1 %3006  ;;  %v3017_v52 = vsel %vm3014_vm4, %v3003_v62, %v3005_v8 }
 0x390   : > { %v3018_v19 = vsel %vm3014_vm4, %v3005_v8, %v6786_v40  ;;  %v4341_v54 = vld [vmem:[#allocation4 + $0x70] sm:$0xff]  ;;  %3031 = vst [vmem:[#allocation4 + $0x80] sm:$0xf0] %v3017_v52  ;;  %3779 = vrot.lane.b32.xlu0 %v6679_v49, %s5423_s17 }
 0x391   : > { %3032 = vst [vmem:[#allocation4 + $0x88] sm:$0xf0] %v3018_v19  ;;  %3839 = vrot.lane.b32.xlu1 %v6681_v37, %s5424_s13  ;;  %4457 = vmatpush1.bf16.msra.mxu0 %v4341_v54 }
 0x392   : > { %v3063_v47 = vpop.permute.xlu0 %3062 }
 0x393   : > { %v3065_v33 = vpop.permute.xlu1 %3064 }
 0x394   : > { %v3078_v21 = vsel %vm3076_vm5, %v3063_v47, %v3065_v33  ;;  %3841 = vrot.lane.b32.xlu0 %v6679_v49, %s5424_s13 }
 0x395   : > { %3092 = vst [vmem:[#allocation4 + $0xb0] sm:$0xf] %v3078_v21  ;;  %3775 = vrot.lane.b32.xlu1 %v6663_v44, %s5423_s17 }
 0x396   : > { %v3125_v22 = vpop.permute.xlu0 %3124 }
 0x397   : > { %v3127_v1 = vpop.permute.xlu1 %3126  ;;  %v4343_v31 = vld [vmem:[#allocation4 + $0x80] sm:$0xff] }
 0x398   : > { %v3140_v55 = vsel %vm7475_vm0, %v3125_v22, %v3127_v1  ;;  %v4344_v53 = vld [vmem:[#allocation4 + $0x88] sm:$0xff]  ;;  %3837 = vrot.lane.b32.xlu0 %v6663_v44, %s5424_s13 }
 0x399   : > { %3154 = vst [vmem:[#allocation4 + $0xb0] sm:$0xf0] %v3140_v55  ;;  %3781 = vrot.lane.b32.xlu1 %v6802_v25, %s5423_s17  ;;  %4497 = vmatprep.subr.bf16.mxu1 %v4344_v53 }
 0x39a   : > { %4498 = vmatpush1.bf16.msra.mxu1 %v4343_v31  ;;  %v3061_v60 = vpop.permute.xlu0 %3060 }
 0x39b   : > { %v3123_v30 = vpop.permute.xlu1 %3122  ;;  %v3077_v11 = vsel %vm3076_vm5, %v3061_v60, %v3063_v47 }
 0x39c   : > { %v3139_v0 = vsel %vm7475_vm0, %v3123_v30, %v3125_v22  ;;  %3091 = vst [vmem:[#allocation4 + $0xa8] sm:$0xf] %v3077_v11  ;;  %3783 = vrot.lane.b32.xlu0 %v6813_v58, %s5423_s17 }
 0x39d   : > { %3153 = vst [vmem:[#allocation4 + $0xa8] sm:$0xf0] %v3139_v0  ;;  %3843 = vrot.lane.b32.xlu1 %v6802_v25, %s5424_s13 }
 0x39e   : > { %v3067_v56 = vpop.permute.xlu0 %3066 }
 0x39f   : > { %v6821_v20 = vpop.permute.xlu1 %3068  ;;  %v3079_v18 = vsel %vm3076_vm5, %v3065_v33, %v3067_v56 }
 0x3a0   : > { %v3080_v27 = vsel %vm3076_vm5, %v3067_v56, %v6821_v20  ;;  %v4349_v35 = vld [vmem:[#allocation4 + $0xb0] sm:$0xff]  ;;  %3093 = vst [vmem:[#allocation4 + $0xb8] sm:$0xf] %v3079_v18  ;;  %3845 = vrot.lane.b32.xlu0 %v6813_v58, %s5424_s13 }
 0x3a1   : > { %3094 = vst [vmem:[#allocation4 + $0xc0] sm:$0xf] %v3080_v27  ;;  %3901 = vrot.lane.b32.xlu1 %v6681_v37, %s5425_s21  ;;  %4458 = vmatprep.subr.bf16.mxu0 %v4349_v35 }
 0x3a2   : > { %v3129_v6 = vpop.permute.xlu0 %3128 }
 0x3a3   : > { %v6830_v24 = vpop.permute.xlu1 %3130  ;;  %v3141_v48 = vsel %vm7475_vm0, %v3127_v1, %v3129_v6 }
 0x3a4   : > { %v3142_v46 = vsel %vm7475_vm0, %v3129_v6, %v6830_v24  ;;  %v4348_v26 = vld [vmem:[#allocation4 + $0xa8] sm:$0xff]  ;;  %3155 = vst [vmem:[#allocation4 + $0xb8] sm:$0xf0] %v3141_v48  ;;  %3903 = vrot.lane.b32.xlu0 %v6679_v49, %s5425_s21 }
 0x3a5   : > { %3156 = vst [vmem:[#allocation4 + $0xc0] sm:$0xf0] %v3142_v46  ;;  %3963 = vrot.lane.b32.xlu1 %v6681_v37, %s5426_s18  ;;  %4459 = vmatpush1.bf16.msra.mxu0 %v4348_v26 }
 0x3a6   : > { %v3187_v34 = vpop.permute.xlu0 %3186 }
 0x3a7   : > { %v3189_v45 = vpop.permute.xlu1 %3188 }
 0x3a8   : > { %v3202_v50 = vsel %vm7474_vm7, %v3187_v34, %v3189_v45  ;;  %3965 = vrot.lane.b32.xlu0 %v6679_v49, %s5426_s18 }
 0x3a9   : > { %3216 = vst [vmem:[#allocation4 + $0xe8] sm:$0xf] %v3202_v50  ;;  %3899 = vrot.lane.b32.xlu1 %v6663_v44, %s5425_s21 }
 0x3aa   : > { %v3249_v57 = vpop.permute.xlu0 %3248 }
 0x3ab   : > { %v3251_v32 = vpop.permute.xlu1 %3250  ;;  %v4350_v4 = vld [vmem:[#allocation4 + $0xb8] sm:$0xff] }
 0x3ac   : > { %v3264_v2 = vsel %vm7473_vm6, %v3249_v57, %v3251_v32  ;;  %v4351_v29 = vld [vmem:[#allocation4 + $0xc0] sm:$0xff]  ;;  %3961 = vrot.lane.b32.xlu0 %v6663_v44, %s5426_s18 }
 0x3ad   : > { %3278 = vst [vmem:[#allocation4 + $0xe8] sm:$0xf0] %v3264_v2  ;;  %3905 = vrot.lane.b32.xlu1 %v6802_v25, %s5425_s21  ;;  %4499 = vmatprep.subr.bf16.mxu1 %v4351_v29 }
 0x3ae   : > { %4500 = vmatpush1.bf16.msra.mxu1 %v4350_v4  ;;  %v3185_v3 = vpop.permute.xlu0 %3184 }
 0x3af   : > { %v3247_v9 = vpop.permute.xlu1 %3246  ;;  %v3201_v62 = vsel %vm7474_vm7, %v3185_v3, %v3187_v34 }
 0x3b0   : > { %v3263_v41 = vsel %vm7473_vm6, %v3247_v9, %v3249_v57  ;;  %3215 = vst [vmem:[#allocation4 + $0xe0] sm:$0xf] %v3201_v62  ;;  %3907 = vrot.lane.b32.xlu0 %v6813_v58, %s5425_s21 }
 0x3b1   : > { %3277 = vst [vmem:[#allocation4 + $0xe0] sm:$0xf0] %v3263_v41  ;;  %3967 = vrot.lane.b32.xlu1 %v6802_v25, %s5426_s18 }
 0x3b2   : > { %v3191_v36 = vpop.permute.xlu0 %3190 }
 0x3b3   : > { %v6855_v15 = vpop.permute.xlu1 %3192  ;;  %v3203_v14 = vsel %vm7474_vm7, %v3189_v45, %v3191_v36 }
 0x3b4   : > { %v3204_v10 = vsel %vm7474_vm7, %v3191_v36, %v6855_v15  ;;  %v4356_v63 = vld [vmem:[#allocation4 + $0xe8] sm:$0xff]  ;;  %3217 = vst [vmem:[#allocation4 + $0xf0] sm:$0xf] %v3203_v14  ;;  %3969 = vrot.lane.b32.xlu0 %v6813_v58, %s5426_s18  ;;  %vm7512_vm7 = vcmask 449536  }
 0x3b5   : > { %3218 = vst [vmem:[#allocation4 + $0xf8] sm:$0xf] %v3204_v10  ;;  %4025 = vrot.lane.b32.xlu1 %v6681_v37, %s5388_s19  ;;  %4460 = vmatprep.subr.bf16.mxu0 %v4356_v63  ;;  %vm7514_vm0 = vmmov %vm7512_vm7 }
 0x3b6   : > { %v3253_v17 = vpop.permute.xlu0 %3252 }
 0x3b7   : > { %v6864_v12 = vpop.permute.xlu1 %3254  ;;  %v3265_v59 = vsel %vm7473_vm6, %v3251_v32, %v3253_v17 }
 0x3b8   : > { %v3266_v61 = vsel %vm7473_vm6, %v3253_v17, %v6864_v12  ;;  %v4355_v51 = vld [vmem:[#allocation4 + $0xe0] sm:$0xff]  ;;  %3279 = vst [vmem:[#allocation4 + $0xf0] sm:$0xf0] %v3265_v59  ;;  %4027 = vrot.lane.b32.xlu0 %v6679_v49, %s5388_s19 }
 0x3b9   : > { %3280 = vst [vmem:[#allocation4 + $0xf8] sm:$0xf0] %v3266_v61  ;;  %4086 = vrot.lane.b32.xlu1 %v6681_v37, %s5389_s20  ;;  %4461 = vmatpush1.bf16.msra.mxu0 %v4355_v51 }
 0x3ba   : > { %v3311_v39 = vpop.permute.xlu0 %3310 }
 0x3bb   : > { %v3313_v16 = vpop.permute.xlu1 %3312 }
 0x3bc   : > { %v3326_v8 = vsel %vm7472_vm2, %v3311_v39, %v3313_v16  ;;  %4088 = vrot.lane.b32.xlu0 %v6679_v49, %s5389_s20 }
 0x3bd   : > { %3340 = vst [vmem:[#allocation4 + $0x120] sm:$0xf] %v3326_v8  ;;  %4023 = vrot.lane.b32.xlu1 %v6663_v44, %s5388_s19  ;;  %v3632_v8 = vld [vmem:[#allocation3 + $0x20] sm:$0xff] }
 0x3be   : > { %v3373_v19 = vpop.permute.xlu0 %3372 }
 0x3bf   : > { %v3375_v52 = vpop.permute.xlu1 %3374  ;;  %v4357_v47 = vld [vmem:[#allocation4 + $0xf0] sm:$0xff] }
 0x3c0   : > { %v3388_v54 = vsel %vm7471_vm13, %v3373_v19, %v3375_v52  ;;  %v4358_v33 = vld [vmem:[#allocation4 + $0xf8] sm:$0xff]  ;;  %4084 = vrot.lane.b32.xlu0 %v6663_v44, %s5389_s20 }
 0x3c1   : > { %3402 = vst [vmem:[#allocation4 + $0x120] sm:$0xf0] %v3388_v54  ;;  %4029 = vrot.lane.b32.xlu1 %v6802_v25, %s5388_s19  ;;  %4501 = vmatprep.subr.bf16.mxu1 %v4358_v33  ;;  %v6952_v33 = vld [vmem:[%s7427_s4] sm:$0xff] }
 0x3c2   : > { %4502 = vmatpush1.bf16.msra.mxu1 %v4357_v47  ;;  %v3309_v1 = vpop.permute.xlu0 %3308 }
 0x3c3   : > { %v3371_v21 = vpop.permute.xlu1 %3370  ;;  %v3325_v55 = vsel %vm7472_vm2, %v3309_v1, %v3311_v39 }
 0x3c4   : > { %v3387_v22 = vsel %vm7471_vm13, %v3371_v21, %v3373_v19  ;;  %3339 = vst [vmem:[#allocation4 + $0x118] sm:$0xf] %v3325_v55  ;;  %4031 = vrot.lane.b32.xlu0 %v6813_v58, %s5388_s19  ;;  %v6945_v19 = vcombine.low %v3632_v8, %v3632_v8 }
 0x3c5   : > { %3401 = vst [vmem:[#allocation4 + $0x118] sm:$0xf0] %v3387_v22  ;;  %4090 = vrot.lane.b32.xlu1 %v6802_v25, %s5389_s20  ;;  %v6959_v22 = vcombine.high %v6952_v33, %v6952_v33 }
 0x3c6   : > { %v3315_v31 = vpop.permute.xlu0 %3314 }
 0x3c7   : > { %v6889_v53 = vpop.permute.xlu1 %3316  ;;  %v3327_v30 = vsel %vm7472_vm2, %v3313_v16, %v3315_v31  ;;  %4484 = vmatprep.mubr.bf16.mxu0 %v6959_v22  ;;  %4525 = vmatprep.mubr.bf16.mxu1 %v6959_v22 }
 0x3c8   : > { %v3328_v60 = vsel %vm7472_vm2, %v3315_v31, %v6889_v53  ;;  %v4363_v0 = vld [vmem:[#allocation4 + $0x120] sm:$0xff]  ;;  %3341 = vst [vmem:[#allocation4 + $0x128] sm:$0xf] %v3327_v30  ;;  %4092 = vrot.lane.b32.xlu0 %v6813_v58, %s5389_s20  ;;  %v6968_v30 = vcombine.high %v3632_v8, %v3632_v8  ;;  %vm7510_vm2 = vcmask 457728  }
 0x3c9   : > { %3342 = vst [vmem:[#allocation4 + $0x130] sm:$0xf] %v3328_v60  ;;  %4147 = vrot.lane.b32.xlu1 %v6681_v37, %s7468_s14  ;;  %4462 = vmatprep.subr.bf16.mxu0 %v4363_v0  ;;  %vm7511_vm6 = vmmov %vm7510_vm2 }
 0x3ca   : > { %v3377_v56 = vpop.permute.xlu0 %3376 }
 0x3cb   : > { %v6898_v11 = vpop.permute.xlu1 %3378  ;;  %v3389_v18 = vsel %vm7471_vm13, %v3375_v52, %v3377_v56  ;;  %v2729_v52 = vld [vmem:[#allocation3 + $0x18] sm:$0xff] }
 0x3cc   : > { %v3390_v27 = vsel %vm7471_vm13, %v3377_v56, %v6898_v11  ;;  %v4362_v35 = vld [vmem:[#allocation4 + $0x118] sm:$0xff]  ;;  %3403 = vst [vmem:[#allocation4 + $0x128] sm:$0xf0] %v3389_v18  ;;  %4149 = vrot.lane.b32.xlu0 %v6679_v49, %s7468_s14  ;;  %v6947_v54 = vcombine.low %v2729_v52, %v2729_v52  ;;  %vm3977_vm13 = vcmask 465920  }
 0x3cd   : > { %3404 = vst [vmem:[#allocation4 + $0x130] sm:$0xf0] %v3390_v27  ;;  %4209 = vrot.lane.b32.xlu1 %v6681_v37, %s7466_s22  ;;  %4463 = vmatpush1.bf16.msra.mxu0 %v4362_v35  ;;  %v6977_v27 = vcombine.high %v2729_v52, %v2729_v52 }
 0x3ce   : > { %v3435_v48 = vpop.permute.xlu0 %3434 }
 0x3cf   : > { %v3437_v6 = vpop.permute.xlu1 %3436 }
 0x3d0   : > { %v3450_v46 = vsel %vm7465_vm14, %v3435_v48, %v3437_v6  ;;  %4211 = vrot.lane.b32.xlu0 %v6679_v49, %s7466_s22 }
 0x3d1   : > { %3464 = vst [vmem:[#allocation4 + $0x158] sm:$0xf] %v3450_v46  ;;  %4145 = vrot.lane.b32.xlu1 %v6663_v44, %s7468_s14 }
 0x3d2   : > { %v3433_v45 = vpop.permute.xlu0 %3432 }
 0x3d3   : > { %v3439_v26 = vpop.permute.xlu1 %3438  ;;  %v3449_v50 = vsel %vm7465_vm14, %v3433_v45, %v3435_v48  ;;  %v4364_v57 = vld [vmem:[#allocation4 + $0x128] sm:$0xff] }
 0x3d4   : > { %v3451_v34 = vsel %vm7465_vm14, %v3437_v6, %v3439_v26  ;;  %v4365_v32 = vld [vmem:[#allocation4 + $0x130] sm:$0xff]  ;;  %3463 = vst [vmem:[#allocation4 + $0x150] sm:$0xf] %v3449_v50  ;;  %4207 = vrot.lane.b32.xlu0 %v6663_v44, %s7466_s22  ;;  %v3754_v50 = vld [vmem:[#allocation3 + $0x24] sm:$0xff] }
 0x3d5   : > { %3465 = vst [vmem:[#allocation4 + $0x160] sm:$0xf] %v3451_v34  ;;  %4151 = vrot.lane.b32.xlu1 %v6802_v25, %s7468_s14  ;;  %4503 = vmatprep.subr.bf16.mxu1 %v4365_v32 }
 0x3d6   : > { %4504 = vmatpush1.bf16.msra.mxu1 %v4364_v57  ;;  %v6918_v29 = vpop.permute.xlu0 %3440 }
 0x3d7   : > { %v3533_v2 = vpop.permute.xlu1 %3532  ;;  %v3452_v4 = vsel %vm7465_vm14, %v3439_v26, %v6918_v29  ;;  %vm7503_vm14 = vmmov %vm7502_vm3 }
 0x3d8   : > { %v4370_v9 = vld [vmem:[#allocation4 + $0x158] sm:$0xff]  ;;  %3466 = vst [vmem:[#allocation4 + $0x168] sm:$0xf] %v3452_v4  ;;  %4153 = vrot.lane.b32.xlu0 %v6813_v58, %s7468_s14 }
 0x3d9   : > { %4213 = vrot.lane.b32.xlu1 %v6802_v25, %s7466_s22  ;;  %4464 = vmatprep.subr.bf16.mxu0 %v4370_v9  ;;  %v6996_v9 = vcombine.high %v3754_v50, %v3754_v50 }
 0x3da   : > { %v3535_v41 = vpop.permute.xlu0 %3534 }
 0x3db   : > { %v3594_v3 = vpop.permute.xlu1 %3593  ;;  %v3547_v62 = vsel %vm7502_vm3, %v3533_v2, %v3535_v41  ;;  %v4369_v36 = vld [vmem:[#allocation4 + $0x150] sm:$0xff] }
 0x3dc   : > { %3561 = vst [vmem:[#allocation4 + $0x190] sm:$0xf] %v3547_v62  ;;  %4215 = vrot.lane.b32.xlu0 %v6813_v58, %s7466_s22  ;;  %4465 = vmatpush1.bf16.msra.mxu0 %v4369_v36  ;;  %s7513_s22 = smov 61  }
 0x3dd   : > { %4270 = vrot.lane.b32.xlu1 %v6681_v37, %s5392_s23  ;;  %v4371_v37 = vld [vmem:[#allocation4 + $0x160] sm:$0xff] }
 0x3de   : > { %v3596_v10 = vpop.permute.xlu0 %3595 }
 0x3df   : > { %v3531_v14 = vpop.permute.xlu1 %3530  ;;  %v3609_v17 = vsel %vm7470_vm8, %v3594_v3, %v3596_v10  ;;  %v4372_v59 = vld [vmem:[#allocation4 + $0x168] sm:$0xff] }
 0x3e0   : > { %v3546_v63 = vsel %vm7503_vm14, %v3531_v14, %v3533_v2  ;;  %3623 = vst [vmem:[#allocation4 + $0x190] sm:$0xf0] %v3609_v17  ;;  %4272 = vrot.lane.b32.xlu0 %v6679_v49, %s5392_s23  ;;  %4505 = vmatprep.subr.bf16.mxu1 %v4372_v59  ;;  %vm7504_vm14 = vmmov %vm7502_vm3 }
 0x3e1   : > { %3560 = vst [vmem:[#allocation4 + $0x188] sm:$0xf] %v3546_v63  ;;  %4268 = vrot.lane.b32.xlu1 %v6663_v44, %s5392_s23  ;;  %4506 = vmatpush1.bf16.msra.mxu1 %v4371_v37 }
 0x3e2   : > { %v3592_v51 = vpop.permute.xlu0 %3591 }
 0x3e3   : > { %v3537_v61 = vpop.permute.xlu1 %3536  ;;  %v3608_v39 = vsel %vm7470_vm8, %v3592_v51, %v3594_v3  ;;  %v6998_v3 = vcombine.low %v3754_v50, %v3754_v50 }
 0x3e4   : > { %v3548_v16 = vsel %vm7502_vm3, %v3535_v41, %v3537_v61  ;;  %3622 = vst [vmem:[#allocation4 + $0x188] sm:$0xf0] %v3608_v39  ;;  %4274 = vrot.lane.b32.xlu0 %v6802_v25, %s5392_s23  ;;  %vm7505_vm3 = vcmask 965632  }
 0x3e5   : > { %3562 = vst [vmem:[#allocation4 + $0x198] sm:$0xf] %v3548_v16  ;;  %4276 = vrot.lane.b32.xlu1 %v6813_v58, %s5392_s23 }
 0x3e6   : > { %v6943_v49 = vpop.permute.xlu0 %3538 }
 0x3e7   : > { %v3598_v44 = vpop.permute.xlu1 %3597  ;;  %v3549_v21 = vsel %vm7504_vm14, %v3537_v61, %v6943_v49  ;;  %v4377_v1 = vld [vmem:[#allocation4 + $0x190] sm:$0xff]  ;;  %vm7506_vm14 = vmmov %vm7505_vm3 }
 0x3e8   : > { %v3610_v47 = vsel %vm7470_vm8, %v3596_v10, %v3598_v44  ;;  %3563 = vst [vmem:[#allocation4 + $0x1a0] sm:$0xf] %v3549_v21  ;;  %2762 = vrot.lane.b32.xlu0 %v6947_v54, %s5410_s26  ;;  %4466 = vmatprep.subr.bf16.mxu0 %v4377_v1 }
 0x3e9   : > { %3624 = vst [vmem:[#allocation4 + $0x198] sm:$0xf0] %v3610_v47  ;;  %3665 = vrot.lane.b32.xlu1 %v6945_v19, %s7500_s25 }
 0x3ea   : > { %v6966_v31 = vpop.permute.xlu0 %3599 }
 0x3eb   : > { %v3656_v55 = vpop.permute.xlu1 %3655  ;;  %v3611_v60 = vsel %vm7470_vm8, %v3598_v44, %v6966_v31  ;;  %v4376_v0 = vld [vmem:[#allocation4 + $0x188] sm:$0xff]  ;;  %vm7507_vm8 = vcmask 957440  }
 0x3ec   : > { %3625 = vst [vmem:[#allocation4 + $0x1a0] sm:$0xf0] %v3611_v60  ;;  %3667 = vrot.lane.b32.xlu0 %v6968_v30, %s7500_s25  ;;  %4467 = vmatpush1.bf16.msra.mxu0 %v4376_v0 }
 0x3ed   : > { %3726 = vrot.lane.b32.xlu1 %v6945_v19, %s7501_s24 }
 0x3ee   : > { %v3658_v18 = vpop.permute.xlu0 %3657 }
 0x3ef   : > { %v3717_v56 = vpop.permute.xlu1 %3716  ;;  %v3670_v35 = vsel %vm7505_vm3, %v3656_v55, %v3658_v18 }
 0x3f0   : > { %3684 = vst [vmem:[#allocation4 + $0x1c8] sm:$0xf] %v3670_v35  ;;  %3728 = vrot.lane.b32.xlu0 %v6968_v30, %s7501_s24  ;;  %v4378_v34 = vld [vmem:[#allocation4 + $0x198] sm:$0xff] }
 0x3f1   : > { %2764 = vrot.lane.b32.xlu1 %v6977_v27, %s5410_s26  ;;  %s7515_s26 = smov 11  }
 0x3f2   : > { %v3719_v48 = vpop.permute.xlu0 %3718 }
 0x3f3   : > { %v3654_v6 = vpop.permute.xlu1 %3653  ;;  %v3731_v26 = vsel %vm7507_vm8, %v3717_v56, %v3719_v48  ;;  %v4379_v45 = vld [vmem:[#allocation4 + $0x1a0] sm:$0xff] }
 0x3f4   : > { %v3669_v46 = vsel %vm7506_vm14, %v3654_v6, %v3656_v55  ;;  %3745 = vst [vmem:[#allocation4 + $0x1c8] sm:$0xf0] %v3731_v26  ;;  %2822 = vrot.lane.b32.xlu0 %v6558_v38, %s5411_s29  ;;  %4507 = vmatprep.subr.bf16.mxu1 %v4379_v45  ;;  %vm7508_vm14 = vmmov %vm7507_vm8 }
 0x3f5   : > { %3683 = vst [vmem:[#allocation4 + $0x1c0] sm:$0xf] %v3669_v46  ;;  %2824 = vrot.lane.b32.xlu1 %v6947_v54, %s5411_s29  ;;  %4508 = vmatpush1.bf16.msra.mxu1 %v4378_v34 }
 0x3f6   : > { %v3715_v57 = vpop.permute.xlu0 %3714 }
 0x3f7   : > { %v3660_v32 = vpop.permute.xlu1 %3659  ;;  %v3730_v4 = vsel %vm7508_vm14, %v3715_v57, %v3717_v56  ;;  %vm7509_vm14 = vmmov %vm7507_vm8 }
 0x3f8   : > { %v3671_v2 = vsel %vm7505_vm3, %v3658_v18, %v3660_v32  ;;  %3744 = vst [vmem:[#allocation4 + $0x1c0] sm:$0xf0] %v3730_v4  ;;  %2884 = vrot.lane.b32.xlu0 %v6558_v38, %s5412_s30 }
 0x3f9   : > { %3685 = vst [vmem:[#allocation4 + $0x1d0] sm:$0xf] %v3671_v2  ;;  %2886 = vrot.lane.b32.xlu1 %v6947_v54, %s5412_s30 }
 0x3fa   : > { %v7000_v62 = vpop.permute.xlu0 %3661 }
 0x3fb   : > { %v3721_v41 = vpop.permute.xlu1 %3720  ;;  %v3672_v14 = vsel %vm7505_vm3, %v3660_v32, %v7000_v62  ;;  %v4384_v10 = vld [vmem:[#allocation4 + $0x1c8] sm:$0xff]  ;;  %vm3853_vm3 = vcmask 539648  }
 0x3fc   : > { %v3732_v36 = vsel %vm7507_vm8, %v3719_v48, %v3721_v41  ;;  %3686 = vst [vmem:[#allocation4 + $0x1d8] sm:$0xf] %v3672_v14  ;;  %3787 = vrot.lane.b32.xlu0 %v6998_v3, %s5423_s17  ;;  %4468 = vmatprep.subr.bf16.mxu0 %v4384_v10  ;;  %vm3791_vm8 = vcmask 547840  }
 0x3fd   : > { %3746 = vst [vmem:[#allocation4 + $0x1d0] sm:$0xf0] %v3732_v36  ;;  %3789 = vrot.lane.b32.xlu1 %v6996_v9, %s5423_s17 }
 0x3fe   : > { %v7009_v17 = vpop.permute.xlu0 %3722 }
 0x3ff   : > { %v3778_v63 = vpop.permute.xlu1 %3777  ;;  %v3733_v59 = vsel %vm7509_vm14, %v3721_v41, %v7009_v17  ;;  %v4383_v37 = vld [vmem:[#allocation4 + $0x1c0] sm:$0xff]  ;;  %vm3915_vm14 = vcmask 531456  }
 0x400   : > { %3747 = vst [vmem:[#allocation4 + $0x1d8] sm:$0xf0] %v3733_v59  ;;  %3849 = vrot.lane.b32.xlu0 %v6998_v3, %s5424_s13  ;;  %4469 = vmatpush1.bf16.msra.mxu0 %v4383_v37 }
 0x401   : > { %3851 = vrot.lane.b32.xlu1 %v6996_v9, %s5424_s13 }
 0x402   : > { %v3780_v51 = vpop.permute.xlu0 %3779 }
 0x403   : > { %v3840_v61 = vpop.permute.xlu1 %3839  ;;  %v3793_v16 = vsel %vm3791_vm8, %v3778_v63, %v3780_v51 }
 0x404   : > { %3807 = vst [vmem:[#allocation4 + $0x200] sm:$0xf] %v3793_v16  ;;  %2826 = vrot.lane.b32.xlu0 %v6977_v27, %s5411_s29  ;;  %v4385_v21 = vld [vmem:[#allocation4 + $0x1d0] sm:$0xff]  ;;  %s7518_s29 = smov 47  }
 0x405   : > { %2888 = vrot.lane.b32.xlu1 %v6977_v27, %s5412_s30  ;;  %s7519_s30 = smov 46  }
 0x406   : > { %v3842_v8 = vpop.permute.xlu0 %3841 }
 0x407   : > { %v3776_v39 = vpop.permute.xlu1 %3775  ;;  %v3855_v44 = vsel %vm3853_vm3, %v3840_v61, %v3842_v8  ;;  %v4386_v47 = vld [vmem:[#allocation4 + $0x1d8] sm:$0xff] }
 0x408   : > { %v3792_v52 = vsel %vm3791_vm8, %v3776_v39, %v3778_v63  ;;  %3869 = vst [vmem:[#allocation4 + $0x200] sm:$0xf0] %v3855_v44  ;;  %2946 = vrot.lane.b32.xlu0 %v6558_v38, %s5413_s9  ;;  %4509 = vmatprep.subr.bf16.mxu1 %v4386_v47 }
 0x409   : > { %3806 = vst [vmem:[#allocation4 + $0x1f8] sm:$0xf] %v3792_v52  ;;  %2948 = vrot.lane.b32.xlu1 %v6947_v54, %s5413_s9  ;;  %4510 = vmatpush1.bf16.msra.mxu1 %v4385_v21 }
 0x40a   : > { %v3838_v55 = vpop.permute.xlu0 %3837 }
 0x40b   : > { %v3782_v1 = vpop.permute.xlu1 %3781  ;;  %v3854_v0 = vsel %vm3853_vm3, %v3838_v55, %v3840_v61 }
 0x40c   : > { %v3794_v60 = vsel %vm3791_vm8, %v3780_v51, %v3782_v1  ;;  %3868 = vst [vmem:[#allocation4 + $0x1f8] sm:$0xf0] %v3854_v0  ;;  %3008 = vrot.lane.b32.xlu0 %v6558_v38, %s5414_s12 }
 0x40d   : > { %3808 = vst [vmem:[#allocation4 + $0x208] sm:$0xf] %v3794_v60  ;;  %3010 = vrot.lane.b32.xlu1 %v6947_v54, %s5414_s12 }
 0x40e   : > { %v7034_v18 = vpop.permute.xlu0 %3783 }
 0x40f   : > { %v3844_v56 = vpop.permute.xlu1 %3843  ;;  %v3795_v6 = vsel %vm3791_vm8, %v3782_v1, %v7034_v18  ;;  %v4391_v48 = vld [vmem:[#allocation4 + $0x200] sm:$0xff] }
 0x410   : > { %v3856_v35 = vsel %vm3853_vm3, %v3842_v8, %v3844_v56  ;;  %3809 = vst [vmem:[#allocation4 + $0x210] sm:$0xf] %v3795_v6  ;;  %3911 = vrot.lane.b32.xlu0 %v6998_v3, %s5425_s21  ;;  %4470 = vmatprep.subr.bf16.mxu0 %v4391_v48 }
 0x411   : > { %3870 = vst [vmem:[#allocation4 + $0x208] sm:$0xf0] %v3856_v35  ;;  %3913 = vrot.lane.b32.xlu1 %v6996_v9, %s5425_s21 }
 0x412   : > { %v7043_v26 = vpop.permute.xlu0 %3845 }
 0x413   : > { %v3902_v46 = vpop.permute.xlu1 %3901  ;;  %v3857_v45 = vsel %vm3853_vm3, %v3844_v56, %v7043_v26  ;;  %v4390_v34 = vld [vmem:[#allocation4 + $0x1f8] sm:$0xff] }
 0x414   : > { %3871 = vst [vmem:[#allocation4 + $0x210] sm:$0xf0] %v3857_v45  ;;  %3973 = vrot.lane.b32.xlu0 %v6998_v3, %s5426_s18  ;;  %4471 = vmatpush1.bf16.msra.mxu0 %v4390_v34 }
 0x415   : > { %3975 = vrot.lane.b32.xlu1 %v6996_v9, %s5426_s18 }
 0x416   : > { %v3904_v32 = vpop.permute.xlu0 %3903 }
 0x417   : > { %v3964_v50 = vpop.permute.xlu1 %3963  ;;  %v3917_v57 = vsel %vm3915_vm14, %v3902_v46, %v3904_v32 }
 0x418   : > { %3931 = vst [vmem:[#allocation4 + $0x238] sm:$0xf] %v3917_v57  ;;  %2950 = vrot.lane.b32.xlu0 %v6977_v27, %s5413_s9  ;;  %v4392_v10 = vld [vmem:[#allocation4 + $0x208] sm:$0xff]  ;;  %s7520_s9 = smov 10  }
 0x419   : > { %3012 = vrot.lane.b32.xlu1 %v6977_v27, %s5414_s12  ;;  %s7521_s12 = smov 9  }
 0x41a   : > { %v3966_v4 = vpop.permute.xlu0 %3965 }
 0x41b   : > { %v3900_v2 = vpop.permute.xlu1 %3899  ;;  %v3979_v36 = vsel %vm3977_vm13, %v3964_v50, %v3966_v4  ;;  %v4393_v14 = vld [vmem:[#allocation4 + $0x210] sm:$0xff] }
 0x41c   : > { %v3916_v41 = vsel %vm3915_vm14, %v3900_v2, %v3902_v46  ;;  %3993 = vst [vmem:[#allocation4 + $0x238] sm:$0xf0] %v3979_v36  ;;  %3070 = vrot.lane.b32.xlu0 %v6558_v38, %s5415_s15  ;;  %4511 = vmatprep.subr.bf16.mxu1 %v4393_v14 }
 0x41d   : > { %3930 = vst [vmem:[#allocation4 + $0x230] sm:$0xf] %v3916_v41  ;;  %3072 = vrot.lane.b32.xlu1 %v6947_v54, %s5415_s15  ;;  %4512 = vmatpush1.bf16.msra.mxu1 %v4392_v10 }
 0x41e   : > { %v3962_v59 = vpop.permute.xlu0 %3961 }
 0x41f   : > { %v3906_v63 = vpop.permute.xlu1 %3905  ;;  %v3978_v61 = vsel %vm3977_vm13, %v3962_v59, %v3964_v50  ;;  %v7121_v59 = vcombine.high %v6805_v13, %v6805_v13 }
 0x420   : > { %v3918_v37 = vsel %vm3915_vm14, %v3904_v32, %v3906_v63  ;;  %3992 = vst [vmem:[#allocation4 + $0x230] sm:$0xf0] %v3978_v61  ;;  %3132 = vrot.lane.b32.xlu0 %v6558_v38, %s5416_s16  ;;  %v3287_v61 = vld [vmem:[#allocation3 + $0x1c] sm:$0xff] }
 0x421   : > { %3932 = vst [vmem:[#allocation4 + $0x240] sm:$0xf] %v3918_v37  ;;  %3134 = vrot.lane.b32.xlu1 %v6947_v54, %s5416_s16 }
 0x422   : > { %v7068_v16 = vpop.permute.xlu0 %3907 }
 0x423   : > { %v3968_v51 = vpop.permute.xlu1 %3967  ;;  %v3919_v8 = vsel %vm3915_vm14, %v3906_v63, %v7068_v16  ;;  %v4398_v52 = vld [vmem:[#allocation4 + $0x238] sm:$0xff] }
 0x424   : > { %v3980_v39 = vsel %vm3977_vm13, %v3966_v4, %v3968_v51  ;;  %3933 = vst [vmem:[#allocation4 + $0x248] sm:$0xf] %v3919_v8  ;;  %4035 = vrot.lane.b32.xlu0 %v6998_v3, %s5388_s19  ;;  %4472 = vmatprep.subr.bf16.mxu0 %v4398_v52  ;;  %v5056_v8 = vcombine.low %v3287_v61, %v3287_v61  ;;  %v5361_v52 = vld [vmem:[#allocation3 + $0x14] sm:$0xff] }
 0x425   : > { %3994 = vst [vmem:[#allocation4 + $0x240] sm:$0xf0] %v3980_v39  ;;  %4037 = vrot.lane.b32.xlu1 %v6996_v9, %s5388_s19 }
 0x426   : > { %v7077_v47 = vpop.permute.xlu0 %3969 }
 0x427   : > { %v4026_v44 = vpop.permute.xlu1 %4025  ;;  %v3981_v21 = vsel %vm3977_vm13, %v3968_v51, %v7077_v47  ;;  %v4397_v1 = vld [vmem:[#allocation4 + $0x230] sm:$0xff] }
 0x428   : > { %3995 = vst [vmem:[#allocation4 + $0x248] sm:$0xf0] %v3981_v21  ;;  %4096 = vrot.lane.b32.xlu0 %v6998_v3, %s5389_s20  ;;  %4473 = vmatpush1.bf16.msra.mxu0 %v4397_v1 }
 0x429   : > { %4098 = vrot.lane.b32.xlu1 %v6996_v9, %s5389_s20 }
 0x42a   : > { %v4028_v60 = vpop.permute.xlu0 %4027 }
 0x42b   : > { %v4087_v55 = vpop.permute.xlu1 %4086  ;;  %v4040_v0 = vsel %vm7510_vm2, %v4026_v44, %v4028_v60 }
 0x42c   : > { %4054 = vst [vmem:[#allocation4 + $0x270] sm:$0xf] %v4040_v0  ;;  %3074 = vrot.lane.b32.xlu0 %v6977_v27, %s5415_s15  ;;  %v4399_v45 = vld [vmem:[#allocation4 + $0x240] sm:$0xff]  ;;  %s7522_s15 = smov 1  }
 0x42d   : > { %3136 = vrot.lane.b32.xlu1 %v6977_v27, %s5416_s16  ;;  %s7523_s16 = smov 119  }
 0x42e   : > { %v4089_v35 = vpop.permute.xlu0 %4088 }
 0x42f   : > { %v4024_v56 = vpop.permute.xlu1 %4023  ;;  %v4101_v48 = vsel %vm7512_vm7, %v4087_v55, %v4089_v35  ;;  %v4400_v46 = vld [vmem:[#allocation4 + $0x248] sm:$0xff]  ;;  %vm7516_vm7 = vmmov %vm7514_vm0 }
 0x430   : > { %v4039_v6 = vsel %vm7511_vm6, %v4024_v56, %v4026_v44  ;;  %4115 = vst [vmem:[#allocation4 + $0x270] sm:$0xf0] %v4101_v48  ;;  %3194 = vrot.lane.b32.xlu0 %v6558_v38, %s7513_s22  ;;  %4513 = vmatprep.subr.bf16.mxu1 %v4400_v46  ;;  %vm7517_vm6 = vmmov %vm7510_vm2  ;;  %v5055_v44 = vcombine.high %v5361_v52, %v5361_v52 }
 0x431   : > { %4053 = vst [vmem:[#allocation4 + $0x268] sm:$0xf] %v4039_v6  ;;  %3196 = vrot.lane.b32.xlu1 %v6947_v54, %s7513_s22  ;;  %4514 = vmatpush1.bf16.msra.mxu1 %v4399_v45 }
 0x432   : > { %v4085_v50 = vpop.permute.xlu0 %4084 }
 0x433   : > { %v4030_v34 = vpop.permute.xlu1 %4029  ;;  %v4100_v57 = vsel %vm7514_vm0, %v4085_v50, %v4087_v55 }
 0x434   : > { %v4041_v32 = vsel %vm7510_vm2, %v4028_v60, %v4030_v34  ;;  %4114 = vst [vmem:[#allocation4 + $0x268] sm:$0xf0] %v4100_v57  ;;  %3256 = vrot.lane.b32.xlu0 %v6802_v25, %s7515_s26  ;;  %vm4161_vm2 = vcmask 384000  }
 0x435   : > { %4055 = vst [vmem:[#allocation4 + $0x278] sm:$0xf] %v4041_v32  ;;  %3258 = vrot.lane.b32.xlu1 %v6813_v58, %s7515_s26  ;;  %v5065_v32 = vcombine.high %v3287_v61, %v3287_v61 }
 0x436   : > { %v7102_v2 = vpop.permute.xlu0 %4031 }
 0x437   : > { %v4091_v54 = vpop.permute.xlu1 %4090  ;;  %v4042_v4 = vsel %vm7517_vm6, %v4030_v34, %v7102_v2  ;;  %v4405_v41 = vld [vmem:[#allocation4 + $0x270] sm:$0xff]  ;;  %vm7525_vm6 = vcmask 957440  }
 0x438   : > { %v4102_v38 = vsel %vm7516_vm7, %v4089_v35, %v4091_v54  ;;  %4056 = vst [vmem:[#allocation4 + $0x280] sm:$0xf] %v4042_v4  ;;  %4157 = vrot.lane.b32.xlu0 %v6998_v3, %s7518_s29  ;;  %4474 = vmatprep.subr.bf16.mxu0 %v4405_v41  ;;  %vm7524_vm7 = vcmask 965632  }
 0x439   : > { %4116 = vst [vmem:[#allocation4 + $0x278] sm:$0xf0] %v4102_v38  ;;  %4159 = vrot.lane.b32.xlu1 %v6996_v9, %s7518_s29 }
 0x43a   : > { %v7111_v25 = vpop.permute.xlu0 %4092 }
 0x43b   : > { %v4148_v58 = vpop.permute.xlu1 %4147  ;;  %v4103_v36 = vsel %vm7514_vm0, %v4091_v54, %v7111_v25  ;;  %v4404_v14 = vld [vmem:[#allocation4 + $0x268] sm:$0xff] }
 0x43c   : > { %4117 = vst [vmem:[#allocation4 + $0x280] sm:$0xf0] %v4103_v36  ;;  %4219 = vrot.lane.b32.xlu0 %v6998_v3, %s7519_s30  ;;  %4475 = vmatpush1.bf16.msra.mxu0 %v4404_v14  ;;  %v5362_v36 = vld [vmem:[#allocation3 + $0x18] sm:$0xff] }
 0x43d   : > { %4221 = vrot.lane.b32.xlu1 %v6996_v9, %s7519_s30  ;;  %v5086_v14 = vcombine.high %v5362_v36, %v5362_v36 }
 0x43e   : > { %v4150_v63 = vpop.permute.xlu0 %4149 }
 0x43f   : > { %v4210_v10 = vpop.permute.xlu1 %4209  ;;  %v4163_v37 = vsel %vm4161_vm2, %v4148_v58, %v4150_v63 }
 0x440   : > { %4177 = vst [vmem:[#allocation4 + $0x2a8] sm:$0xf] %v4163_v37  ;;  %3198 = vrot.lane.b32.xlu0 %v6977_v27, %s7513_s22  ;;  %v4406_v55 = vld [vmem:[#allocation4 + $0x278] sm:$0xff] }
 0x441   : > { %3260 = vrot.lane.b32.xlu1 %v7121_v59, %s7515_s26 }
 0x442   : > { %v4212_v39 = vpop.permute.xlu0 %4211 }
 0x443   : > { %v4146_v51 = vpop.permute.xlu1 %4145  ;;  %v4224_v13 = vsel %vm1248_vm11, %v4210_v10, %v4212_v39  ;;  %v4407_v1 = vld [vmem:[#allocation4 + $0x280] sm:$0xff] }
 0x444   : > { %v4162_v21 = vsel %vm4161_vm2, %v4146_v51, %v4148_v58  ;;  %4238 = vst [vmem:[#allocation4 + $0x2a8] sm:$0xf0] %v4224_v13  ;;  %3318 = vrot.lane.b32.xlu0 %v5055_v44, %s7520_s9  ;;  %4515 = vmatprep.subr.bf16.mxu1 %v4407_v1 }
 0x445   : > { %4176 = vst [vmem:[#allocation4 + $0x2a0] sm:$0xf] %v4162_v21  ;;  %3320 = vrot.lane.b32.xlu1 %v5056_v8, %s7520_s9  ;;  %4516 = vmatpush1.bf16.msra.mxu1 %v4406_v55  ;;  %v7173_v55 = vld [vmem:[#allocation2 + $0x188] sm:$0xff] }
 0x446   : > { %v4208_v60 = vpop.permute.xlu0 %4207 }
 0x447   : > { %v4152_v27 = vpop.permute.xlu1 %4151  ;;  %v4223_v56 = vsel %vm1248_vm11, %v4208_v60, %v4210_v10 }
 0x448   : > { %v4164_v0 = vsel %vm4161_vm2, %v4150_v63, %v4152_v27  ;;  %4237 = vst [vmem:[#allocation4 + $0x2a0] sm:$0xf0] %v4223_v56  ;;  %3380 = vrot.lane.b32.xlu0 %v5055_v44, %s7521_s12 }
 0x449   : > { %4178 = vst [vmem:[#allocation4 + $0x2b0] sm:$0xf] %v4164_v0  ;;  %3382 = vrot.lane.b32.xlu1 %v5056_v8, %s7521_s12 }
 0x44a   : > { %v7136_v6 = vpop.permute.xlu0 %4153 }
 0x44b   : > { %v4214_v35 = vpop.permute.xlu1 %4213  ;;  %v4165_v46 = vsel %vm4161_vm2, %v4152_v27, %v7136_v6  ;;  %v4412_v45 = vld [vmem:[#allocation4 + $0x2a8] sm:$0xff] }
 0x44c   : > { %v4225_v48 = vsel %vm1248_vm11, %v4212_v39, %v4214_v35  ;;  %4179 = vst [vmem:[#allocation4 + $0x2b8] sm:$0xf] %v4165_v46  ;;  %4280 = vrot.lane.b32.xlu0 %v6998_v3, %s5392_s23  ;;  %4476 = vmatprep.subr.bf16.mxu0 %v4412_v45 }
 0x44d   : > { %4239 = vst [vmem:[#allocation4 + $0x2b0] sm:$0xf0] %v4225_v48  ;;  %4282 = vrot.lane.b32.xlu1 %v6996_v9, %s5392_s23 }
 0x44e   : > { %v7145_v50 = vpop.permute.xlu0 %4215 }
 0x44f   : > { %v4271_v34 = vpop.permute.xlu1 %4270  ;;  %v4226_v57 = vsel %vm1248_vm11, %v4214_v35, %v7145_v50  ;;  %v4411_v54 = vld [vmem:[#allocation4 + $0x2a0] sm:$0xff] }
 0x450   : > { %4240 = vst [vmem:[#allocation4 + $0x2b8] sm:$0xf0] %v4226_v57  ;;  %3322 = vrot.lane.b32.xlu0 %v5065_v32, %s7520_s9  ;;  %4477 = vmatpush1.bf16.msra.mxu0 %v4411_v54 }
 0x451   : > { %3384 = vrot.lane.b32.xlu1 %v5065_v32, %s7521_s12 }
 0x452   : > { %v4273_v9 = vpop.permute.xlu0 %4272 }
 0x453   : > { %v4269_v38 = vpop.permute.xlu1 %4268  ;;  %v4285_v3 = vsel %vm1324_vm12, %v4271_v34, %v4273_v9 }
 0x454   : > { %v4284_v4 = vsel %vm1324_vm12, %v4269_v38, %v4271_v34  ;;  %4299 = vst [vmem:[#allocation4 + $0x2e0] sm:$0xf] %v4285_v3  ;;  %3442 = vrot.lane.b32.xlu0 %v5055_v44, %s7522_s15  ;;  %v4413_v61 = vld [vmem:[#allocation4 + $0x2b0] sm:$0xff] }
 0x455   : > { %4298 = vst [vmem:[#allocation4 + $0x2d8] sm:$0xf] %v4284_v4  ;;  %3444 = vrot.lane.b32.xlu1 %v5056_v8, %s7522_s15  ;;  %v4622_v4 = vld [vmem:[%s5492_s10 + $0x2] sm:$0xff] }
 0x456   : > { %v4275_v58 = vpop.permute.xlu0 %4274  ;;  %v4640_v36 = vrot.slane %v4622_v4, %v5487_v5 }
 0x457   : > { %v7155_v41 = vpop.permute.xlu1 %4276  ;;  %v4286_v10 = vsel %vm1324_vm12, %v4273_v9, %v4275_v58  ;;  %v4414_v37 = vld [vmem:[#allocation4 + $0x2b8] sm:$0xff] }
 0x458   : > { %v4287_v63 = vsel %vm1324_vm12, %v4275_v58, %v7155_v41  ;;  %4300 = vst [vmem:[#allocation4 + $0x2e8] sm:$0xf] %v4286_v10  ;;  %3446 = vrot.lane.b32.xlu0 %v5065_v32, %s7522_s15  ;;  %4517 = vmatprep.subr.bf16.mxu1 %v4414_v37 }
 0x459   : > { %4301 = vst [vmem:[#allocation4 + $0x2f0] sm:$0xf] %v4287_v63  ;;  %3540 = vrot.lane.b32.xlu1 %v5086_v14, %s7499_s11  ;;  %4518 = vmatpush1.bf16.msra.mxu1 %v4413_v61 }
 0x45a   : > { %v2763_v39 = vpop.permute.xlu0 %2762 }
 0x45b   : > { %v7162_v51 = vpop.permute.xlu1 %3665  ;;  %v2772_v8 = vsel %vm2766_vm9, %v6718_v28, %v2763_v39  ;;  %v4419_v52 = vld [vmem:[#allocation4 + $0x2e0] sm:$0xff] }
 0x45c   : > { %v4418_v44 = vld [vmem:[#allocation4 + $0x2d8] sm:$0xff]  ;;  %2786 = vst [vmem:[#allocation4 + $0x28] sm:$0xf0] %v2772_v8  ;;  %3542 = vrot.lane.b32.xlu0 %v6945_v19, %s7499_s11  ;;  %4478 = vmatprep.subr.bf16.mxu0 %v4419_v52  ;;  %v4648_v8 = vcombine.high %v4640_v36, %v4640_v36 }
 0x45d   : > { %3601 = vrot.lane.b32.xlu1 %v5086_v14, %s7523_s16  ;;  %4479 = vmatpush1.bf16.msra.mxu0 %v4418_v44 }
 0x45e   : > { %v3668_v13 = vpop.permute.xlu0 %3667  ;;  %4480 = vmatprep.subr.bf16.mxu0 %v7173_v55 }
 0x45f   : > { %v7169_v21 = vpop.permute.xlu1 %3726  ;;  %v3675_v1 = vsel %vm7524_vm7, %v7162_v51, %v3668_v13  ;;  %v4420_v27 = vld [vmem:[#allocation4 + $0x2e8] sm:$0xff] }
 0x460   : > { %v4421_v28 = vld [vmem:[#allocation4 + $0x2f0] sm:$0xff]  ;;  %3689 = vst [vmem:[#allocation4 + $0x1f0] sm:$0xf] %v3675_v1  ;;  %3603 = vrot.lane.b32.xlu0 %v6945_v19, %s7523_s16  ;;  %v7191_v19 = vcombine.low %v6952_v33, %v6952_v33  ;;  %v4331_v33 = vld [vmem:[#allocation4 + $0x20] sm:$0xff] }
 0x461   : > { %3544 = vrot.lane.b32.xlu1 %v6968_v30, %s7499_s11  ;;  %4519 = vmatprep.subr.bf16.mxu1 %v4421_v28  ;;  %v4623_v28 = vld [vmem:[%s5492_s10 + $0xa] sm:$0xff] }
 0x462   : > { %4481 = vmatpush1.bf16.msra.mxu0 %v7173_v55  ;;  %4520 = vmatpush1.bf16.msra.mxu1 %v4420_v27  ;;  %v3729_v0 = vpop.permute.xlu0 %3728 }
 0x463   : > { %v2765_v60 = vpop.permute.xlu1 %2764  ;;  %v3736_v35 = vsel %vm7525_vm6, %v7169_v21, %v3729_v0  ;;  %4482 = vmatprep.subr.bf16.mxu0 %v7173_v55  ;;  %4521 = vmatprep.subr.bf16.mxu1 %v7173_v55  ;;  %v4332_v46 = vld [vmem:[#allocation4 + $0x28] sm:$0xff]  ;;  %vm7533_vm6 = vcmask 89088  }
 0x464   : > { %v2773_v56 = vsel %vm2766_vm9, %v2763_v39, %v2765_v60  ;;  %3750 = vst [vmem:[#allocation4 + $0x1f0] sm:$0xf0] %v3736_v35  ;;  %3605 = vrot.lane.b32.xlu0 %v6968_v30, %s7523_s16  ;;  %vm7526_vm9 = vcmask 506880  }
 0x465   : > { %2787 = vst [vmem:[#allocation4 + $0x30] sm:$0xf0] %v2773_v56  ;;  %3663 = vrot.lane.b32.xlu1 %v5086_v14, %s7500_s25 }
 0x466   : > { %4483 = vmatpush1.bf16.msra.mxu0 %v7173_v55  ;;  %4522 = vmatpush1.bf16.msra.mxu1 %v7173_v55  ;;  %v2823_v45 = vpop.permute.xlu0 %2822 }
 0x467   : > { %v2825_v48 = vpop.permute.xlu1 %2824  ;;  %4534 = vmatprep.subr.bf16.mxu0 %v4332_v46  ;;  %v2833_v34 = vsel %vm2828_vm10, %v6743_v43, %v2823_v45  ;;  %4523 = vmatprep.subr.bf16.mxu1 %v7173_v55  ;;  %v4657_v46 = vrot.slane %v4623_v28, %v5487_v5 }
 0x468   : > { %v2834_v32 = vsel %vm2828_vm10, %v2823_v45, %v2825_v48  ;;  %2847 = vst [vmem:[#allocation4 + $0x58] sm:$0xf] %v2833_v34  ;;  %3724 = vrot.lane.b32.xlu0 %v5086_v14, %s7501_s24  ;;  %v4633_v14 = vcombine.high %v4622_v4, %v4622_v4 }
 0x469   : > { %2848 = vst [vmem:[#allocation4 + $0x60] sm:$0xf] %v2834_v32  ;;  %3785 = vrot.lane.b32.xlu1 %v7121_v59, %s5423_s17  ;;  %4485 = vmatmul.mubr.bf16.vlgmr.msra.gmra.mrb[8].mxu0 %v7191_v19 }
 0x46a   : > { %4524 = vmatpush1.bf16.msra.mxu1 %v7173_v55  ;;  %4535 = vmatpush1.bf16.msra.mxu0 %v4331_v33  ;;  %v2885_v43 = vpop.permute.xlu0 %2884  ;;  %v4647_v39 = vrot.slane %v4633_v14, %v5487_v5 }
 0x46b   : > { %v2887_v30 = vpop.permute.xlu1 %2886  ;;  %v2895_v57 = vsel %vm2890_vm15, %v6752_v23, %v2885_v43  ;;  %v4389_v38 = vld [vmem:[#allocation4 + $0x1f0] sm:$0xff]  ;;  %4566 = vmatprep.mubr.bf16.mxu0 %v6959_v22 }
 0x46c   : > { %v2896_v54 = vsel %vm2890_vm15, %v2885_v43, %v2887_v30  ;;  %v4333_v9 = vld [vmem:[#allocation4 + $0x30] sm:$0xff]  ;;  %2909 = vst [vmem:[#allocation4 + $0x58] sm:$0xf0] %v2895_v57  ;;  %3847 = vrot.lane.b32.xlu0 %v7121_v59, %s5424_s13  ;;  %5209 = vmatprep.subr.bf16.mxu1 %v4389_v38  ;;  %v4665_v43 = vcombine.high %v4657_v46, %v4657_v46 }
 0x46d   : > { %2910 = vst [vmem:[#allocation4 + $0x60] sm:$0xf0] %v2896_v54  ;;  %3909 = vrot.lane.b32.xlu1 %v7121_v59, %s5425_s21  ;;  %4526 = vmatmul.mubr.bf16.vlgmr.msra.gmra.mrb[8].mxu1 %v7191_v19  ;;  %s5260_s21 = smul.u32 56, %s7562_s28 }
 0x46e   : > { %5210 = vmatpush3.bf16.msra.mxu1 %v4333_v9  ;;  %v7214_v3 = vpop.permute.xlu0 %3787  ;;  %4607 = vmatprep.mubr.bf16.mxu1 %v6959_v22 }
 0x46f   : > { %v3790_v23 = vpop.permute.xlu1 %3789  ;;  %s7411_s11 = scalar_lea.vmem %s7431_s8, %s5260_s21 }
 0x470   : > { %v3798_v58 = vsel %vm3791_vm8, %v7214_v3, %v3790_v23  ;;  %3971 = vrot.lane.b32.xlu0 %v7121_v59, %s5426_s18 }
 0x471   : > { %3812 = vst [vmem:[#allocation4 + $0x228] sm:$0xf] %v3798_v58  ;;  %4033 = vrot.lane.b32.xlu1 %v7121_v59, %s5388_s19 }
 0x472   : > { %v7224_v63 = vpop.permute.xlu0 %3849 }
 0x473   : > { %v3852_v10 = vpop.permute.xlu1 %3851  ;;  %v4338_v61 = vld [vmem:[#allocation4 + $0x58] sm:$0xff] }
 0x474   : > { %v3860_v37 = vsel %vm3853_vm3, %v7224_v63, %v3852_v10  ;;  %v4339_v22 = vld [vmem:[#allocation4 + $0x60] sm:$0xff]  ;;  %4094 = vrot.lane.b32.xlu0 %v7121_v59, %s5389_s20 }
 0x475   : > { %3874 = vst [vmem:[#allocation4 + $0x228] sm:$0xf0] %v3860_v37  ;;  %4667 = vrot.lane.b32.xlu1 %v4640_v36, %s5392_s23  ;;  %4536 = vmatprep.subr.bf16.mxu0 %v4339_v22 }
 0x476   : > { %4537 = vmatpush1.bf16.msra.mxu0 %v4338_v61  ;;  %v2827_v44 = vpop.permute.xlu0 %2826 }
 0x477   : > { %v2889_v52 = vpop.permute.xlu1 %2888  ;;  %v2835_v1 = vsel %vm2828_vm10, %v2825_v48, %v2827_v44  ;;  %v4649_v48 = vcombine.high %v4647_v39, %v4647_v39  ;;  %vm7527_vm10 = vmmov %vm7526_vm9 }
 0x478   : > { %v2897_v13 = vsel %vm2890_vm15, %v2887_v30, %v2889_v52  ;;  %2849 = vst [vmem:[#allocation4 + $0x68] sm:$0xf] %v2835_v1  ;;  %4669 = vrot.lane.b32.xlu0 %v4648_v8, %s5392_s23  ;;  %v4650_v30 = vcombine.high %v4623_v28, %v4623_v28  ;;  %vm7528_vm15 = vcmask 457728  }
 0x479   : > { %2911 = vst [vmem:[#allocation4 + $0x68] sm:$0xf0] %v2897_v13  ;;  %4671 = vrot.lane.b32.xlu1 %v4647_v39, %s5392_s23 }
 0x47a   : > { %v2947_v60 = vpop.permute.xlu0 %2946 }
 0x47b   : > { %v2949_v27 = vpop.permute.xlu1 %2948  ;;  %v2957_v0 = vsel %vm2952_vm1, %v6777_v7, %v2947_v60 }
 0x47c   : > { %v2958_v56 = vsel %vm2952_vm1, %v2947_v60, %v2949_v27  ;;  %v4396_v35 = vld [vmem:[#allocation4 + $0x228] sm:$0xff]  ;;  %2971 = vst [vmem:[#allocation4 + $0x90] sm:$0xf] %v2957_v0  ;;  %4155 = vrot.lane.b32.xlu0 %v7121_v59, %s7518_s29 }
 0x47d   : > { %2972 = vst [vmem:[#allocation4 + $0x98] sm:$0xf] %v2958_v56  ;;  %4217 = vrot.lane.b32.xlu1 %v7121_v59, %s7519_s30  ;;  %5211 = vmatprep.subr.bf16.mxu1 %v4396_v35 }
 0x47e   : > { %v3009_v34 = vpop.permute.xlu0 %3008 }
 0x47f   : > { %v3011_v45 = vpop.permute.xlu1 %3010  ;;  %v3019_v7 = vsel %vm3014_vm4, %v6786_v40, %v3009_v34  ;;  %v4664_v40 = vrot.slane %v4650_v30, %v5487_v5  ;;  %v4439_v5 = vld [vmem:[%s7428_s5] sm:$0xff] }
 0x480   : > { %v3020_v32 = vsel %vm3014_vm4, %v3009_v34, %v3011_v45  ;;  %v4340_v33 = vld [vmem:[#allocation4 + $0x68] sm:$0xff]  ;;  %3033 = vst [vmem:[#allocation4 + $0x90] sm:$0xf0] %v3019_v7  ;;  %4278 = vrot.lane.b32.xlu0 %v7121_v59, %s5392_s23 }
 0x481   : > { %3034 = vst [vmem:[#allocation4 + $0x98] sm:$0xf0] %v3020_v32  ;;  %4673 = vrot.lane.b32.xlu1 %v4649_v48, %s5392_s23  ;;  %5212 = vmatpush3.bf16.msra.mxu1 %v4340_v33  ;;  %v4666_v9 = vcombine.high %v4664_v40, %v4664_v40 }
 0x482   : > { %v7251_v54 = vpop.permute.xlu0 %3911 }
 0x483   : > { %v3914_v57 = vpop.permute.xlu1 %3913 }
 0x484   : > { %v3922_v38 = vsel %vm3915_vm14, %v7251_v54, %v3914_v57  ;;  %4675 = vrot.lane.b32.xlu0 %v4657_v46, %s5392_s23 }
 0x485   : > { %3936 = vst [vmem:[#allocation4 + $0x260] sm:$0xf] %v3922_v38  ;;  %4677 = vrot.lane.b32.xlu1 %v4665_v43, %s5392_s23 }
 0x486   : > { %v7258_v23 = vpop.permute.xlu0 %3973 }
 0x487   : > { %v3976_v4 = vpop.permute.xlu1 %3975  ;;  %v4345_v36 = vld [vmem:[#allocation4 + $0x90] sm:$0xff] }
 0x488   : > { %v3984_v59 = vsel %vm3977_vm13, %v7258_v23, %v3976_v4  ;;  %v4346_v58 = vld [vmem:[#allocation4 + $0x98] sm:$0xff]  ;;  %4679 = vrot.lane.b32.xlu0 %v4664_v40, %s5392_s23 }
 0x489   : > { %3998 = vst [vmem:[#allocation4 + $0x260] sm:$0xf0] %v3984_v59  ;;  %4538 = vmatprep.subr.bf16.mxu0 %v4346_v58  ;;  %4681 = vrot.lane.b32.xlu1 %v4666_v9, %s5392_s23 }
 0x48a   : > { %4539 = vmatpush1.bf16.msra.mxu0 %v4345_v36  ;;  %v2951_v10 = vpop.permute.xlu0 %2950 }
 0x48b   : > { %v3013_v14 = vpop.permute.xlu1 %3012  ;;  %v2959_v22 = vsel %vm2952_vm1, %v2949_v27, %v2951_v10  ;;  %vm7529_vm1 = vmmov %vm7514_vm0  ;;  %vm7531_vm0 = vcmask 498688  }
 0x48c   : > { %v3021_v37 = vsel %vm3014_vm4, %v3011_v45, %v3013_v14  ;;  %2973 = vst [vmem:[#allocation4 + $0xa0] sm:$0xf] %v2959_v22  ;;  %4442 = vperm.xlu0 %5318, %v4439_v5   ;;  %vm7530_vm4 = vmmov %vm7526_vm9 }
 0x48d   : > { %3035 = vst [vmem:[#allocation4 + $0xa0] sm:$0xf0] %v3021_v37  ;;  %vm7532_vm7 = vmmov %vm7531_vm0 }
 0x48e   : > { %v3071_v39 = vpop.permute.xlu0 %3070 }
 0x48f   : > { %v3073_v61 = vpop.permute.xlu1 %3072  ;;  %v3081_v8 = vsel %vm3076_vm5, %v6821_v20, %v3071_v39 }
 0x490   : > { %v3082_v52 = vsel %vm3076_vm5, %v3071_v39, %v3073_v61  ;;  %v4403_v44 = vld [vmem:[#allocation4 + $0x260] sm:$0xff]  ;;  %3095 = vst [vmem:[#allocation4 + $0xc8] sm:$0xf] %v3081_v8 }
 0x491   : > { %3096 = vst [vmem:[#allocation4 + $0xd0] sm:$0xf] %v3082_v52  ;;  %5213 = vmatprep.subr.bf16.mxu1 %v4403_v44 }
 0x492   : > { %v3133_v1 = vpop.permute.xlu0 %3132 }
 0x493   : > { %v3135_v13 = vpop.permute.xlu1 %3134  ;;  %v3143_v28 = vsel %vm7526_vm9, %v6830_v24, %v3133_v1  ;;  %vm7534_vm9 = vmmov %vm7533_vm6 }
 0x494   : > { %v3144_v27 = vsel %vm7527_vm10, %v3133_v1, %v3135_v13  ;;  %v4347_v60 = vld [vmem:[#allocation4 + $0xa0] sm:$0xff]  ;;  %3157 = vst [vmem:[#allocation4 + $0xc8] sm:$0xf0] %v3143_v28  ;;  %vm7536_vm10 = vmmov %vm7531_vm0 }
 0x495   : > { %3158 = vst [vmem:[#allocation4 + $0xd0] sm:$0xf0] %v3144_v27  ;;  %5214 = vmatpush3.bf16.msra.mxu1 %v4347_v60 }
 0x496   : > { %v7275_v56 = vpop.permute.xlu0 %4035 }
 0x497   : > { %v4038_v0 = vpop.permute.xlu1 %4037 }
 0x498   : > { %v4045_v20 = vsel %vm7528_vm15, %v7275_v56, %v4038_v0  ;;  %vm7537_vm15 = vcmask 80896  }
 0x499   : > { %4059 = vst [vmem:[#allocation4 + $0x298] sm:$0xf] %v4045_v20 }
 0x49a   : > { %v7279_v48 = vpop.permute.xlu0 %4096 }
 0x49b   : > { %v4099_v35 = vpop.permute.xlu1 %4098  ;;  %v4352_v45 = vld [vmem:[#allocation4 + $0xc8] sm:$0xff] }
 0x49c   : > { %v4106_v46 = vsel %vm7529_vm1, %v7279_v48, %v4099_v35  ;;  %v4353_v24 = vld [vmem:[#allocation4 + $0xd0] sm:$0xff]  ;;  %vm7538_vm1 = vmmov %vm7537_vm15 }
 0x49d   : > { %4120 = vst [vmem:[#allocation4 + $0x298] sm:$0xf0] %v4106_v46  ;;  %4540 = vmatprep.subr.bf16.mxu0 %v4353_v24 }
 0x49e   : > { %4541 = vmatpush1.bf16.msra.mxu0 %v4352_v45  ;;  %v3075_v7 = vpop.permute.xlu0 %3074 }
 0x49f   : > { %v3137_v34 = vpop.permute.xlu1 %3136  ;;  %v3083_v33 = vsel %vm3076_vm5, %v3073_v61, %v3075_v7  ;;  %vm7535_vm5 = vmmov %vm7533_vm6 }
 0x4a0   : > { %v3145_v32 = vsel %vm7530_vm4, %v3135_v13, %v3137_v34  ;;  %3097 = vst [vmem:[#allocation4 + $0xd8] sm:$0xf] %v3083_v33  ;;  %vm7539_vm4 = vcmask 72704  }
 0x4a1   : > { %3159 = vst [vmem:[#allocation4 + $0xd8] sm:$0xf0] %v3145_v32 }
 0x4a2   : > { %v3195_v43 = vpop.permute.xlu0 %3194 }
 0x4a3   : > { %v3197_v30 = vpop.permute.xlu1 %3196  ;;  %v3205_v57 = vsel %vm7531_vm0, %v6855_v15, %v3195_v43  ;;  %vm7540_vm0 = vmmov %vm7539_vm4 }
 0x4a4   : > { %v3206_v38 = vsel %vm7532_vm7, %v3195_v43, %v3197_v30  ;;  %v4410_v40 = vld [vmem:[#allocation4 + $0x298] sm:$0xff]  ;;  %3219 = vst [vmem:[#allocation4 + $0x100] sm:$0xf] %v3205_v57  ;;  %vm7541_vm7 = vmmov %vm7540_vm0 }
 0x4a5   : > { %3220 = vst [vmem:[#allocation4 + $0x108] sm:$0xf] %v3206_v38  ;;  %5215 = vmatprep.subr.bf16.mxu1 %v4410_v40  ;;  %v4625_v57 = vld [vmem:[%s7430_s7] sm:$0xff] }
 0x4a6   : > { %v3257_v4 = vpop.permute.xlu0 %3256  ;;  %4628 = vperm.xlu1 %5319, %v4625_v57  }
 0x4a7   : > { %v3259_v9 = vpop.permute.xlu1 %3258  ;;  %v3267_v59 = vsel %vm7533_vm6, %v6864_v12, %v3257_v4  ;;  %vm7542_vm6 = vmmov %vm7538_vm1 }
 0x4a8   : > { %v3268_v58 = vsel %vm7534_vm9, %v3257_v4, %v3259_v9  ;;  %v4354_v36 = vld [vmem:[#allocation4 + $0xd8] sm:$0xff]  ;;  %3281 = vst [vmem:[#allocation4 + $0x100] sm:$0xf0] %v3267_v59  ;;  %vm7543_vm9 = vcmask 7168  }
 0x4a9   : > { %3282 = vst [vmem:[#allocation4 + $0x108] sm:$0xf0] %v3268_v58  ;;  %5216 = vmatpush3.bf16.msra.mxu1 %v4354_v36 }
 0x4aa   : > { %v7291_v14 = vpop.permute.xlu0 %4157 }
 0x4ab   : > { %v4160_v5 = vpop.permute.xlu1 %4159 }
 0x4ac   : > { %v4168_v15 = vsel %vm4161_vm2, %v7291_v14, %v4160_v5 }
 0x4ad   : > { %4182 = vst [vmem:[#allocation4 + $0x2d0] sm:$0xf] %v4168_v15 }
 0x4ae   : > { %v7295_v37 = vpop.permute.xlu0 %4219 }
 0x4af   : > { %v4222_v10 = vpop.permute.xlu1 %4221  ;;  %v4359_v61 = vld [vmem:[#allocation4 + $0x100] sm:$0xff] }
 0x4b0   : > { %v4229_v22 = vsel %vm1248_vm11, %v7295_v37, %v4222_v10  ;;  %v4360_v12 = vld [vmem:[#allocation4 + $0x108] sm:$0xff] }
 0x4b1   : > { %4243 = vst [vmem:[#allocation4 + $0x2d0] sm:$0xf0] %v4229_v22  ;;  %4542 = vmatprep.subr.bf16.mxu0 %v4360_v12 }
 0x4b2   : > { %4543 = vmatpush1.bf16.msra.mxu0 %v4359_v61  ;;  %v3199_v8 = vpop.permute.xlu0 %3198 }
 0x4b3   : > { %v3261_v39 = vpop.permute.xlu1 %3260  ;;  %v3207_v44 = vsel %vm7536_vm10, %v3197_v30, %v3199_v8  ;;  %vm7545_vm10 = vcmask 1039360  }
 0x4b4   : > { %v3269_v52 = vsel %vm7535_vm5, %v3259_v9, %v3261_v39  ;;  %3221 = vst [vmem:[#allocation4 + $0x110] sm:$0xf] %v3207_v44  ;;  %vm7544_vm5 = vmmov %vm7543_vm9 }
 0x4b5   : > { %3283 = vst [vmem:[#allocation4 + $0x110] sm:$0xf0] %v3269_v52 }
 0x4b6   : > { %v3319_v1 = vpop.permute.xlu0 %3318 }
 0x4b7   : > { %v3321_v13 = vpop.permute.xlu1 %3320  ;;  %v3329_v28 = vsel %vm7537_vm15, %v6889_v53, %v3319_v1  ;;  %vm7546_vm15 = vmmov %vm7544_vm5 }
 0x4b8   : > { %v3330_v27 = vsel %vm7538_vm1, %v3319_v1, %v3321_v13  ;;  %v4417_v60 = vld [vmem:[#allocation4 + $0x2d0] sm:$0xff]  ;;  %3343 = vst [vmem:[#allocation4 + $0x138] sm:$0xf] %v3329_v28  ;;  %vm7547_vm1 = vcmask 973824  }
 0x4b9   : > { %3344 = vst [vmem:[#allocation4 + $0x140] sm:$0xf] %v3330_v27  ;;  %5217 = vmatprep.subr.bf16.mxu1 %v4417_v60 }
 0x4ba   : > { %v3381_v20 = vpop.permute.xlu0 %3380 }
 0x4bb   : > { %v3383_v0 = vpop.permute.xlu1 %3382  ;;  %v3391_v35 = vsel %vm7539_vm4, %v6898_v11, %v3381_v20  ;;  %vm7548_vm4 = vmmov %vm7545_vm10 }
 0x4bc   : > { %v3392_v46 = vsel %vm7540_vm0, %v3381_v20, %v3383_v0  ;;  %v4361_v24 = vld [vmem:[#allocation4 + $0x110] sm:$0xff]  ;;  %3405 = vst [vmem:[#allocation4 + $0x138] sm:$0xf0] %v3391_v35  ;;  %vm7549_vm0 = vmmov %vm7548_vm4 }
 0x4bd   : > { %3406 = vst [vmem:[#allocation4 + $0x140] sm:$0xf0] %v3392_v46  ;;  %5218 = vmatpush3.bf16.msra.mxu1 %v4361_v24 }
 0x4be   : > { %v7307_v34 = vpop.permute.xlu0 %4280 }
 0x4bf   : > { %v4283_v45 = vpop.permute.xlu1 %4282 }
 0x4c0   : > { %v4290_v53 = vsel %vm1324_vm12, %v7307_v34, %v4283_v45 }
 0x4c1   : > { %4304 = vst [vmem:[#allocation4 + $0x308] sm:$0xf] %v4290_v53 }
 0x4c2   : > { %v3323_v32 = vpop.permute.xlu0 %3322 }
 0x4c3   : > { %v3385_v7 = vpop.permute.xlu1 %3384  ;;  %v3331_v30 = vsel %vm7542_vm6, %v3321_v13, %v3323_v32  ;;  %v4366_v43 = vld [vmem:[#allocation4 + $0x138] sm:$0xff]  ;;  %vm7551_vm6 = vcmask 965632  }
 0x4c4   : > { %v3393_v33 = vsel %vm7541_vm7, %v3383_v0, %v3385_v7  ;;  %v4367_v11 = vld [vmem:[#allocation4 + $0x140] sm:$0xff]  ;;  %3345 = vst [vmem:[#allocation4 + $0x148] sm:$0xf] %v3331_v30  ;;  %vm7550_vm7 = vmmov %vm7547_vm1 }
 0x4c5   : > { %3407 = vst [vmem:[#allocation4 + $0x148] sm:$0xf0] %v3393_v33  ;;  %4544 = vmatprep.subr.bf16.mxu0 %v4367_v11 }
 0x4c6   : > { %4545 = vmatpush1.bf16.msra.mxu0 %v4366_v43  ;;  %v3443_v40 = vpop.permute.xlu0 %3442 }
 0x4c7   : > { %v3445_v38 = vpop.permute.xlu1 %3444  ;;  %v3453_v9 = vsel %vm7543_vm9, %v6918_v29, %v3443_v40  ;;  %vm7552_vm9 = vmmov %vm7551_vm6 }
 0x4c8   : > { %v3454_v4 = vsel %vm7544_vm5, %v3443_v40, %v3445_v38  ;;  %v4424_v59 = vld [vmem:[#allocation4 + $0x308] sm:$0xff]  ;;  %3467 = vst [vmem:[#allocation4 + $0x170] sm:$0xf] %v3453_v9  ;;  %vm7553_vm5 = vmmov %vm7547_vm1 }
 0x4c9   : > { %3468 = vst [vmem:[#allocation4 + $0x178] sm:$0xf] %v3454_v4  ;;  %5219 = vmatprep.subr.bf16.mxu1 %v4424_v59 }
 0x4ca   : > { %v3447_v36 = vpop.permute.xlu0 %3446 }
 0x4cb   : > { %v3541_v58 = vpop.permute.xlu1 %3540  ;;  %v3455_v15 = vsel %vm7546_vm15, %v3445_v38, %v3447_v36 }
 0x4cc   : > { %v3550_v5 = vsel %vm7545_vm10, %v6943_v49, %v3541_v58  ;;  %v4368_v10 = vld [vmem:[#allocation4 + $0x148] sm:$0xff]  ;;  %3469 = vst [vmem:[#allocation4 + $0x180] sm:$0xf] %v3455_v15  ;;  %vm7554_vm10 = vcmask 957440  }
 0x4cd   : > { %3564 = vst [vmem:[#allocation4 + $0x1a8] sm:$0xf] %v3550_v5  ;;  %5220 = vmatpush3.bf16.msra.mxu1 %v4368_v10  ;;  %vm7555_vm15 = vmmov %vm7554_vm10 }
 0x4ce   : > { %5221 = vmatprep.subr.bf16.mxu1 %v7173_v55  ;;  %v3543_v22 = vpop.permute.xlu0 %3542 }
 0x4cf   : > { %v3602_v29 = vpop.permute.xlu1 %3601  ;;  %v3551_v61 = vsel %vm7548_vm4, %v3541_v58, %v3543_v22  ;;  %v4373_v8 = vld [vmem:[#allocation4 + $0x170] sm:$0xff]  ;;  %vm4690_vm4 = vcmask 31744  }
 0x4d0   : > { %v3612_v12 = vsel %vm7547_vm1, %v6966_v31, %v3602_v29  ;;  %v4374_v39 = vld [vmem:[#allocation4 + $0x178] sm:$0xff]  ;;  %3565 = vst [vmem:[#allocation4 + $0x1b0] sm:$0xf] %v3551_v61 }
 0x4d1   : > { %3626 = vst [vmem:[#allocation4 + $0x1a8] sm:$0xf0] %v3612_v12  ;;  %4546 = vmatprep.subr.bf16.mxu0 %v4374_v39 }
 0x4d2   : > { %4547 = vmatpush1.bf16.msra.mxu0 %v4373_v8  ;;  %v3604_v52 = vpop.permute.xlu0 %3603 }
 0x4d3   : > { %v3545_v49 = vpop.permute.xlu1 %3544  ;;  %v3613_v13 = vsel %vm7550_vm7, %v3602_v29, %v3604_v52  ;;  %v4375_v1 = vld [vmem:[#allocation4 + $0x180] sm:$0xff] }
 0x4d4   : > { %v3552_v44 = vsel %vm7549_vm0, %v3543_v22, %v3545_v49  ;;  %3627 = vst [vmem:[#allocation4 + $0x1b0] sm:$0xf0] %v3613_v13  ;;  %5222 = vmatpush3.bf16.msra.mxu1 %v4375_v1 }
 0x4d5   : > { %3566 = vst [vmem:[#allocation4 + $0x1b8] sm:$0xf] %v3552_v44  ;;  %5223 = vmatprep.subr.bf16.mxu1 %v7173_v55 }
 0x4d6   : > { %v3606_v28 = vpop.permute.xlu0 %3605 }
 0x4d7   : > { %v3664_v31 = vpop.permute.xlu1 %3663  ;;  %v3614_v0 = vsel %vm7553_vm5, %v3604_v52, %v3606_v28 }
 0x4d8   : > { %v3673_v27 = vsel %vm7551_vm6, %v7000_v62, %v3664_v31  ;;  %v3674_v60 = vsel %vm7552_vm9, %v3664_v31, %v7162_v51  ;;  %3628 = vst [vmem:[#allocation4 + $0x1b8] sm:$0xf0] %v3614_v0  ;;  %v4380_v53 = vld [vmem:[#allocation4 + $0x1a8] sm:$0xff] }
 0x4d9   : > { %3687 = vst [vmem:[#allocation4 + $0x1e0] sm:$0xf] %v3673_v27  ;;  %3688 = vst [vmem:[#allocation4 + $0x1e8] sm:$0xf] %v3674_v60 }
 0x4da   : > { %v3725_v35 = vpop.permute.xlu0 %3724 }
 0x4db   : > { %v3786_v20 = vpop.permute.xlu1 %3785  ;;  %v3734_v45 = vsel %vm7554_vm10, %v7009_v17, %v3725_v35  ;;  %v3735_v62 = vsel %vm7555_vm15, %v3725_v35, %v7169_v21  ;;  %v4381_v51 = vld [vmem:[#allocation4 + $0x1b0] sm:$0xff] }
 0x4dc   : > { %v3796_v46 = vsel %vm3791_vm8, %v7034_v18, %v3786_v20  ;;  %v3797_v24 = vsel %vm3791_vm8, %v3786_v20, %v7214_v3  ;;  %3748 = vst [vmem:[#allocation4 + $0x1e0] sm:$0xf0] %v3734_v45  ;;  %3749 = vst [vmem:[#allocation4 + $0x1e8] sm:$0xf0] %v3735_v62  ;;  %4548 = vmatprep.subr.bf16.mxu0 %v4381_v51  ;;  %vm7556_vm8 = vcmask 457728  }
 0x4dd   : > { %3810 = vst [vmem:[#allocation4 + $0x218] sm:$0xf] %v3796_v46  ;;  %3811 = vst [vmem:[#allocation4 + $0x220] sm:$0xf] %v3797_v24  ;;  %4549 = vmatpush1.bf16.msra.mxu0 %v4380_v53 }
 0x4de   : > { %v3848_v32 = vpop.permute.xlu0 %3847  ;;  %vm7557_vm1 = vmmov %vm7556_vm8 }
 0x4df   : > { %v3910_v7 = vpop.permute.xlu1 %3909  ;;  %v3858_v17 = vsel %vm3853_vm3, %v7043_v26, %v3848_v32  ;;  %v3859_v21 = vsel %vm3853_vm3, %v3848_v32, %v7224_v63  ;;  %v4382_v33 = vld [vmem:[#allocation4 + $0x1b8] sm:$0xff]  ;;  %vm7558_vm3 = vcmask 449536  }
 0x4e0   : > { %v3920_v18 = vsel %vm3915_vm14, %v7068_v16, %v3910_v7  ;;  %v3921_v3 = vsel %vm3915_vm14, %v3910_v7, %v7251_v54  ;;  %3872 = vst [vmem:[#allocation4 + $0x218] sm:$0xf0] %v3858_v17  ;;  %3873 = vst [vmem:[#allocation4 + $0x220] sm:$0xf0] %v3859_v21  ;;  %5224 = vmatpush3.bf16.msra.mxu1 %v4382_v33 }
 0x4e1   : > { %3934 = vst [vmem:[#allocation4 + $0x250] sm:$0xf] %v3920_v18  ;;  %3935 = vst [vmem:[#allocation4 + $0x258] sm:$0xf] %v3921_v3 }
 0x4e2   : > { %v3972_v11 = vpop.permute.xlu0 %3971  ;;  %vm7559_vm14 = vmmov %vm7558_vm3 }
 0x4e3   : > { %v4034_v30 = vpop.permute.xlu1 %4033  ;;  %v3982_v26 = vsel %vm3977_vm13, %v7077_v47, %v3972_v11  ;;  %v3983_v63 = vsel %vm3977_vm13, %v3972_v11, %v7258_v23  ;;  %4608 = vmatmul.mubr.bf16.vlgmr.msra.gmra.mrb[12].mxu1 %v7191_v19  ;;  %v4388_v43 = vld [vmem:[#allocation4 + $0x1e8] sm:$0xff]  ;;  %v4387_v57 = vld [vmem:[#allocation4 + $0x1e0] sm:$0xff]  ;;  %vm4694_vm13 = vcmask 1041408  }
 0x4e4   : > { %v4043_v16 = vsel %vm7556_vm8, %v7102_v2, %v4034_v30  ;;  %v4044_v54 = vsel %vm7557_vm1, %v4034_v30, %v7275_v56  ;;  %3996 = vst [vmem:[#allocation4 + $0x250] sm:$0xf0] %v3982_v26  ;;  %3997 = vst [vmem:[#allocation4 + $0x258] sm:$0xf0] %v3983_v63  ;;  %4550 = vmatprep.subr.bf16.mxu0 %v4388_v43  ;;  %4748 = vmatprep.mubr.bf16.mxu1 %v7173_v55 }
 0x4e5   : > { %4057 = vst [vmem:[#allocation4 + $0x288] sm:$0xf] %v4043_v16  ;;  %4058 = vst [vmem:[#allocation4 + $0x290] sm:$0xf] %v4044_v54  ;;  %4551 = vmatpush1.bf16.msra.mxu0 %v4387_v57 }
 0x4e6   : > { %v4095_v56 = vpop.permute.xlu0 %4094 }
 0x4e7   : > { %v4668_v2 = vpop.permute.xlu1 %4667  ;;  %v4104_v47 = vsel %vm7558_vm3, %v7111_v25, %v4095_v56  ;;  %v4105_v23 = vsel %vm7559_vm14, %v4095_v56, %v7279_v48  ;;  %v4395_v38 = vld [vmem:[#allocation4 + $0x220] sm:$0xff]  ;;  %v4394_v40 = vld [vmem:[#allocation4 + $0x218] sm:$0xff]  ;;  %v4624_v48 = vld [vmem:[%s7429_s6] sm:$0xf] }
 0x4e8   : > { %4118 = vst [vmem:[#allocation4 + $0x288] sm:$0xf0] %v4104_v47  ;;  %4119 = vst [vmem:[#allocation4 + $0x290] sm:$0xf0] %v4105_v23  ;;  %4552 = vmatprep.subr.bf16.mxu0 %v4395_v38 }
 0x4e9   : > { %4553 = vmatpush1.bf16.msra.mxu0 %v4394_v40 }
 0x4ea   : > { %v4670_v4 = vpop.permute.xlu0 %4669 }
 0x4eb   : > { %v4672_v9 = vpop.permute.xlu1 %4671  ;;  %v4683_v59 = vsel %vm1324_vm12, %v4668_v2, %v4670_v4  ;;  %v4402_v36 = vld [vmem:[#allocation4 + $0x258] sm:$0xff]  ;;  %v4401_v5 = vld [vmem:[#allocation4 + $0x250] sm:$0xff] }
 0x4ec   : > { %v4684_v58 = vsel %vm1324_vm12, %v4670_v4, %v4672_v9  ;;  %v4696_v25 = vsel %vm4694_vm13, %v4683_v59, 0  ;;  %4554 = vmatprep.subr.bf16.mxu0 %v4402_v36 }
 0x4ed   : > { %5187 = vmatprep.subr.msk.bf16.mxu1 %vm4694_vm13, %v4684_v58  ;;  %4555 = vmatpush1.bf16.msra.mxu0 %v4401_v5 }
 0x4ee   : > { %4717 = vmatpush1.bf16.msra.mxu1 %v4696_v25  ;;  %v4156_v10 = vpop.permute.xlu0 %4155 }
 0x4ef   : > { %v4218_v15 = vpop.permute.xlu1 %4217  ;;  %v4166_v12 = vsel %vm4161_vm2, %v7136_v6, %v4156_v10  ;;  %v4167_v61 = vsel %vm4161_vm2, %v4156_v10, %v7291_v14  ;;  %v4409_v39 = vld [vmem:[#allocation4 + $0x290] sm:$0xff]  ;;  %v4408_v8 = vld [vmem:[#allocation4 + $0x288] sm:$0xff] }
 0x4f0   : > { %v4227_v29 = vsel %vm1248_vm11, %v7145_v50, %v4218_v15  ;;  %v4228_v22 = vsel %vm1248_vm11, %v4218_v15, %v7295_v37  ;;  %4180 = vst [vmem:[#allocation4 + $0x2c0] sm:$0xf] %v4166_v12  ;;  %4181 = vst [vmem:[#allocation4 + $0x2c8] sm:$0xf] %v4167_v61  ;;  %4556 = vmatprep.subr.bf16.mxu0 %v4409_v39  ;;  %vm7560_vm11 = vmmov 0  }
 0x4f1   : > { %4241 = vst [vmem:[#allocation4 + $0x2c0] sm:$0xf0] %v4227_v29  ;;  %4242 = vst [vmem:[#allocation4 + $0x2c8] sm:$0xf0] %v4228_v22  ;;  %5188 = vmatmul.mubr.msk.bf16.vlgmr.msra.gmra.mrb[16].mxu1 %vm4690_vm4, %v4624_v48  ;;  %4557 = vmatpush1.bf16.msra.mxu0 %v4408_v8 }
 0x4f2   : > { %4789 = vmatprep.mubr.bf16.mxu1 %v7173_v55  ;;  %v4279_v37 = vpop.permute.xlu0 %4278 }
 0x4f3   : > { %v4674_v50 = vpop.permute.xlu1 %4673  ;;  %v4288_v6 = vsel %vm1324_vm12, %v7155_v41, %v4279_v37  ;;  %v4289_v14 = vsel %vm1324_vm12, %v4279_v37, %v7307_v34 }
 0x4f4   : > { %4302 = vst [vmem:[#allocation4 + $0x2f8] sm:$0xf] %v4288_v6  ;;  %4303 = vst [vmem:[#allocation4 + $0x300] sm:$0xf] %v4289_v14  ;;  %v4685_v49 = vsel %vm1324_vm12, %v4672_v9, %v4674_v50 }
 0x4f5   : > { %v4702_v28 = vsel %vm4694_vm13, %v4685_v49, 0 }
 0x4f6   : > { %v4676_v52 = vpop.permute.xlu0 %4675 }
 0x4f7   : > { %v4678_v44 = vpop.permute.xlu1 %4677  ;;  %v4686_v13 = vsel %vm1324_vm12, %v4674_v50, %v4676_v52 }
 0x4f8   : > { %v4416_v1 = vld [vmem:[#allocation4 + $0x2c8] sm:$0xff]  ;;  %v4415_v31 = vld [vmem:[#allocation4 + $0x2c0] sm:$0xff]  ;;  %5189 = vmatprep.subr.msk.bf16.mxu1 %vm4694_vm13, %v4686_v13  ;;  %v4687_v41 = vsel %vm1324_vm12, %v4676_v52, %v4678_v44 }
 0x4f9   : > { %4558 = vmatprep.subr.bf16.mxu0 %v4416_v1  ;;  %4758 = vmatpush1.bf16.msra.mxu1 %v4702_v28  ;;  %v4708_v20 = vsel %vm4694_vm13, %v4687_v41, 0 }
 0x4fa   : > { %4559 = vmatpush1.bf16.msra.mxu0 %v4415_v31  ;;  %v4680_v34 = vpop.permute.xlu0 %4679 }
 0x4fb   : > { %v4688_v27 = vsel %vm1324_vm12, %v4678_v44, %v4680_v34  ;;  %v4423_v60 = vld [vmem:[#allocation4 + $0x300] sm:$0xff]  ;;  %v4422_v0 = vld [vmem:[#allocation4 + $0x2f8] sm:$0xff]  ;;  %v4682_v35 = vpop.permute.xlu1 %4681 }
 0x4fc   : > { %4560 = vmatprep.subr.bf16.mxu0 %v4423_v60  ;;  %5190 = vmatmul.mubr.msk.bf16.vlgmr.msra.gmra.mrb[20].mxu1 %vm4690_vm4, %v4624_v48  ;;  %v4689_v46 = vsel %vm1324_vm12, %v4680_v34, %v4682_v35 }
 0x4fd   : > { %5191 = vmatprep.subr.msk.bf16.mxu1 %vm4694_vm13, %v4688_v27  ;;  %4830 = vmatprep.mubr.bf16.mxu1 %v7173_v55  ;;  %v4714_v24 = vsel %vm4694_vm13, %v4689_v46, 0 }
 0x4fe   : > { %4561 = vmatpush1.bf16.msra.mxu0 %v4422_v0  ;;  %4799 = vmatpush1.bf16.msra.mxu1 %v4708_v20 }
 0x4ff   : > { %4562 = vmatprep.subr.bf16.mxu0 %v7173_v55  ;;  %5253 = vmatprep.subr.bf16.mxu1 %v5407_v42 }
 0x502   : > { %4563 = vmatpush1.bf16.msra.mxu0 %v7173_v55 }
 0x503   : > { %4564 = vmatprep.subr.bf16.mxu0 %v7173_v55 }
 0x504   : > { %5192 = vmatmul.mubr.msk.bf16.vlgmr.msra.gmra.mrb[24].mxu1 %vm4690_vm4, %v4624_v48 }
 0x505   : > { %5254 = vmatpush3.bf16.msra.mxu1 %v4714_v24  ;;  %5255 = vmatprep.mubr.msk.bf16.mxu1 %vm7560_vm11, %v5407_v42 }
 0x506   : > { %4565 = vmatpush1.bf16.msra.mxu0 %v7173_v55 }
 0x509   : > { %4567 = vmatmul.mubr.bf16.vlgmr.msra.gmra.mrb[12].mxu0 %v7191_v19 }
 0x50b   : > { %v4443_v11 = vpop.permute.xlu0 %4442 }
 0x50c   : > { %5256 = vmatmul.mubr.msk.bf16.vlgmr.msra.gmra.mrb[28].mxu1 %vm4690_vm4, %v4624_v48 }
 0x525   : > { %v4629_v19 = vpop.permute.xlu1 %4628 }
 0x53c   : > { %v4486_v45 = vpop.f32.mrb[8].mxu0 }
 0x53d   : > { %v4488_v62 = vpop.f32.mrb[9].mxu0  ;;  %v4487_v42 = vadd.f32 %v4486_v45, %v4443_v11 }
 0x53e   : > { %v4490_v51 = vpop.f32.mrb[10].mxu0  ;;  %v4489_v16 = vadd.f32 %v4488_v62, %v4443_v11 }
 0x53f   : > { %v4491_v53 = vpop.f32.mrb[11].mxu0  ;;  %v4615_v26 = vmax.f32 %v4487_v42, 0.0 }
 0x540   : > { %v4527_v7 = vpop.f32.mrb[8].mxu1  ;;  %v4616_v57 = vmax.f32 %v4489_v16, 0.0 }
 0x541   : > { %v4529_v32 = vpop.f32.mrb[9].mxu1  ;;  %v4528_v4 = vadd.f32 %v4527_v7, %v4443_v11 }
 0x542   : > { %v4531_v18 = vpop.f32.mrb[10].mxu1  ;;  %v4530_v59 = vadd.f32 %v4529_v32, %v4443_v11 }
 0x543   : > { %v4532_v3 = vpop.f32.mrb[11].mxu1  ;;  %v4617_v36 = vmax.f32 %v4528_v4, 0.0 }
 0x544   : > { %v4618_v48 = vmax.f32 %v4530_v59, 0.0 }
 0x5b6   : > { %v5225_v17 = vpop.f32.mrb[12].mxu1 }
 0x5b7   : > { %v5226_v21 = vpop.f32.mrb[13].mxu1 }
 0x5b8   : > { %v5227_v33 = vadd.f32 %v5226_v21, %v5225_v17  ;;  %v5228_v55 = vpop.f32.mrb[14].mxu1 }
 0x5b9   : > { %v5229_v30 = vpop.f32.mrb[15].mxu1 }
 0x5ba   : > { %v4610_v49 = vadd.f32 %v5227_v33, %v4443_v11 }
 0x5bc   : > { %v4621_v0 = vmax.f32 %v4610_v49, 0.0 }
 0x5c4   : > { %v4750_v54 = vpop.f32.mrb[16].mxu1 }
 0x5c5   : > { %v4751_v63 = vadd.f32 %v4750_v54, %v4629_v19  ;;  %v4752_v43 = vpop.f32.mrb[17].mxu1 }
 0x5c6   : > { %v4753_v2 = vadd.f32 %v4752_v43, %v4629_v19  ;;  %v4754_v56 = vpop.f32.mrb[18].mxu1 }
 0x5c7   : > { %v4879_v47 = vadd.f32 %v4751_v63, %v4615_v26  ;;  %v4755_v23 = vpop.f32.mrb[19].mxu1 }
 0x5c8   : > { %v4880_v38 = vadd.f32 %v4753_v2, %v4616_v57 }
 0x5c9   : > { %v4886_v40 = vmax.f32 %v4879_v47, 0.0 }
 0x5ca   : > { %v4887_v9 = vmax.f32 %v4880_v38, 0.0 }
 0x5cb   : > { %4893 = vst [vmem:[%s7411_s11] sm:$0xff] %v4886_v40 }
 0x5cc   : > { %4894 = vst [vmem:[%s7411_s11 + $0x8] sm:$0xff] %v4887_v9 }
 0x5cf   : > { %v4791_v58 = vpop.f32.mrb[20].mxu1 }
 0x5d0   : > { %v4792_v5 = vadd.f32 %v4791_v58, %v4629_v19  ;;  %v4793_v25 = vpop.f32.mrb[21].mxu1 }
 0x5d1   : > { %v4794_v15 = vadd.f32 %v4793_v25, %v4629_v19  ;;  %v4795_v10 = vpop.f32.mrb[22].mxu1 }
 0x5d2   : > { %v4881_v29 = vadd.f32 %v4792_v5, %v4617_v36  ;;  %v4796_v22 = vpop.f32.mrb[23].mxu1 }
 0x5d3   : > { %v4882_v12 = vadd.f32 %v4794_v15, %v4618_v48 }
 0x5d4   : > { %v4888_v61 = vmax.f32 %v4881_v29, 0.0 }
 0x5d5   : > { %v4889_v39 = vmax.f32 %v4882_v12, 0.0 }
 0x5d6   : > { %4895 = vst [vmem:[%s7411_s11 + $0x10] sm:$0xff] %v4888_v61 }
 0x5d7   : > { %4896 = vst [vmem:[%s7411_s11 + $0x18] sm:$0xff] %v4889_v39  ;;  %v4832_v8 = vpop.f32.mrb[24].mxu1 }
 0x5d8   : > { %v4834_v50 = vpop.f32.mrb[25].mxu1  ;;  %v4833_v31 = vadd.f32 %v4832_v8, %v4629_v19 }
 0x5d9   : > { %v4836_v37 = vpop.f32.mrb[26].mxu1  ;;  %v4835_v34 = vadd.f32 %v4834_v50, %v4629_v19 }
 0x5da   : > { %v4837_v6 = vpop.f32.mrb[27].mxu1 }
 0x5dc   : > { %v4568_v14 = vpop.f32.mrb[12].mxu0 }
 0x5dd   : > { %v4569_v52 = vadd.f32 %v4568_v14, %v4443_v11  ;;  %v4570_v44 = vpop.f32.mrb[13].mxu0 }
 0x5de   : > { %v4571_v13 = vadd.f32 %v4570_v44, %v4443_v11  ;;  %v4572_v1 = vpop.f32.mrb[14].mxu0 }
 0x5df   : > { %v4619_v28 = vmax.f32 %v4569_v52, 0.0  ;;  %v4573_v41 = vpop.f32.mrb[15].mxu0  ;;  %v4873_v60 = vpop.f32.mrb[28].mxu1 }
 0x5e0   : > { %v4620_v27 = vmax.f32 %v4571_v13, 0.0  ;;  %v4874_v35 = vadd.f32 %v4873_v60, %v4629_v19  ;;  %v5257_v46 = vpop.f32.mrb[29].mxu1 }
 0x5e1   : > { %v4883_v20 = vadd.f32 %v4833_v31, %v4619_v28  ;;  %v4876_v45 = vpop.f32.mrb[30].mxu1 }
 0x5e2   : > { %v4884_v24 = vadd.f32 %v4835_v34, %v4620_v27  ;;  %v4885_v51 = vadd.f32 %v4874_v35, %v4621_v0  ;;  %v5258_v53 = vpop.f32.mrb[31].mxu1 }
 0x5e3   : > { %v4890_v62 = vmax.f32 %v4883_v20, 0.0 }
 0x5e4   : > { %v4891_v7 = vmax.f32 %v4884_v24, 0.0  ;;  %v4892_v32 = vmax.f32 %v4885_v51, 0.0 }
 0x5e5   : > { %4897 = vst [vmem:[%s7411_s11 + $0x20] sm:$0xff] %v4890_v62 }
 0x5e6   : > { %4898 = vst [vmem:[%s7411_s11 + $0x28] sm:$0xff] %v4891_v7  ;;  %4899 = vst [vmem:[%s7411_s11 + $0x30] sm:$0xff] %v4892_v32 }
 0x5e7 PF: > { %s18_s27 = sadd.s32 1, %s5377_s27  }
 0x5e8   : > { %p15_p4 = scmp.ge.s32.totalorder %s18_s27, 4  }
 0x5ea   :  { %17 = sbr.rel (!%p15_p4) target bundleno = 1 (0x1), region = 82 }

</bundles_post_ra>
